<compile_context>
chip_gen: v6e
topology: v6e:2x2x1
jax: 0.10.0
libtpu: 0.0.40
codegen_flags: <defaults>
</compile_context>

<pallas_src>
import functools

import jax
import jax.numpy as jnp
import numpy as np
from jax.experimental import pallas as pl
from jax.experimental.pallas import tpu as pltpu


def gru_mae_kernel(xt_ref, cid_ref,
                   wih_f_ref, bih_f_ref, whh_f_ref, bhh_f_ref,
                   wih_v_ref, bih_v_ref, whh_v_ref, bhh_v_ref,
                   lw_ref, lb_ref,
                   out_ref, *, seq_len, hidden, num_combinations):
    L, H, C = seq_len, hidden, num_combinations

    xt = xt_ref[...]                    # (L, B) time-major sequence
    cid = cid_ref[...]                  # (B, 1) int32
    B = xt.shape[1]

    wih_f = wih_f_ref[...]              # (1, 3H)
    bih_f = bih_f_ref[...]              # (1, 3H)
    whh_f = whh_f_ref[...]              # (H, 3H)
    bhh_f = bhh_f_ref[...]              # (1, 3H)

    def gru_step(gi, h, whh, bhh):
        """One GRU step with fused gates.

        gi : (B, 3H) precomputed input-gate terms (inp * W_ih + b_ih)
        h  : (B, H)  previous hidden state
        whh: (H, 3H) fused hidden->hidden weights (transposed), bhh: (1, 3H)
        """
        gh = jnp.dot(h, whh, preferred_element_type=jnp.float32) + bhh  # (B, 3H)
        r = jax.nn.sigmoid(gi[:, 0 * H:1 * H] + gh[:, 0 * H:1 * H])
        z = jax.nn.sigmoid(gi[:, 1 * H:2 * H] + gh[:, 1 * H:2 * H])
        n = jnp.tanh(gi[:, 2 * H:3 * H] + r * gh[:, 2 * H:3 * H])
        return (1.0 - z) * n + z * h

    # ---- fixed encoder GRU: shared by every combination, computed ONCE ----
    # input-gate terms for all L encoder steps precomputed in one VPU op.
    gi_enc = xt[:, :, None] * wih_f[None, :, :] + bih_f[None, :, :]     # (L, B, 3H)
    h = jnp.zeros((B, H), dtype=jnp.float32)
    for t in range(L):
        h = gru_step(gi_enc[t], h, whh_f, bhh_f)
    h_enc = h                                                           # (B, H)

    # ---- per-combination variable decoder (teacher forcing, training) ----
    out = jnp.zeros((B, L), dtype=jnp.float32)
    for c in range(C):
        wih_c = wih_v_ref[c]            # (1, 3H)
        bih_c = bih_v_ref[c]            # (1, 3H)
        whh_c = whh_v_ref[c]            # (H, 3H)
        bhh_c = bhh_v_ref[c]            # (1, 3H)
        lw_c = lw_ref[c]                # (1, H)
        lb_c = lb_ref[c]                # (1, 1)

        # Step 0's input is Linear_c(h_enc); steps >= 1 are teacher-forced
        # with known x columns.  Hence ALL decoder input-gate terms are
        # computable before the serial recurrence starts.
        inp0 = jnp.sum(h_enc * lw_c, axis=-1, keepdims=True) + lb_c     # (B, 1)
        gi0 = inp0 * wih_c + bih_c                                      # (B, 3H)
        gi_tf = xt[:, :, None] * wih_c[None, :, :] + bih_c[None, :, :]  # (L, B, 3H)

        h = h_enc
        h_rev = [None] * L
        for s in range(L):
            gi = gi0 if s == 0 else gi_tf[L - s]   # teacher input = x[:, L-s]
            h = gru_step(gi, h, whh_c, bhh_c)
            h_rev[L - 1 - s] = h                   # store already time-flipped

        # Batched emission after the recurrence: one multiply+reduce for all
        # L steps instead of an in-loop XLU reduction + column concat.
        hs = jnp.stack(h_rev, axis=1)                                   # (B, L, H)
        emit = jnp.sum(hs * lw_c[None, :, :], axis=-1) + lb_c           # (B, L)

        # only samples belonging to this combination take the new values
        out = jnp.where(cid == c, emit, out)

    out_ref[...] = out                  # single dense (B, L) store


def gru_mae_forward(x, params, *, encoding_size, sequence_length, num_combinations):
    B = x.shape[0]
    L = sequence_length
    H = encoding_size
    C = num_combinations
    G = 3 * H

    x_t = jnp.transpose(x[:, :L].astype(jnp.float32))   # (L, B) time-major
    cid = x[:, L].astype(jnp.int32).reshape(B, 1)

    kernel = functools.partial(gru_mae_kernel, seq_len=L, hidden=H,
                               num_combinations=C)

    def full(shape):
        # full-array block, single grid step -> everything VMEM-resident once
        return pl.BlockSpec(shape, lambda i, _s=len(shape): (0,) * _s)

    grid_spec = pltpu.PrefetchScalarGridSpec(
        num_scalar_prefetch=0,
        grid=(1,),
        in_specs=[
            full((L, B)),        # x_t
            full((B, 1)),        # cid
            full((1, G)),        # wih_f  (fused gates)
            full((1, G)),        # bih_f
            full((H, G)),        # whh_f  (fused + transposed)
            full((1, G)),        # bhh_f
            full((C, 1, G)),     # wih_v  (stacked per combination)
            full((C, 1, G)),     # bih_v
            full((C, H, G)),     # whh_v
            full((C, 1, G)),     # bhh_v
            full((C, 1, H)),     # lin_w
            full((C, 1, 1)),     # lin_b
        ],
        out_specs=full((B, L)),
    )

    # TODO(synk): for production sizes, add a "parallel" batch-tile grid axis
    # (v7x megacore) and consider bf16 MXU operands on v6e/v7x.
    return pl.pallas_call(
        kernel,
        out_shape=jax.ShapeDtypeStruct((B, L), jnp.float32),
        grid_spec=grid_spec,
        compiler_params=pltpu.CompilerParams(dimension_semantics=("arbitrary",)),
    )(x_t, cid,
      params["wih_f"], params["bih_f"], params["whh_f"], params["bhh_f"],
      params["wih_v"], params["bih_v"], params["whh_v"], params["bhh_v"],
      params["lin_w"], params["lin_b"])


def make_pt_params(key, H, C):
    """Deterministic synthetic parameters in the PyTorch layout.

    GRU weight_ih (3H, 1), weight_hh (3H, H), biases (3H,);
    Linear weight (1, H), bias (1,).  Gate order (r, z, n).
    """
    ks = jax.random.split(key, 10)
    s = 1.0 / np.sqrt(H)

    def u(k, shape):
        return jax.random.uniform(k, shape, jnp.float32, -s, s)

    return {
        "wih_f": u(ks[0], (3 * H, 1)),
        "whh_f": u(ks[1], (3 * H, H)),
        "bih_f": u(ks[2], (3 * H,)),
        "bhh_f": u(ks[3], (3 * H,)),
        "wih_v": u(ks[4], (C, 3 * H, 1)),
        "whh_v": u(ks[5], (C, 3 * H, H)),
        "bih_v": u(ks[6], (C, 3 * H)),
        "bhh_v": u(ks[7], (C, 3 * H)),
        "lin_w": u(ks[8], (C, 1, H)),
        "lin_b": u(ks[9], (C, 1)),
    }


def to_kernel_params(pt):
    """Convert PyTorch-layout params to the fused/transposed kernel layout."""
    C, G, H = pt["whh_v"].shape
    return {
        "wih_f": pt["wih_f"].reshape(1, G),
        "bih_f": pt["bih_f"].reshape(1, G),
        "whh_f": jnp.transpose(pt["whh_f"]),                 # (H, 3H)
        "bhh_f": pt["bhh_f"].reshape(1, G),
        "wih_v": pt["wih_v"].reshape(C, 1, G),
        "bih_v": pt["bih_v"].reshape(C, 1, G),
        "whh_v": jnp.transpose(pt["whh_v"], (0, 2, 1)),      # (C, H, 3H)
        "bhh_v": pt["bhh_v"].reshape(C, 1, G),
        "lin_w": pt["lin_w"],                                # (C, 1, H)
        "lin_b": pt["lin_b"].reshape(C, 1, 1),
    }


def reference_forward(x, pt, L, H, C):
    """Pure NumPy reference mirroring the PyTorch module (training + teacher forcing)."""
    x = np.asarray(x, np.float32)
    p = {k: np.asarray(v, np.float32) for k, v in pt.items()}
    B = x.shape[0]
    out = np.zeros((B, L), np.float32)

    def sigmoid(v):
        return 1.0 / (1.0 + np.exp(-v))

    def cell(inp, h, w_ih, b_ih, w_hh, b_hh):
        gi = w_ih[:, 0] * inp + b_ih                 # (3H,)
        gh = w_hh @ h + b_hh                         # (3H,)
        r = sigmoid(gi[:H] + gh[:H])
        z = sigmoid(gi[H:2 * H] + gh[H:2 * H])
        n = np.tanh(gi[2 * H:] + r * gh[2 * H:])
        return (1.0 - z) * n + z * h

    for b in range(B):
        c = int(x[b, L])
        seq = x[b, :L]
        h = np.zeros(H, np.float32)
        for t in range(L):
            h = cell(seq[t], h, p["wih_f"], p["bih_f"], p["whh_f"], p["bhh_f"])
        lw, lb = p["lin_w"][c, 0], float(p["lin_b"][c, 0])
        inp = float(lw @ h + lb)
        emitted = []
        for s in range(L):
            h = cell(inp, h, p["wih_v"][c], p["bih_v"][c],
                     p["whh_v"][c], p["bhh_v"][c])
            emitted.append(float(lw @ h + lb))
            inp = float(seq[L - 1 - s])              # teacher forcing
        out[b] = np.array(emitted[::-1], np.float32)
    return out


if __name__ == "__main__":
    B, L, H, C = 8, 8, 32, 3   # batch, sequence_length, encoding_size, #combinations

    key = jax.random.PRNGKey(0)
    k_par, k_seq, k_cid = jax.random.split(key, 3)

    pt_params = make_pt_params(k_par, H, C)
    params = to_kernel_params(pt_params)

    seq = jax.random.normal(k_seq, (B, L), jnp.float32)
    cids = jax.random.randint(k_cid, (B,), 0, C).astype(jnp.float32)
    # x matches the PyTorch input convention: (B, L+1), last column = combination id
    x = jnp.concatenate([seq, cids[:, None]], axis=1)

    out = gru_mae_forward(x, params, encoding_size=H,
                          sequence_length=L, num_combinations=C)
    out = jax.block_until_ready(out)

    ref = reference_forward(np.asarray(x), pt_params, L, H, C)
    np.testing.assert_allclose(np.asarray(out), ref, rtol=1e-2, atol=1e-2)

    print("KERNEL_OK")
</pallas_src>

<mosaic_0001>
module attributes {stable_mosaic.version = 11 : i64} {
  func.func @gru_mae_kernel(%arg0: i32, %arg1: memref<8x8xf32, #tpu.memory_space<vmem>>, %arg2: memref<8x1xi32, #tpu.memory_space<vmem>>, %arg3: memref<1x96xf32, #tpu.memory_space<vmem>>, %arg4: memref<1x96xf32, #tpu.memory_space<vmem>>, %arg5: memref<32x96xf32, #tpu.memory_space<vmem>>, %arg6: memref<1x96xf32, #tpu.memory_space<vmem>>, %arg7: memref<3x1x96xf32, #tpu.memory_space<vmem>>, %arg8: memref<3x1x96xf32, #tpu.memory_space<vmem>>, %arg9: memref<3x32x96xf32, #tpu.memory_space<vmem>>, %arg10: memref<3x1x96xf32, #tpu.memory_space<vmem>>, %arg11: memref<3x1x32xf32, #tpu.memory_space<vmem>>, %arg12: memref<3x1x1xf32, #tpu.memory_space<vmem>>, %arg13: memref<8x8xf32, #tpu.memory_space<vmem>>) attributes {dimension_semantics = [#tpu.dimension_semantics<arbitrary>], iteration_bounds = array<i64: 1>, scalar_prefetch = 0 : i64, scratch_operands = 0 : i64, tpu.core_type = #tpu.core_type<tc>, window_params = [{pipeline_mode = #tpu.pipeline_mode<synchronous>, transform_indices = @transform_0, window_bounds = array<i64: 8, 8>}, {pipeline_mode = #tpu.pipeline_mode<synchronous>, transform_indices = @transform_1, window_bounds = array<i64: 8, 1>}, {pipeline_mode = #tpu.pipeline_mode<synchronous>, transform_indices = @transform_2, window_bounds = array<i64: 1, 96>}, {pipeline_mode = #tpu.pipeline_mode<synchronous>, transform_indices = @transform_3, window_bounds = array<i64: 1, 96>}, {pipeline_mode = #tpu.pipeline_mode<synchronous>, transform_indices = @transform_4, window_bounds = array<i64: 32, 96>}, {pipeline_mode = #tpu.pipeline_mode<synchronous>, transform_indices = @transform_5, window_bounds = array<i64: 1, 96>}, {pipeline_mode = #tpu.pipeline_mode<synchronous>, transform_indices = @transform_6, window_bounds = array<i64: 3, 1, 96>}, {pipeline_mode = #tpu.pipeline_mode<synchronous>, transform_indices = @transform_7, window_bounds = array<i64: 3, 1, 96>}, {pipeline_mode = #tpu.pipeline_mode<synchronous>, transform_indices = @transform_8, window_bounds = array<i64: 3, 32, 96>}, {pipeline_mode = #tpu.pipeline_mode<synchronous>, transform_indices = @transform_9, window_bounds = array<i64: 3, 1, 96>}, {pipeline_mode = #tpu.pipeline_mode<synchronous>, transform_indices = @transform_10, window_bounds = array<i64: 3, 1, 32>}, {pipeline_mode = #tpu.pipeline_mode<synchronous>, transform_indices = @transform_11, window_bounds = array<i64: 3, 1, 1>}, {pipeline_mode = #tpu.pipeline_mode<synchronous>, transform_indices = @transform_12, window_bounds = array<i64: 8, 8>}]} {
    %c0 = arith.constant 0 : index
    %c0_0 = arith.constant 0 : index
    %0 = vector.load %arg1[%c0, %c0_0] : memref<8x8xf32, #tpu.memory_space<vmem>>, vector<8x8xf32>
    %c0_1 = arith.constant 0 : index
    %c0_2 = arith.constant 0 : index
    %1 = vector.load %arg2[%c0_1, %c0_2] : memref<8x1xi32, #tpu.memory_space<vmem>>, vector<8x1xi32>
    %c0_3 = arith.constant 0 : index
    %c0_4 = arith.constant 0 : index
    %2 = vector.load %arg3[%c0_3, %c0_4] : memref<1x96xf32, #tpu.memory_space<vmem>>, vector<1x96xf32>
    %c0_5 = arith.constant 0 : index
    %c0_6 = arith.constant 0 : index
    %3 = vector.load %arg4[%c0_5, %c0_6] : memref<1x96xf32, #tpu.memory_space<vmem>>, vector<1x96xf32>
    %c0_7 = arith.constant 0 : index
    %c0_8 = arith.constant 0 : index
    %4 = vector.load %arg5[%c0_7, %c0_8] : memref<32x96xf32, #tpu.memory_space<vmem>>, vector<32x96xf32>
    %c0_9 = arith.constant 0 : index
    %c0_10 = arith.constant 0 : index
    %5 = vector.load %arg6[%c0_9, %c0_10] : memref<1x96xf32, #tpu.memory_space<vmem>>, vector<1x96xf32>
    %6 = vector.shape_cast %0 : vector<8x8xf32> to vector<8x8x1xf32>
    %7 = vector.shape_cast %2 : vector<1x96xf32> to vector<1x1x96xf32>
    %8 = vector.broadcast %6 : vector<8x8x1xf32> to vector<8x8x96xf32>
    %9 = vector.broadcast %7 : vector<1x1x96xf32> to vector<8x8x96xf32>
    %10 = arith.mulf %8, %9 : vector<8x8x96xf32>
    %11 = vector.shape_cast %3 : vector<1x96xf32> to vector<1x1x96xf32>
    %12 = vector.broadcast %11 : vector<1x1x96xf32> to vector<8x8x96xf32>
    %13 = arith.addf %10, %12 : vector<8x8x96xf32>
    %cst = arith.constant 0.000000e+00 : f32
    %14 = vector.broadcast %cst : f32 to vector<8x32xf32>
    %15 = vector.extract_strided_slice %13 {offsets = [0, 0, 0], sizes = [1, 8, 96], strides = [1, 1, 1]} : vector<8x8x96xf32> to vector<1x8x96xf32>
    %16 = vector.shape_cast %15 : vector<1x8x96xf32> to vector<8x96xf32>
    %cst_11 = arith.constant dense<0.000000e+00> : vector<8x96xf32>
    %17 = tpu.matmul %14, %4, %cst_11 {dimension_numbers = #tpu.dot_dimension_numbers<[1], [0], [0], [1], [0, 0, 1, 1], [], []>} : vector<8x32xf32>, vector<32x96xf32>, vector<8x96xf32> -> vector<8x96xf32>
    %18 = vector.broadcast %5 : vector<1x96xf32> to vector<8x96xf32>
    %19 = arith.addf %17, %18 : vector<8x96xf32>
    %20 = vector.extract_strided_slice %16 {offsets = [0, 0], sizes = [8, 32], strides = [1, 1]} : vector<8x96xf32> to vector<8x32xf32>
    %21 = vector.extract_strided_slice %19 {offsets = [0, 0], sizes = [8, 32], strides = [1, 1]} : vector<8x96xf32> to vector<8x32xf32>
    %22 = arith.addf %20, %21 : vector<8x32xf32>
    %23 = arith.negf %22 : vector<8x32xf32>
    %24 = math.exp %23 : vector<8x32xf32>
    %cst_12 = arith.constant 1.000000e+00 : f32
    %25 = vector.broadcast %cst_12 : f32 to vector<8x32xf32>
    %26 = arith.addf %25, %24 : vector<8x32xf32>
    %27 = arith.divf %25, %26 : vector<8x32xf32>
    %28 = vector.extract_strided_slice %16 {offsets = [0, 32], sizes = [8, 32], strides = [1, 1]} : vector<8x96xf32> to vector<8x32xf32>
    %29 = vector.extract_strided_slice %19 {offsets = [0, 32], sizes = [8, 32], strides = [1, 1]} : vector<8x96xf32> to vector<8x32xf32>
    %30 = arith.addf %28, %29 : vector<8x32xf32>
    %31 = arith.negf %30 : vector<8x32xf32>
    %32 = math.exp %31 : vector<8x32xf32>
    %cst_13 = arith.constant 1.000000e+00 : f32
    %33 = vector.broadcast %cst_13 : f32 to vector<8x32xf32>
    %34 = arith.addf %33, %32 : vector<8x32xf32>
    %35 = arith.divf %33, %34 : vector<8x32xf32>
    %36 = vector.extract_strided_slice %16 {offsets = [0, 64], sizes = [8, 32], strides = [1, 1]} : vector<8x96xf32> to vector<8x32xf32>
    %37 = vector.extract_strided_slice %19 {offsets = [0, 64], sizes = [8, 32], strides = [1, 1]} : vector<8x96xf32> to vector<8x32xf32>
    %38 = arith.mulf %27, %37 : vector<8x32xf32>
    %39 = arith.addf %36, %38 : vector<8x32xf32>
    %40 = math.tanh %39 : vector<8x32xf32>
    %cst_14 = arith.constant 1.000000e+00 : f32
    %41 = vector.broadcast %cst_14 : f32 to vector<8x32xf32>
    %42 = arith.subf %41, %35 : vector<8x32xf32>
    %43 = arith.mulf %42, %40 : vector<8x32xf32>
    %44 = arith.mulf %35, %14 : vector<8x32xf32>
    %45 = arith.addf %43, %44 : vector<8x32xf32>
    %46 = vector.extract_strided_slice %13 {offsets = [1, 0, 0], sizes = [1, 8, 96], strides = [1, 1, 1]} : vector<8x8x96xf32> to vector<1x8x96xf32>
    %47 = vector.shape_cast %46 : vector<1x8x96xf32> to vector<8x96xf32>
    %cst_15 = arith.constant dense<0.000000e+00> : vector<8x96xf32>
    %48 = tpu.matmul %45, %4, %cst_15 {dimension_numbers = #tpu.dot_dimension_numbers<[1], [0], [0], [1], [0, 0, 1, 1], [], []>} : vector<8x32xf32>, vector<32x96xf32>, vector<8x96xf32> -> vector<8x96xf32>
    %49 = vector.broadcast %5 : vector<1x96xf32> to vector<8x96xf32>
    %50 = arith.addf %48, %49 : vector<8x96xf32>
    %51 = vector.extract_strided_slice %47 {offsets = [0, 0], sizes = [8, 32], strides = [1, 1]} : vector<8x96xf32> to vector<8x32xf32>
    %52 = vector.extract_strided_slice %50 {offsets = [0, 0], sizes = [8, 32], strides = [1, 1]} : vector<8x96xf32> to vector<8x32xf32>
    %53 = arith.addf %51, %52 : vector<8x32xf32>
    %54 = arith.negf %53 : vector<8x32xf32>
    %55 = math.exp %54 : vector<8x32xf32>
    %cst_16 = arith.constant 1.000000e+00 : f32
    %56 = vector.broadcast %cst_16 : f32 to vector<8x32xf32>
    %57 = arith.addf %56, %55 : vector<8x32xf32>
    %58 = arith.divf %56, %57 : vector<8x32xf32>
    %59 = vector.extract_strided_slice %47 {offsets = [0, 32], sizes = [8, 32], strides = [1, 1]} : vector<8x96xf32> to vector<8x32xf32>
    %60 = vector.extract_strided_slice %50 {offsets = [0, 32], sizes = [8, 32], strides = [1, 1]} : vector<8x96xf32> to vector<8x32xf32>
    %61 = arith.addf %59, %60 : vector<8x32xf32>
    %62 = arith.negf %61 : vector<8x32xf32>
    %63 = math.exp %62 : vector<8x32xf32>
    %cst_17 = arith.constant 1.000000e+00 : f32
    %64 = vector.broadcast %cst_17 : f32 to vector<8x32xf32>
    %65 = arith.addf %64, %63 : vector<8x32xf32>
    %66 = arith.divf %64, %65 : vector<8x32xf32>
    %67 = vector.extract_strided_slice %47 {offsets = [0, 64], sizes = [8, 32], strides = [1, 1]} : vector<8x96xf32> to vector<8x32xf32>
    %68 = vector.extract_strided_slice %50 {offsets = [0, 64], sizes = [8, 32], strides = [1, 1]} : vector<8x96xf32> to vector<8x32xf32>
    %69 = arith.mulf %58, %68 : vector<8x32xf32>
    %70 = arith.addf %67, %69 : vector<8x32xf32>
    %71 = math.tanh %70 : vector<8x32xf32>
    %cst_18 = arith.constant 1.000000e+00 : f32
    %72 = vector.broadcast %cst_18 : f32 to vector<8x32xf32>
    %73 = arith.subf %72, %66 : vector<8x32xf32>
    %74 = arith.mulf %73, %71 : vector<8x32xf32>
    %75 = arith.mulf %66, %45 : vector<8x32xf32>
    %76 = arith.addf %74, %75 : vector<8x32xf32>
    %77 = vector.extract_strided_slice %13 {offsets = [2, 0, 0], sizes = [1, 8, 96], strides = [1, 1, 1]} : vector<8x8x96xf32> to vector<1x8x96xf32>
    %78 = vector.shape_cast %77 : vector<1x8x96xf32> to vector<8x96xf32>
    %cst_19 = arith.constant dense<0.000000e+00> : vector<8x96xf32>
    %79 = tpu.matmul %76, %4, %cst_19 {dimension_numbers = #tpu.dot_dimension_numbers<[1], [0], [0], [1], [0, 0, 1, 1], [], []>} : vector<8x32xf32>, vector<32x96xf32>, vector<8x96xf32> -> vector<8x96xf32>
    %80 = vector.broadcast %5 : vector<1x96xf32> to vector<8x96xf32>
    %81 = arith.addf %79, %80 : vector<8x96xf32>
    %82 = vector.extract_strided_slice %78 {offsets = [0, 0], sizes = [8, 32], strides = [1, 1]} : vector<8x96xf32> to vector<8x32xf32>
    %83 = vector.extract_strided_slice %81 {offsets = [0, 0], sizes = [8, 32], strides = [1, 1]} : vector<8x96xf32> to vector<8x32xf32>
    %84 = arith.addf %82, %83 : vector<8x32xf32>
    %85 = arith.negf %84 : vector<8x32xf32>
    %86 = math.exp %85 : vector<8x32xf32>
    %cst_20 = arith.constant 1.000000e+00 : f32
    %87 = vector.broadcast %cst_20 : f32 to vector<8x32xf32>
    %88 = arith.addf %87, %86 : vector<8x32xf32>
    %89 = arith.divf %87, %88 : vector<8x32xf32>
    %90 = vector.extract_strided_slice %78 {offsets = [0, 32], sizes = [8, 32], strides = [1, 1]} : vector<8x96xf32> to vector<8x32xf32>
    %91 = vector.extract_strided_slice %81 {offsets = [0, 32], sizes = [8, 32], strides = [1, 1]} : vector<8x96xf32> to vector<8x32xf32>
    %92 = arith.addf %90, %91 : vector<8x32xf32>
    %93 = arith.negf %92 : vector<8x32xf32>
    %94 = math.exp %93 : vector<8x32xf32>
    %cst_21 = arith.constant 1.000000e+00 : f32
    %95 = vector.broadcast %cst_21 : f32 to vector<8x32xf32>
    %96 = arith.addf %95, %94 : vector<8x32xf32>
    %97 = arith.divf %95, %96 : vector<8x32xf32>
    %98 = vector.extract_strided_slice %78 {offsets = [0, 64], sizes = [8, 32], strides = [1, 1]} : vector<8x96xf32> to vector<8x32xf32>
    %99 = vector.extract_strided_slice %81 {offsets = [0, 64], sizes = [8, 32], strides = [1, 1]} : vector<8x96xf32> to vector<8x32xf32>
    %100 = arith.mulf %89, %99 : vector<8x32xf32>
    %101 = arith.addf %98, %100 : vector<8x32xf32>
    %102 = math.tanh %101 : vector<8x32xf32>
    %cst_22 = arith.constant 1.000000e+00 : f32
    %103 = vector.broadcast %cst_22 : f32 to vector<8x32xf32>
    %104 = arith.subf %103, %97 : vector<8x32xf32>
    %105 = arith.mulf %104, %102 : vector<8x32xf32>
    %106 = arith.mulf %97, %76 : vector<8x32xf32>
    %107 = arith.addf %105, %106 : vector<8x32xf32>
    %108 = vector.extract_strided_slice %13 {offsets = [3, 0, 0], sizes = [1, 8, 96], strides = [1, 1, 1]} : vector<8x8x96xf32> to vector<1x8x96xf32>
    %109 = vector.shape_cast %108 : vector<1x8x96xf32> to vector<8x96xf32>
    %cst_23 = arith.constant dense<0.000000e+00> : vector<8x96xf32>
    %110 = tpu.matmul %107, %4, %cst_23 {dimension_numbers = #tpu.dot_dimension_numbers<[1], [0], [0], [1], [0, 0, 1, 1], [], []>} : vector<8x32xf32>, vector<32x96xf32>, vector<8x96xf32> -> vector<8x96xf32>
    %111 = vector.broadcast %5 : vector<1x96xf32> to vector<8x96xf32>
    %112 = arith.addf %110, %111 : vector<8x96xf32>
    %113 = vector.extract_strided_slice %109 {offsets = [0, 0], sizes = [8, 32], strides = [1, 1]} : vector<8x96xf32> to vector<8x32xf32>
    %114 = vector.extract_strided_slice %112 {offsets = [0, 0], sizes = [8, 32], strides = [1, 1]} : vector<8x96xf32> to vector<8x32xf32>
    %115 = arith.addf %113, %114 : vector<8x32xf32>
    %116 = arith.negf %115 : vector<8x32xf32>
    %117 = math.exp %116 : vector<8x32xf32>
    %cst_24 = arith.constant 1.000000e+00 : f32
    %118 = vector.broadcast %cst_24 : f32 to vector<8x32xf32>
    %119 = arith.addf %118, %117 : vector<8x32xf32>
    %120 = arith.divf %118, %119 : vector<8x32xf32>
    %121 = vector.extract_strided_slice %109 {offsets = [0, 32], sizes = [8, 32], strides = [1, 1]} : vector<8x96xf32> to vector<8x32xf32>
    %122 = vector.extract_strided_slice %112 {offsets = [0, 32], sizes = [8, 32], strides = [1, 1]} : vector<8x96xf32> to vector<8x32xf32>
    %123 = arith.addf %121, %122 : vector<8x32xf32>
    %124 = arith.negf %123 : vector<8x32xf32>
    %125 = math.exp %124 : vector<8x32xf32>
    %cst_25 = arith.constant 1.000000e+00 : f32
    %126 = vector.broadcast %cst_25 : f32 to vector<8x32xf32>
    %127 = arith.addf %126, %125 : vector<8x32xf32>
    %128 = arith.divf %126, %127 : vector<8x32xf32>
    %129 = vector.extract_strided_slice %109 {offsets = [0, 64], sizes = [8, 32], strides = [1, 1]} : vector<8x96xf32> to vector<8x32xf32>
    %130 = vector.extract_strided_slice %112 {offsets = [0, 64], sizes = [8, 32], strides = [1, 1]} : vector<8x96xf32> to vector<8x32xf32>
    %131 = arith.mulf %120, %130 : vector<8x32xf32>
    %132 = arith.addf %129, %131 : vector<8x32xf32>
    %133 = math.tanh %132 : vector<8x32xf32>
    %cst_26 = arith.constant 1.000000e+00 : f32
    %134 = vector.broadcast %cst_26 : f32 to vector<8x32xf32>
    %135 = arith.subf %134, %128 : vector<8x32xf32>
    %136 = arith.mulf %135, %133 : vector<8x32xf32>
    %137 = arith.mulf %128, %107 : vector<8x32xf32>
    %138 = arith.addf %136, %137 : vector<8x32xf32>
    %139 = vector.extract_strided_slice %13 {offsets = [4, 0, 0], sizes = [1, 8, 96], strides = [1, 1, 1]} : vector<8x8x96xf32> to vector<1x8x96xf32>
    %140 = vector.shape_cast %139 : vector<1x8x96xf32> to vector<8x96xf32>
    %cst_27 = arith.constant dense<0.000000e+00> : vector<8x96xf32>
    %141 = tpu.matmul %138, %4, %cst_27 {dimension_numbers = #tpu.dot_dimension_numbers<[1], [0], [0], [1], [0, 0, 1, 1], [], []>} : vector<8x32xf32>, vector<32x96xf32>, vector<8x96xf32> -> vector<8x96xf32>
    %142 = vector.broadcast %5 : vector<1x96xf32> to vector<8x96xf32>
    %143 = arith.addf %141, %142 : vector<8x96xf32>
    %144 = vector.extract_strided_slice %140 {offsets = [0, 0], sizes = [8, 32], strides = [1, 1]} : vector<8x96xf32> to vector<8x32xf32>
    %145 = vector.extract_strided_slice %143 {offsets = [0, 0], sizes = [8, 32], strides = [1, 1]} : vector<8x96xf32> to vector<8x32xf32>
    %146 = arith.addf %144, %145 : vector<8x32xf32>
    %147 = arith.negf %146 : vector<8x32xf32>
    %148 = math.exp %147 : vector<8x32xf32>
    %cst_28 = arith.constant 1.000000e+00 : f32
    %149 = vector.broadcast %cst_28 : f32 to vector<8x32xf32>
    %150 = arith.addf %149, %148 : vector<8x32xf32>
    %151 = arith.divf %149, %150 : vector<8x32xf32>
    %152 = vector.extract_strided_slice %140 {offsets = [0, 32], sizes = [8, 32], strides = [1, 1]} : vector<8x96xf32> to vector<8x32xf32>
    %153 = vector.extract_strided_slice %143 {offsets = [0, 32], sizes = [8, 32], strides = [1, 1]} : vector<8x96xf32> to vector<8x32xf32>
    %154 = arith.addf %152, %153 : vector<8x32xf32>
    %155 = arith.negf %154 : vector<8x32xf32>
    %156 = math.exp %155 : vector<8x32xf32>
    %cst_29 = arith.constant 1.000000e+00 : f32
    %157 = vector.broadcast %cst_29 : f32 to vector<8x32xf32>
    %158 = arith.addf %157, %156 : vector<8x32xf32>
    %159 = arith.divf %157, %158 : vector<8x32xf32>
    %160 = vector.extract_strided_slice %140 {offsets = [0, 64], sizes = [8, 32], strides = [1, 1]} : vector<8x96xf32> to vector<8x32xf32>
    %161 = vector.extract_strided_slice %143 {offsets = [0, 64], sizes = [8, 32], strides = [1, 1]} : vector<8x96xf32> to vector<8x32xf32>
    %162 = arith.mulf %151, %161 : vector<8x32xf32>
    %163 = arith.addf %160, %162 : vector<8x32xf32>
    %164 = math.tanh %163 : vector<8x32xf32>
    %cst_30 = arith.constant 1.000000e+00 : f32
    %165 = vector.broadcast %cst_30 : f32 to vector<8x32xf32>
    %166 = arith.subf %165, %159 : vector<8x32xf32>
    %167 = arith.mulf %166, %164 : vector<8x32xf32>
    %168 = arith.mulf %159, %138 : vector<8x32xf32>
    %169 = arith.addf %167, %168 : vector<8x32xf32>
    %170 = vector.extract_strided_slice %13 {offsets = [5, 0, 0], sizes = [1, 8, 96], strides = [1, 1, 1]} : vector<8x8x96xf32> to vector<1x8x96xf32>
    %171 = vector.shape_cast %170 : vector<1x8x96xf32> to vector<8x96xf32>
    %cst_31 = arith.constant dense<0.000000e+00> : vector<8x96xf32>
    %172 = tpu.matmul %169, %4, %cst_31 {dimension_numbers = #tpu.dot_dimension_numbers<[1], [0], [0], [1], [0, 0, 1, 1], [], []>} : vector<8x32xf32>, vector<32x96xf32>, vector<8x96xf32> -> vector<8x96xf32>
    %173 = vector.broadcast %5 : vector<1x96xf32> to vector<8x96xf32>
    %174 = arith.addf %172, %173 : vector<8x96xf32>
    %175 = vector.extract_strided_slice %171 {offsets = [0, 0], sizes = [8, 32], strides = [1, 1]} : vector<8x96xf32> to vector<8x32xf32>
    %176 = vector.extract_strided_slice %174 {offsets = [0, 0], sizes = [8, 32], strides = [1, 1]} : vector<8x96xf32> to vector<8x32xf32>
    %177 = arith.addf %175, %176 : vector<8x32xf32>
    %178 = arith.negf %177 : vector<8x32xf32>
    %179 = math.exp %178 : vector<8x32xf32>
    %cst_32 = arith.constant 1.000000e+00 : f32
    %180 = vector.broadcast %cst_32 : f32 to vector<8x32xf32>
    %181 = arith.addf %180, %179 : vector<8x32xf32>
    %182 = arith.divf %180, %181 : vector<8x32xf32>
    %183 = vector.extract_strided_slice %171 {offsets = [0, 32], sizes = [8, 32], strides = [1, 1]} : vector<8x96xf32> to vector<8x32xf32>
    %184 = vector.extract_strided_slice %174 {offsets = [0, 32], sizes = [8, 32], strides = [1, 1]} : vector<8x96xf32> to vector<8x32xf32>
    %185 = arith.addf %183, %184 : vector<8x32xf32>
    %186 = arith.negf %185 : vector<8x32xf32>
    %187 = math.exp %186 : vector<8x32xf32>
    %cst_33 = arith.constant 1.000000e+00 : f32
    %188 = vector.broadcast %cst_33 : f32 to vector<8x32xf32>
    %189 = arith.addf %188, %187 : vector<8x32xf32>
    %190 = arith.divf %188, %189 : vector<8x32xf32>
    %191 = vector.extract_strided_slice %171 {offsets = [0, 64], sizes = [8, 32], strides = [1, 1]} : vector<8x96xf32> to vector<8x32xf32>
    %192 = vector.extract_strided_slice %174 {offsets = [0, 64], sizes = [8, 32], strides = [1, 1]} : vector<8x96xf32> to vector<8x32xf32>
    %193 = arith.mulf %182, %192 : vector<8x32xf32>
    %194 = arith.addf %191, %193 : vector<8x32xf32>
    %195 = math.tanh %194 : vector<8x32xf32>
    %cst_34 = arith.constant 1.000000e+00 : f32
    %196 = vector.broadcast %cst_34 : f32 to vector<8x32xf32>
    %197 = arith.subf %196, %190 : vector<8x32xf32>
    %198 = arith.mulf %197, %195 : vector<8x32xf32>
    %199 = arith.mulf %190, %169 : vector<8x32xf32>
    %200 = arith.addf %198, %199 : vector<8x32xf32>
    %201 = vector.extract_strided_slice %13 {offsets = [6, 0, 0], sizes = [1, 8, 96], strides = [1, 1, 1]} : vector<8x8x96xf32> to vector<1x8x96xf32>
    %202 = vector.shape_cast %201 : vector<1x8x96xf32> to vector<8x96xf32>
    %cst_35 = arith.constant dense<0.000000e+00> : vector<8x96xf32>
    %203 = tpu.matmul %200, %4, %cst_35 {dimension_numbers = #tpu.dot_dimension_numbers<[1], [0], [0], [1], [0, 0, 1, 1], [], []>} : vector<8x32xf32>, vector<32x96xf32>, vector<8x96xf32> -> vector<8x96xf32>
    %204 = vector.broadcast %5 : vector<1x96xf32> to vector<8x96xf32>
    %205 = arith.addf %203, %204 : vector<8x96xf32>
    %206 = vector.extract_strided_slice %202 {offsets = [0, 0], sizes = [8, 32], strides = [1, 1]} : vector<8x96xf32> to vector<8x32xf32>
    %207 = vector.extract_strided_slice %205 {offsets = [0, 0], sizes = [8, 32], strides = [1, 1]} : vector<8x96xf32> to vector<8x32xf32>
    %208 = arith.addf %206, %207 : vector<8x32xf32>
    %209 = arith.negf %208 : vector<8x32xf32>
    %210 = math.exp %209 : vector<8x32xf32>
    %cst_36 = arith.constant 1.000000e+00 : f32
    %211 = vector.broadcast %cst_36 : f32 to vector<8x32xf32>
    %212 = arith.addf %211, %210 : vector<8x32xf32>
    %213 = arith.divf %211, %212 : vector<8x32xf32>
    %214 = vector.extract_strided_slice %202 {offsets = [0, 32], sizes = [8, 32], strides = [1, 1]} : vector<8x96xf32> to vector<8x32xf32>
    %215 = vector.extract_strided_slice %205 {offsets = [0, 32], sizes = [8, 32], strides = [1, 1]} : vector<8x96xf32> to vector<8x32xf32>
    %216 = arith.addf %214, %215 : vector<8x32xf32>
    %217 = arith.negf %216 : vector<8x32xf32>
    %218 = math.exp %217 : vector<8x32xf32>
    %cst_37 = arith.constant 1.000000e+00 : f32
    %219 = vector.broadcast %cst_37 : f32 to vector<8x32xf32>
    %220 = arith.addf %219, %218 : vector<8x32xf32>
    %221 = arith.divf %219, %220 : vector<8x32xf32>
    %222 = vector.extract_strided_slice %202 {offsets = [0, 64], sizes = [8, 32], strides = [1, 1]} : vector<8x96xf32> to vector<8x32xf32>
    %223 = vector.extract_strided_slice %205 {offsets = [0, 64], sizes = [8, 32], strides = [1, 1]} : vector<8x96xf32> to vector<8x32xf32>
    %224 = arith.mulf %213, %223 : vector<8x32xf32>
    %225 = arith.addf %222, %224 : vector<8x32xf32>
    %226 = math.tanh %225 : vector<8x32xf32>
    %cst_38 = arith.constant 1.000000e+00 : f32
    %227 = vector.broadcast %cst_38 : f32 to vector<8x32xf32>
    %228 = arith.subf %227, %221 : vector<8x32xf32>
    %229 = arith.mulf %228, %226 : vector<8x32xf32>
    %230 = arith.mulf %221, %200 : vector<8x32xf32>
    %231 = arith.addf %229, %230 : vector<8x32xf32>
    %232 = vector.extract_strided_slice %13 {offsets = [7, 0, 0], sizes = [1, 8, 96], strides = [1, 1, 1]} : vector<8x8x96xf32> to vector<1x8x96xf32>
    %233 = vector.shape_cast %232 : vector<1x8x96xf32> to vector<8x96xf32>
    %cst_39 = arith.constant dense<0.000000e+00> : vector<8x96xf32>
    %234 = tpu.matmul %231, %4, %cst_39 {dimension_numbers = #tpu.dot_dimension_numbers<[1], [0], [0], [1], [0, 0, 1, 1], [], []>} : vector<8x32xf32>, vector<32x96xf32>, vector<8x96xf32> -> vector<8x96xf32>
    %235 = vector.broadcast %5 : vector<1x96xf32> to vector<8x96xf32>
    %236 = arith.addf %234, %235 : vector<8x96xf32>
    %237 = vector.extract_strided_slice %233 {offsets = [0, 0], sizes = [8, 32], strides = [1, 1]} : vector<8x96xf32> to vector<8x32xf32>
    %238 = vector.extract_strided_slice %236 {offsets = [0, 0], sizes = [8, 32], strides = [1, 1]} : vector<8x96xf32> to vector<8x32xf32>
    %239 = arith.addf %237, %238 : vector<8x32xf32>
    %240 = arith.negf %239 : vector<8x32xf32>
    %241 = math.exp %240 : vector<8x32xf32>
    %cst_40 = arith.constant 1.000000e+00 : f32
    %242 = vector.broadcast %cst_40 : f32 to vector<8x32xf32>
    %243 = arith.addf %242, %241 : vector<8x32xf32>
    %244 = arith.divf %242, %243 : vector<8x32xf32>
    %245 = vector.extract_strided_slice %233 {offsets = [0, 32], sizes = [8, 32], strides = [1, 1]} : vector<8x96xf32> to vector<8x32xf32>
    %246 = vector.extract_strided_slice %236 {offsets = [0, 32], sizes = [8, 32], strides = [1, 1]} : vector<8x96xf32> to vector<8x32xf32>
    %247 = arith.addf %245, %246 : vector<8x32xf32>
    %248 = arith.negf %247 : vector<8x32xf32>
    %249 = math.exp %248 : vector<8x32xf32>
    %cst_41 = arith.constant 1.000000e+00 : f32
    %250 = vector.broadcast %cst_41 : f32 to vector<8x32xf32>
    %251 = arith.addf %250, %249 : vector<8x32xf32>
    %252 = arith.divf %250, %251 : vector<8x32xf32>
    %253 = vector.extract_strided_slice %233 {offsets = [0, 64], sizes = [8, 32], strides = [1, 1]} : vector<8x96xf32> to vector<8x32xf32>
    %254 = vector.extract_strided_slice %236 {offsets = [0, 64], sizes = [8, 32], strides = [1, 1]} : vector<8x96xf32> to vector<8x32xf32>
    %255 = arith.mulf %244, %254 : vector<8x32xf32>
    %256 = arith.addf %253, %255 : vector<8x32xf32>
    %257 = math.tanh %256 : vector<8x32xf32>
    %cst_42 = arith.constant 1.000000e+00 : f32
    %258 = vector.broadcast %cst_42 : f32 to vector<8x32xf32>
    %259 = arith.subf %258, %252 : vector<8x32xf32>
    %260 = arith.mulf %259, %257 : vector<8x32xf32>
    %261 = arith.mulf %252, %231 : vector<8x32xf32>
    %262 = arith.addf %260, %261 : vector<8x32xf32>
    %cst_43 = arith.constant 0.000000e+00 : f32
    %263 = vector.broadcast %cst_43 : f32 to vector<8x8xf32>
    %c0_44 = arith.constant 0 : index
    %c0_45 = arith.constant 0 : index
    %c0_46 = arith.constant 0 : index
    %264 = vector.load %arg7[%c0_44, %c0_45, %c0_46] : memref<3x1x96xf32, #tpu.memory_space<vmem>>, vector<1x1x96xf32>
    %265 = vector.shape_cast %264 : vector<1x1x96xf32> to vector<1x96xf32>
    %c0_47 = arith.constant 0 : index
    %c0_48 = arith.constant 0 : index
    %c0_49 = arith.constant 0 : index
    %266 = vector.load %arg8[%c0_47, %c0_48, %c0_49] : memref<3x1x96xf32, #tpu.memory_space<vmem>>, vector<1x1x96xf32>
    %267 = vector.shape_cast %266 : vector<1x1x96xf32> to vector<1x96xf32>
    %c0_50 = arith.constant 0 : index
    %c0_51 = arith.constant 0 : index
    %c0_52 = arith.constant 0 : index
    %268 = vector.load %arg9[%c0_50, %c0_51, %c0_52] : memref<3x32x96xf32, #tpu.memory_space<vmem>>, vector<1x32x96xf32>
    %269 = vector.shape_cast %268 : vector<1x32x96xf32> to vector<32x96xf32>
    %c0_53 = arith.constant 0 : index
    %c0_54 = arith.constant 0 : index
    %c0_55 = arith.constant 0 : index
    %270 = vector.load %arg10[%c0_53, %c0_54, %c0_55] : memref<3x1x96xf32, #tpu.memory_space<vmem>>, vector<1x1x96xf32>
    %271 = vector.shape_cast %270 : vector<1x1x96xf32> to vector<1x96xf32>
    %c0_56 = arith.constant 0 : index
    %c0_57 = arith.constant 0 : index
    %c0_58 = arith.constant 0 : index
    %272 = vector.load %arg11[%c0_56, %c0_57, %c0_58] : memref<3x1x32xf32, #tpu.memory_space<vmem>>, vector<1x1x32xf32>
    %273 = vector.shape_cast %272 : vector<1x1x32xf32> to vector<1x32xf32>
    %c0_59 = arith.constant 0 : index
    %c0_60 = arith.constant 0 : index
    %c0_61 = arith.constant 0 : index
    %274 = vector.load %arg12[%c0_59, %c0_60, %c0_61] : memref<3x1x1xf32, #tpu.memory_space<vmem>>, vector<1x1x1xf32>
    %275 = vector.shape_cast %274 : vector<1x1x1xf32> to vector<1x1xf32>
    %276 = vector.broadcast %273 : vector<1x32xf32> to vector<8x32xf32>
    %277 = arith.mulf %262, %276 : vector<8x32xf32>
    %cst_62 = arith.constant dense<0.000000e+00> : vector<8xf32>
    %278 = vector.multi_reduction <add>, %277, %cst_62 [1] : vector<8x32xf32> to vector<8xf32>
    %279 = vector.shape_cast %278 : vector<8xf32> to vector<8x1xf32>
    %280 = vector.broadcast %275 : vector<1x1xf32> to vector<8x1xf32>
    %281 = arith.addf %279, %280 : vector<8x1xf32>
    %282 = vector.broadcast %281 : vector<8x1xf32> to vector<8x96xf32>
    %283 = vector.broadcast %265 : vector<1x96xf32> to vector<8x96xf32>
    %284 = arith.mulf %282, %283 : vector<8x96xf32>
    %285 = vector.broadcast %267 : vector<1x96xf32> to vector<8x96xf32>
    %286 = arith.addf %284, %285 : vector<8x96xf32>
    %287 = vector.shape_cast %0 : vector<8x8xf32> to vector<8x8x1xf32>
    %288 = vector.shape_cast %265 : vector<1x96xf32> to vector<1x1x96xf32>
    %289 = vector.broadcast %287 : vector<8x8x1xf32> to vector<8x8x96xf32>
    %290 = vector.broadcast %288 : vector<1x1x96xf32> to vector<8x8x96xf32>
    %291 = arith.mulf %289, %290 : vector<8x8x96xf32>
    %292 = vector.shape_cast %267 : vector<1x96xf32> to vector<1x1x96xf32>
    %293 = vector.broadcast %292 : vector<1x1x96xf32> to vector<8x8x96xf32>
    %294 = arith.addf %291, %293 : vector<8x8x96xf32>
    %cst_63 = arith.constant dense<0.000000e+00> : vector<8x96xf32>
    %295 = tpu.matmul %262, %269, %cst_63 {dimension_numbers = #tpu.dot_dimension_numbers<[1], [0], [0], [1], [0, 0, 1, 1], [], []>} : vector<8x32xf32>, vector<32x96xf32>, vector<8x96xf32> -> vector<8x96xf32>
    %296 = vector.broadcast %271 : vector<1x96xf32> to vector<8x96xf32>
    %297 = arith.addf %295, %296 : vector<8x96xf32>
    %298 = vector.extract_strided_slice %286 {offsets = [0, 0], sizes = [8, 32], strides = [1, 1]} : vector<8x96xf32> to vector<8x32xf32>
    %299 = vector.extract_strided_slice %297 {offsets = [0, 0], sizes = [8, 32], strides = [1, 1]} : vector<8x96xf32> to vector<8x32xf32>
    %300 = arith.addf %298, %299 : vector<8x32xf32>
    %301 = arith.negf %300 : vector<8x32xf32>
    %302 = math.exp %301 : vector<8x32xf32>
    %cst_64 = arith.constant 1.000000e+00 : f32
    %303 = vector.broadcast %cst_64 : f32 to vector<8x32xf32>
    %304 = arith.addf %303, %302 : vector<8x32xf32>
    %305 = arith.divf %303, %304 : vector<8x32xf32>
    %306 = vector.extract_strided_slice %286 {offsets = [0, 32], sizes = [8, 32], strides = [1, 1]} : vector<8x96xf32> to vector<8x32xf32>
    %307 = vector.extract_strided_slice %297 {offsets = [0, 32], sizes = [8, 32], strides = [1, 1]} : vector<8x96xf32> to vector<8x32xf32>
    %308 = arith.addf %306, %307 : vector<8x32xf32>
    %309 = arith.negf %308 : vector<8x32xf32>
    %310 = math.exp %309 : vector<8x32xf32>
    %cst_65 = arith.constant 1.000000e+00 : f32
    %311 = vector.broadcast %cst_65 : f32 to vector<8x32xf32>
    %312 = arith.addf %311, %310 : vector<8x32xf32>
    %313 = arith.divf %311, %312 : vector<8x32xf32>
    %314 = vector.extract_strided_slice %286 {offsets = [0, 64], sizes = [8, 32], strides = [1, 1]} : vector<8x96xf32> to vector<8x32xf32>
    %315 = vector.extract_strided_slice %297 {offsets = [0, 64], sizes = [8, 32], strides = [1, 1]} : vector<8x96xf32> to vector<8x32xf32>
    %316 = arith.mulf %305, %315 : vector<8x32xf32>
    %317 = arith.addf %314, %316 : vector<8x32xf32>
    %318 = math.tanh %317 : vector<8x32xf32>
    %cst_66 = arith.constant 1.000000e+00 : f32
    %319 = vector.broadcast %cst_66 : f32 to vector<8x32xf32>
    %320 = arith.subf %319, %313 : vector<8x32xf32>
    %321 = arith.mulf %320, %318 : vector<8x32xf32>
    %322 = arith.mulf %313, %262 : vector<8x32xf32>
    %323 = arith.addf %321, %322 : vector<8x32xf32>
    %324 = vector.extract_strided_slice %294 {offsets = [7, 0, 0], sizes = [1, 8, 96], strides = [1, 1, 1]} : vector<8x8x96xf32> to vector<1x8x96xf32>
    %325 = vector.shape_cast %324 : vector<1x8x96xf32> to vector<8x96xf32>
    %cst_67 = arith.constant dense<0.000000e+00> : vector<8x96xf32>
    %326 = tpu.matmul %323, %269, %cst_67 {dimension_numbers = #tpu.dot_dimension_numbers<[1], [0], [0], [1], [0, 0, 1, 1], [], []>} : vector<8x32xf32>, vector<32x96xf32>, vector<8x96xf32> -> vector<8x96xf32>
    %327 = vector.broadcast %271 : vector<1x96xf32> to vector<8x96xf32>
    %328 = arith.addf %326, %327 : vector<8x96xf32>
    %329 = vector.extract_strided_slice %325 {offsets = [0, 0], sizes = [8, 32], strides = [1, 1]} : vector<8x96xf32> to vector<8x32xf32>
    %330 = vector.extract_strided_slice %328 {offsets = [0, 0], sizes = [8, 32], strides = [1, 1]} : vector<8x96xf32> to vector<8x32xf32>
    %331 = arith.addf %329, %330 : vector<8x32xf32>
    %332 = arith.negf %331 : vector<8x32xf32>
    %333 = math.exp %332 : vector<8x32xf32>
    %cst_68 = arith.constant 1.000000e+00 : f32
    %334 = vector.broadcast %cst_68 : f32 to vector<8x32xf32>
    %335 = arith.addf %334, %333 : vector<8x32xf32>
    %336 = arith.divf %334, %335 : vector<8x32xf32>
    %337 = vector.extract_strided_slice %325 {offsets = [0, 32], sizes = [8, 32], strides = [1, 1]} : vector<8x96xf32> to vector<8x32xf32>
    %338 = vector.extract_strided_slice %328 {offsets = [0, 32], sizes = [8, 32], strides = [1, 1]} : vector<8x96xf32> to vector<8x32xf32>
    %339 = arith.addf %337, %338 : vector<8x32xf32>
    %340 = arith.negf %339 : vector<8x32xf32>
    %341 = math.exp %340 : vector<8x32xf32>
    %cst_69 = arith.constant 1.000000e+00 : f32
    %342 = vector.broadcast %cst_69 : f32 to vector<8x32xf32>
    %343 = arith.addf %342, %341 : vector<8x32xf32>
    %344 = arith.divf %342, %343 : vector<8x32xf32>
    %345 = vector.extract_strided_slice %325 {offsets = [0, 64], sizes = [8, 32], strides = [1, 1]} : vector<8x96xf32> to vector<8x32xf32>
    %346 = vector.extract_strided_slice %328 {offsets = [0, 64], sizes = [8, 32], strides = [1, 1]} : vector<8x96xf32> to vector<8x32xf32>
    %347 = arith.mulf %336, %346 : vector<8x32xf32>
    %348 = arith.addf %345, %347 : vector<8x32xf32>
    %349 = math.tanh %348 : vector<8x32xf32>
    %cst_70 = arith.constant 1.000000e+00 : f32
    %350 = vector.broadcast %cst_70 : f32 to vector<8x32xf32>
    %351 = arith.subf %350, %344 : vector<8x32xf32>
    %352 = arith.mulf %351, %349 : vector<8x32xf32>
    %353 = arith.mulf %344, %323 : vector<8x32xf32>
    %354 = arith.addf %352, %353 : vector<8x32xf32>
    %355 = vector.extract_strided_slice %294 {offsets = [6, 0, 0], sizes = [1, 8, 96], strides = [1, 1, 1]} : vector<8x8x96xf32> to vector<1x8x96xf32>
    %356 = vector.shape_cast %355 : vector<1x8x96xf32> to vector<8x96xf32>
    %cst_71 = arith.constant dense<0.000000e+00> : vector<8x96xf32>
    %357 = tpu.matmul %354, %269, %cst_71 {dimension_numbers = #tpu.dot_dimension_numbers<[1], [0], [0], [1], [0, 0, 1, 1], [], []>} : vector<8x32xf32>, vector<32x96xf32>, vector<8x96xf32> -> vector<8x96xf32>
    %358 = vector.broadcast %271 : vector<1x96xf32> to vector<8x96xf32>
    %359 = arith.addf %357, %358 : vector<8x96xf32>
    %360 = vector.extract_strided_slice %356 {offsets = [0, 0], sizes = [8, 32], strides = [1, 1]} : vector<8x96xf32> to vector<8x32xf32>
    %361 = vector.extract_strided_slice %359 {offsets = [0, 0], sizes = [8, 32], strides = [1, 1]} : vector<8x96xf32> to vector<8x32xf32>
    %362 = arith.addf %360, %361 : vector<8x32xf32>
    %363 = arith.negf %362 : vector<8x32xf32>
    %364 = math.exp %363 : vector<8x32xf32>
    %cst_72 = arith.constant 1.000000e+00 : f32
    %365 = vector.broadcast %cst_72 : f32 to vector<8x32xf32>
    %366 = arith.addf %365, %364 : vector<8x32xf32>
    %367 = arith.divf %365, %366 : vector<8x32xf32>
    %368 = vector.extract_strided_slice %356 {offsets = [0, 32], sizes = [8, 32], strides = [1, 1]} : vector<8x96xf32> to vector<8x32xf32>
    %369 = vector.extract_strided_slice %359 {offsets = [0, 32], sizes = [8, 32], strides = [1, 1]} : vector<8x96xf32> to vector<8x32xf32>
    %370 = arith.addf %368, %369 : vector<8x32xf32>
    %371 = arith.negf %370 : vector<8x32xf32>
    %372 = math.exp %371 : vector<8x32xf32>
    %cst_73 = arith.constant 1.000000e+00 : f32
    %373 = vector.broadcast %cst_73 : f32 to vector<8x32xf32>
    %374 = arith.addf %373, %372 : vector<8x32xf32>
    %375 = arith.divf %373, %374 : vector<8x32xf32>
    %376 = vector.extract_strided_slice %356 {offsets = [0, 64], sizes = [8, 32], strides = [1, 1]} : vector<8x96xf32> to vector<8x32xf32>
    %377 = vector.extract_strided_slice %359 {offsets = [0, 64], sizes = [8, 32], strides = [1, 1]} : vector<8x96xf32> to vector<8x32xf32>
    %378 = arith.mulf %367, %377 : vector<8x32xf32>
    %379 = arith.addf %376, %378 : vector<8x32xf32>
    %380 = math.tanh %379 : vector<8x32xf32>
    %cst_74 = arith.constant 1.000000e+00 : f32
    %381 = vector.broadcast %cst_74 : f32 to vector<8x32xf32>
    %382 = arith.subf %381, %375 : vector<8x32xf32>
    %383 = arith.mulf %382, %380 : vector<8x32xf32>
    %384 = arith.mulf %375, %354 : vector<8x32xf32>
    %385 = arith.addf %383, %384 : vector<8x32xf32>
    %386 = vector.extract_strided_slice %294 {offsets = [5, 0, 0], sizes = [1, 8, 96], strides = [1, 1, 1]} : vector<8x8x96xf32> to vector<1x8x96xf32>
    %387 = vector.shape_cast %386 : vector<1x8x96xf32> to vector<8x96xf32>
    %cst_75 = arith.constant dense<0.000000e+00> : vector<8x96xf32>
    %388 = tpu.matmul %385, %269, %cst_75 {dimension_numbers = #tpu.dot_dimension_numbers<[1], [0], [0], [1], [0, 0, 1, 1], [], []>} : vector<8x32xf32>, vector<32x96xf32>, vector<8x96xf32> -> vector<8x96xf32>
    %389 = vector.broadcast %271 : vector<1x96xf32> to vector<8x96xf32>
    %390 = arith.addf %388, %389 : vector<8x96xf32>
    %391 = vector.extract_strided_slice %387 {offsets = [0, 0], sizes = [8, 32], strides = [1, 1]} : vector<8x96xf32> to vector<8x32xf32>
    %392 = vector.extract_strided_slice %390 {offsets = [0, 0], sizes = [8, 32], strides = [1, 1]} : vector<8x96xf32> to vector<8x32xf32>
    %393 = arith.addf %391, %392 : vector<8x32xf32>
    %394 = arith.negf %393 : vector<8x32xf32>
    %395 = math.exp %394 : vector<8x32xf32>
    %cst_76 = arith.constant 1.000000e+00 : f32
    %396 = vector.broadcast %cst_76 : f32 to vector<8x32xf32>
    %397 = arith.addf %396, %395 : vector<8x32xf32>
    %398 = arith.divf %396, %397 : vector<8x32xf32>
    %399 = vector.extract_strided_slice %387 {offsets = [0, 32], sizes = [8, 32], strides = [1, 1]} : vector<8x96xf32> to vector<8x32xf32>
    %400 = vector.extract_strided_slice %390 {offsets = [0, 32], sizes = [8, 32], strides = [1, 1]} : vector<8x96xf32> to vector<8x32xf32>
    %401 = arith.addf %399, %400 : vector<8x32xf32>
    %402 = arith.negf %401 : vector<8x32xf32>
    %403 = math.exp %402 : vector<8x32xf32>
    %cst_77 = arith.constant 1.000000e+00 : f32
    %404 = vector.broadcast %cst_77 : f32 to vector<8x32xf32>
    %405 = arith.addf %404, %403 : vector<8x32xf32>
    %406 = arith.divf %404, %405 : vector<8x32xf32>
    %407 = vector.extract_strided_slice %387 {offsets = [0, 64], sizes = [8, 32], strides = [1, 1]} : vector<8x96xf32> to vector<8x32xf32>
    %408 = vector.extract_strided_slice %390 {offsets = [0, 64], sizes = [8, 32], strides = [1, 1]} : vector<8x96xf32> to vector<8x32xf32>
    %409 = arith.mulf %398, %408 : vector<8x32xf32>
    %410 = arith.addf %407, %409 : vector<8x32xf32>
    %411 = math.tanh %410 : vector<8x32xf32>
    %cst_78 = arith.constant 1.000000e+00 : f32
    %412 = vector.broadcast %cst_78 : f32 to vector<8x32xf32>
    %413 = arith.subf %412, %406 : vector<8x32xf32>
    %414 = arith.mulf %413, %411 : vector<8x32xf32>
    %415 = arith.mulf %406, %385 : vector<8x32xf32>
    %416 = arith.addf %414, %415 : vector<8x32xf32>
    %417 = vector.extract_strided_slice %294 {offsets = [4, 0, 0], sizes = [1, 8, 96], strides = [1, 1, 1]} : vector<8x8x96xf32> to vector<1x8x96xf32>
    %418 = vector.shape_cast %417 : vector<1x8x96xf32> to vector<8x96xf32>
    %cst_79 = arith.constant dense<0.000000e+00> : vector<8x96xf32>
    %419 = tpu.matmul %416, %269, %cst_79 {dimension_numbers = #tpu.dot_dimension_numbers<[1], [0], [0], [1], [0, 0, 1, 1], [], []>} : vector<8x32xf32>, vector<32x96xf32>, vector<8x96xf32> -> vector<8x96xf32>
    %420 = vector.broadcast %271 : vector<1x96xf32> to vector<8x96xf32>
    %421 = arith.addf %419, %420 : vector<8x96xf32>
    %422 = vector.extract_strided_slice %418 {offsets = [0, 0], sizes = [8, 32], strides = [1, 1]} : vector<8x96xf32> to vector<8x32xf32>
    %423 = vector.extract_strided_slice %421 {offsets = [0, 0], sizes = [8, 32], strides = [1, 1]} : vector<8x96xf32> to vector<8x32xf32>
    %424 = arith.addf %422, %423 : vector<8x32xf32>
    %425 = arith.negf %424 : vector<8x32xf32>
    %426 = math.exp %425 : vector<8x32xf32>
    %cst_80 = arith.constant 1.000000e+00 : f32
    %427 = vector.broadcast %cst_80 : f32 to vector<8x32xf32>
    %428 = arith.addf %427, %426 : vector<8x32xf32>
    %429 = arith.divf %427, %428 : vector<8x32xf32>
    %430 = vector.extract_strided_slice %418 {offsets = [0, 32], sizes = [8, 32], strides = [1, 1]} : vector<8x96xf32> to vector<8x32xf32>
    %431 = vector.extract_strided_slice %421 {offsets = [0, 32], sizes = [8, 32], strides = [1, 1]} : vector<8x96xf32> to vector<8x32xf32>
    %432 = arith.addf %430, %431 : vector<8x32xf32>
    %433 = arith.negf %432 : vector<8x32xf32>
    %434 = math.exp %433 : vector<8x32xf32>
    %cst_81 = arith.constant 1.000000e+00 : f32
    %435 = vector.broadcast %cst_81 : f32 to vector<8x32xf32>
    %436 = arith.addf %435, %434 : vector<8x32xf32>
    %437 = arith.divf %435, %436 : vector<8x32xf32>
    %438 = vector.extract_strided_slice %418 {offsets = [0, 64], sizes = [8, 32], strides = [1, 1]} : vector<8x96xf32> to vector<8x32xf32>
    %439 = vector.extract_strided_slice %421 {offsets = [0, 64], sizes = [8, 32], strides = [1, 1]} : vector<8x96xf32> to vector<8x32xf32>
    %440 = arith.mulf %429, %439 : vector<8x32xf32>
    %441 = arith.addf %438, %440 : vector<8x32xf32>
    %442 = math.tanh %441 : vector<8x32xf32>
    %cst_82 = arith.constant 1.000000e+00 : f32
    %443 = vector.broadcast %cst_82 : f32 to vector<8x32xf32>
    %444 = arith.subf %443, %437 : vector<8x32xf32>
    %445 = arith.mulf %444, %442 : vector<8x32xf32>
    %446 = arith.mulf %437, %416 : vector<8x32xf32>
    %447 = arith.addf %445, %446 : vector<8x32xf32>
    %448 = vector.extract_strided_slice %294 {offsets = [3, 0, 0], sizes = [1, 8, 96], strides = [1, 1, 1]} : vector<8x8x96xf32> to vector<1x8x96xf32>
    %449 = vector.shape_cast %448 : vector<1x8x96xf32> to vector<8x96xf32>
    %cst_83 = arith.constant dense<0.000000e+00> : vector<8x96xf32>
    %450 = tpu.matmul %447, %269, %cst_83 {dimension_numbers = #tpu.dot_dimension_numbers<[1], [0], [0], [1], [0, 0, 1, 1], [], []>} : vector<8x32xf32>, vector<32x96xf32>, vector<8x96xf32> -> vector<8x96xf32>
    %451 = vector.broadcast %271 : vector<1x96xf32> to vector<8x96xf32>
    %452 = arith.addf %450, %451 : vector<8x96xf32>
    %453 = vector.extract_strided_slice %449 {offsets = [0, 0], sizes = [8, 32], strides = [1, 1]} : vector<8x96xf32> to vector<8x32xf32>
    %454 = vector.extract_strided_slice %452 {offsets = [0, 0], sizes = [8, 32], strides = [1, 1]} : vector<8x96xf32> to vector<8x32xf32>
    %455 = arith.addf %453, %454 : vector<8x32xf32>
    %456 = arith.negf %455 : vector<8x32xf32>
    %457 = math.exp %456 : vector<8x32xf32>
    %cst_84 = arith.constant 1.000000e+00 : f32
    %458 = vector.broadcast %cst_84 : f32 to vector<8x32xf32>
    %459 = arith.addf %458, %457 : vector<8x32xf32>
    %460 = arith.divf %458, %459 : vector<8x32xf32>
    %461 = vector.extract_strided_slice %449 {offsets = [0, 32], sizes = [8, 32], strides = [1, 1]} : vector<8x96xf32> to vector<8x32xf32>
    %462 = vector.extract_strided_slice %452 {offsets = [0, 32], sizes = [8, 32], strides = [1, 1]} : vector<8x96xf32> to vector<8x32xf32>
    %463 = arith.addf %461, %462 : vector<8x32xf32>
    %464 = arith.negf %463 : vector<8x32xf32>
    %465 = math.exp %464 : vector<8x32xf32>
    %cst_85 = arith.constant 1.000000e+00 : f32
    %466 = vector.broadcast %cst_85 : f32 to vector<8x32xf32>
    %467 = arith.addf %466, %465 : vector<8x32xf32>
    %468 = arith.divf %466, %467 : vector<8x32xf32>
    %469 = vector.extract_strided_slice %449 {offsets = [0, 64], sizes = [8, 32], strides = [1, 1]} : vector<8x96xf32> to vector<8x32xf32>
    %470 = vector.extract_strided_slice %452 {offsets = [0, 64], sizes = [8, 32], strides = [1, 1]} : vector<8x96xf32> to vector<8x32xf32>
    %471 = arith.mulf %460, %470 : vector<8x32xf32>
    %472 = arith.addf %469, %471 : vector<8x32xf32>
    %473 = math.tanh %472 : vector<8x32xf32>
    %cst_86 = arith.constant 1.000000e+00 : f32
    %474 = vector.broadcast %cst_86 : f32 to vector<8x32xf32>
    %475 = arith.subf %474, %468 : vector<8x32xf32>
    %476 = arith.mulf %475, %473 : vector<8x32xf32>
    %477 = arith.mulf %468, %447 : vector<8x32xf32>
    %478 = arith.addf %476, %477 : vector<8x32xf32>
    %479 = vector.extract_strided_slice %294 {offsets = [2, 0, 0], sizes = [1, 8, 96], strides = [1, 1, 1]} : vector<8x8x96xf32> to vector<1x8x96xf32>
    %480 = vector.shape_cast %479 : vector<1x8x96xf32> to vector<8x96xf32>
    %cst_87 = arith.constant dense<0.000000e+00> : vector<8x96xf32>
    %481 = tpu.matmul %478, %269, %cst_87 {dimension_numbers = #tpu.dot_dimension_numbers<[1], [0], [0], [1], [0, 0, 1, 1], [], []>} : vector<8x32xf32>, vector<32x96xf32>, vector<8x96xf32> -> vector<8x96xf32>
    %482 = vector.broadcast %271 : vector<1x96xf32> to vector<8x96xf32>
    %483 = arith.addf %481, %482 : vector<8x96xf32>
    %484 = vector.extract_strided_slice %480 {offsets = [0, 0], sizes = [8, 32], strides = [1, 1]} : vector<8x96xf32> to vector<8x32xf32>
    %485 = vector.extract_strided_slice %483 {offsets = [0, 0], sizes = [8, 32], strides = [1, 1]} : vector<8x96xf32> to vector<8x32xf32>
    %486 = arith.addf %484, %485 : vector<8x32xf32>
    %487 = arith.negf %486 : vector<8x32xf32>
    %488 = math.exp %487 : vector<8x32xf32>
    %cst_88 = arith.constant 1.000000e+00 : f32
    %489 = vector.broadcast %cst_88 : f32 to vector<8x32xf32>
    %490 = arith.addf %489, %488 : vector<8x32xf32>
    %491 = arith.divf %489, %490 : vector<8x32xf32>
    %492 = vector.extract_strided_slice %480 {offsets = [0, 32], sizes = [8, 32], strides = [1, 1]} : vector<8x96xf32> to vector<8x32xf32>
    %493 = vector.extract_strided_slice %483 {offsets = [0, 32], sizes = [8, 32], strides = [1, 1]} : vector<8x96xf32> to vector<8x32xf32>
    %494 = arith.addf %492, %493 : vector<8x32xf32>
    %495 = arith.negf %494 : vector<8x32xf32>
    %496 = math.exp %495 : vector<8x32xf32>
    %cst_89 = arith.constant 1.000000e+00 : f32
    %497 = vector.broadcast %cst_89 : f32 to vector<8x32xf32>
    %498 = arith.addf %497, %496 : vector<8x32xf32>
    %499 = arith.divf %497, %498 : vector<8x32xf32>
    %500 = vector.extract_strided_slice %480 {offsets = [0, 64], sizes = [8, 32], strides = [1, 1]} : vector<8x96xf32> to vector<8x32xf32>
    %501 = vector.extract_strided_slice %483 {offsets = [0, 64], sizes = [8, 32], strides = [1, 1]} : vector<8x96xf32> to vector<8x32xf32>
    %502 = arith.mulf %491, %501 : vector<8x32xf32>
    %503 = arith.addf %500, %502 : vector<8x32xf32>
    %504 = math.tanh %503 : vector<8x32xf32>
    %cst_90 = arith.constant 1.000000e+00 : f32
    %505 = vector.broadcast %cst_90 : f32 to vector<8x32xf32>
    %506 = arith.subf %505, %499 : vector<8x32xf32>
    %507 = arith.mulf %506, %504 : vector<8x32xf32>
    %508 = arith.mulf %499, %478 : vector<8x32xf32>
    %509 = arith.addf %507, %508 : vector<8x32xf32>
    %510 = vector.extract_strided_slice %294 {offsets = [1, 0, 0], sizes = [1, 8, 96], strides = [1, 1, 1]} : vector<8x8x96xf32> to vector<1x8x96xf32>
    %511 = vector.shape_cast %510 : vector<1x8x96xf32> to vector<8x96xf32>
    %cst_91 = arith.constant dense<0.000000e+00> : vector<8x96xf32>
    %512 = tpu.matmul %509, %269, %cst_91 {dimension_numbers = #tpu.dot_dimension_numbers<[1], [0], [0], [1], [0, 0, 1, 1], [], []>} : vector<8x32xf32>, vector<32x96xf32>, vector<8x96xf32> -> vector<8x96xf32>
    %513 = vector.broadcast %271 : vector<1x96xf32> to vector<8x96xf32>
    %514 = arith.addf %512, %513 : vector<8x96xf32>
    %515 = vector.extract_strided_slice %511 {offsets = [0, 0], sizes = [8, 32], strides = [1, 1]} : vector<8x96xf32> to vector<8x32xf32>
    %516 = vector.extract_strided_slice %514 {offsets = [0, 0], sizes = [8, 32], strides = [1, 1]} : vector<8x96xf32> to vector<8x32xf32>
    %517 = arith.addf %515, %516 : vector<8x32xf32>
    %518 = arith.negf %517 : vector<8x32xf32>
    %519 = math.exp %518 : vector<8x32xf32>
    %cst_92 = arith.constant 1.000000e+00 : f32
    %520 = vector.broadcast %cst_92 : f32 to vector<8x32xf32>
    %521 = arith.addf %520, %519 : vector<8x32xf32>
    %522 = arith.divf %520, %521 : vector<8x32xf32>
    %523 = vector.extract_strided_slice %511 {offsets = [0, 32], sizes = [8, 32], strides = [1, 1]} : vector<8x96xf32> to vector<8x32xf32>
    %524 = vector.extract_strided_slice %514 {offsets = [0, 32], sizes = [8, 32], strides = [1, 1]} : vector<8x96xf32> to vector<8x32xf32>
    %525 = arith.addf %523, %524 : vector<8x32xf32>
    %526 = arith.negf %525 : vector<8x32xf32>
    %527 = math.exp %526 : vector<8x32xf32>
    %cst_93 = arith.constant 1.000000e+00 : f32
    %528 = vector.broadcast %cst_93 : f32 to vector<8x32xf32>
    %529 = arith.addf %528, %527 : vector<8x32xf32>
    %530 = arith.divf %528, %529 : vector<8x32xf32>
    %531 = vector.extract_strided_slice %511 {offsets = [0, 64], sizes = [8, 32], strides = [1, 1]} : vector<8x96xf32> to vector<8x32xf32>
    %532 = vector.extract_strided_slice %514 {offsets = [0, 64], sizes = [8, 32], strides = [1, 1]} : vector<8x96xf32> to vector<8x32xf32>
    %533 = arith.mulf %522, %532 : vector<8x32xf32>
    %534 = arith.addf %531, %533 : vector<8x32xf32>
    %535 = math.tanh %534 : vector<8x32xf32>
    %cst_94 = arith.constant 1.000000e+00 : f32
    %536 = vector.broadcast %cst_94 : f32 to vector<8x32xf32>
    %537 = arith.subf %536, %530 : vector<8x32xf32>
    %538 = arith.mulf %537, %535 : vector<8x32xf32>
    %539 = arith.mulf %530, %509 : vector<8x32xf32>
    %540 = arith.addf %538, %539 : vector<8x32xf32>
    %541 = vector.shape_cast %540 : vector<8x32xf32> to vector<8x1x32xf32>
    %542 = vector.shape_cast %509 : vector<8x32xf32> to vector<8x1x32xf32>
    %543 = vector.shape_cast %478 : vector<8x32xf32> to vector<8x1x32xf32>
    %544 = vector.shape_cast %447 : vector<8x32xf32> to vector<8x1x32xf32>
    %545 = vector.shape_cast %416 : vector<8x32xf32> to vector<8x1x32xf32>
    %546 = vector.shape_cast %385 : vector<8x32xf32> to vector<8x1x32xf32>
    %547 = vector.shape_cast %354 : vector<8x32xf32> to vector<8x1x32xf32>
    %548 = vector.shape_cast %323 : vector<8x32xf32> to vector<8x1x32xf32>
    %549 = tpu.concatenate %541, %542, %543, %544, %545, %546, %547, %548 in 1 : vector<8x1x32xf32>, vector<8x1x32xf32>, vector<8x1x32xf32>, vector<8x1x32xf32>, vector<8x1x32xf32>, vector<8x1x32xf32>, vector<8x1x32xf32>, vector<8x1x32xf32> -> vector<8x8x32xf32>
    %550 = vector.shape_cast %273 : vector<1x32xf32> to vector<1x1x32xf32>
    %551 = vector.broadcast %550 : vector<1x1x32xf32> to vector<8x8x32xf32>
    %552 = arith.mulf %549, %551 : vector<8x8x32xf32>
    %cst_95 = arith.constant dense<0.000000e+00> : vector<8x8xf32>
    %553 = vector.multi_reduction <add>, %552, %cst_95 [2] : vector<8x8x32xf32> to vector<8x8xf32>
    %554 = vector.broadcast %275 : vector<1x1xf32> to vector<8x8xf32>
    %555 = arith.addf %553, %554 : vector<8x8xf32>
    %c0_i32 = arith.constant 0 : i32
    %556 = vector.broadcast %c0_i32 : i32 to vector<8x1xi32>
    %557 = arith.cmpi eq, %1, %556 : vector<8x1xi32>
    %558 = vector.shape_cast %557 : vector<8x1xi1> to vector<8x1xi1>
    %559 = vector.broadcast %558 : vector<8x1xi1> to vector<8x8xi1>
    %560 = arith.select %559, %555, %263 : vector<8x8xi1>, vector<8x8xf32>
    %c1 = arith.constant 1 : index
    %c0_96 = arith.constant 0 : index
    %c0_97 = arith.constant 0 : index
    %561 = vector.load %arg7[%c1, %c0_96, %c0_97] : memref<3x1x96xf32, #tpu.memory_space<vmem>>, vector<1x1x96xf32>
    %562 = vector.shape_cast %561 : vector<1x1x96xf32> to vector<1x96xf32>
    %c1_98 = arith.constant 1 : index
    %c0_99 = arith.constant 0 : index
    %c0_100 = arith.constant 0 : index
    %563 = vector.load %arg8[%c1_98, %c0_99, %c0_100] : memref<3x1x96xf32, #tpu.memory_space<vmem>>, vector<1x1x96xf32>
    %564 = vector.shape_cast %563 : vector<1x1x96xf32> to vector<1x96xf32>
    %c1_101 = arith.constant 1 : index
    %c0_102 = arith.constant 0 : index
    %c0_103 = arith.constant 0 : index
    %565 = vector.load %arg9[%c1_101, %c0_102, %c0_103] : memref<3x32x96xf32, #tpu.memory_space<vmem>>, vector<1x32x96xf32>
    %566 = vector.shape_cast %565 : vector<1x32x96xf32> to vector<32x96xf32>
    %c1_104 = arith.constant 1 : index
    %c0_105 = arith.constant 0 : index
    %c0_106 = arith.constant 0 : index
    %567 = vector.load %arg10[%c1_104, %c0_105, %c0_106] : memref<3x1x96xf32, #tpu.memory_space<vmem>>, vector<1x1x96xf32>
    %568 = vector.shape_cast %567 : vector<1x1x96xf32> to vector<1x96xf32>
    %c1_107 = arith.constant 1 : index
    %c0_108 = arith.constant 0 : index
    %c0_109 = arith.constant 0 : index
    %569 = vector.load %arg11[%c1_107, %c0_108, %c0_109] : memref<3x1x32xf32, #tpu.memory_space<vmem>>, vector<1x1x32xf32>
    %570 = vector.shape_cast %569 : vector<1x1x32xf32> to vector<1x32xf32>
    %c1_110 = arith.constant 1 : index
    %c0_111 = arith.constant 0 : index
    %c0_112 = arith.constant 0 : index
    %571 = vector.load %arg12[%c1_110, %c0_111, %c0_112] : memref<3x1x1xf32, #tpu.memory_space<vmem>>, vector<1x1x1xf32>
    %572 = vector.shape_cast %571 : vector<1x1x1xf32> to vector<1x1xf32>
    %573 = vector.broadcast %570 : vector<1x32xf32> to vector<8x32xf32>
    %574 = arith.mulf %262, %573 : vector<8x32xf32>
    %cst_113 = arith.constant dense<0.000000e+00> : vector<8xf32>
    %575 = vector.multi_reduction <add>, %574, %cst_113 [1] : vector<8x32xf32> to vector<8xf32>
    %576 = vector.shape_cast %575 : vector<8xf32> to vector<8x1xf32>
    %577 = vector.broadcast %572 : vector<1x1xf32> to vector<8x1xf32>
    %578 = arith.addf %576, %577 : vector<8x1xf32>
    %579 = vector.broadcast %578 : vector<8x1xf32> to vector<8x96xf32>
    %580 = vector.broadcast %562 : vector<1x96xf32> to vector<8x96xf32>
    %581 = arith.mulf %579, %580 : vector<8x96xf32>
    %582 = vector.broadcast %564 : vector<1x96xf32> to vector<8x96xf32>
    %583 = arith.addf %581, %582 : vector<8x96xf32>
    %584 = vector.shape_cast %0 : vector<8x8xf32> to vector<8x8x1xf32>
    %585 = vector.shape_cast %562 : vector<1x96xf32> to vector<1x1x96xf32>
    %586 = vector.broadcast %584 : vector<8x8x1xf32> to vector<8x8x96xf32>
    %587 = vector.broadcast %585 : vector<1x1x96xf32> to vector<8x8x96xf32>
    %588 = arith.mulf %586, %587 : vector<8x8x96xf32>
    %589 = vector.shape_cast %564 : vector<1x96xf32> to vector<1x1x96xf32>
    %590 = vector.broadcast %589 : vector<1x1x96xf32> to vector<8x8x96xf32>
    %591 = arith.addf %588, %590 : vector<8x8x96xf32>
    %cst_114 = arith.constant dense<0.000000e+00> : vector<8x96xf32>
    %592 = tpu.matmul %262, %566, %cst_114 {dimension_numbers = #tpu.dot_dimension_numbers<[1], [0], [0], [1], [0, 0, 1, 1], [], []>} : vector<8x32xf32>, vector<32x96xf32>, vector<8x96xf32> -> vector<8x96xf32>
    %593 = vector.broadcast %568 : vector<1x96xf32> to vector<8x96xf32>
    %594 = arith.addf %592, %593 : vector<8x96xf32>
    %595 = vector.extract_strided_slice %583 {offsets = [0, 0], sizes = [8, 32], strides = [1, 1]} : vector<8x96xf32> to vector<8x32xf32>
    %596 = vector.extract_strided_slice %594 {offsets = [0, 0], sizes = [8, 32], strides = [1, 1]} : vector<8x96xf32> to vector<8x32xf32>
    %597 = arith.addf %595, %596 : vector<8x32xf32>
    %598 = arith.negf %597 : vector<8x32xf32>
    %599 = math.exp %598 : vector<8x32xf32>
    %cst_115 = arith.constant 1.000000e+00 : f32
    %600 = vector.broadcast %cst_115 : f32 to vector<8x32xf32>
    %601 = arith.addf %600, %599 : vector<8x32xf32>
    %602 = arith.divf %600, %601 : vector<8x32xf32>
    %603 = vector.extract_strided_slice %583 {offsets = [0, 32], sizes = [8, 32], strides = [1, 1]} : vector<8x96xf32> to vector<8x32xf32>
    %604 = vector.extract_strided_slice %594 {offsets = [0, 32], sizes = [8, 32], strides = [1, 1]} : vector<8x96xf32> to vector<8x32xf32>
    %605 = arith.addf %603, %604 : vector<8x32xf32>
    %606 = arith.negf %605 : vector<8x32xf32>
    %607 = math.exp %606 : vector<8x32xf32>
    %cst_116 = arith.constant 1.000000e+00 : f32
    %608 = vector.broadcast %cst_116 : f32 to vector<8x32xf32>
    %609 = arith.addf %608, %607 : vector<8x32xf32>
    %610 = arith.divf %608, %609 : vector<8x32xf32>
    %611 = vector.extract_strided_slice %583 {offsets = [0, 64], sizes = [8, 32], strides = [1, 1]} : vector<8x96xf32> to vector<8x32xf32>
    %612 = vector.extract_strided_slice %594 {offsets = [0, 64], sizes = [8, 32], strides = [1, 1]} : vector<8x96xf32> to vector<8x32xf32>
    %613 = arith.mulf %602, %612 : vector<8x32xf32>
    %614 = arith.addf %611, %613 : vector<8x32xf32>
    %615 = math.tanh %614 : vector<8x32xf32>
    %cst_117 = arith.constant 1.000000e+00 : f32
    %616 = vector.broadcast %cst_117 : f32 to vector<8x32xf32>
    %617 = arith.subf %616, %610 : vector<8x32xf32>
    %618 = arith.mulf %617, %615 : vector<8x32xf32>
    %619 = arith.mulf %610, %262 : vector<8x32xf32>
    %620 = arith.addf %618, %619 : vector<8x32xf32>
    %621 = vector.extract_strided_slice %591 {offsets = [7, 0, 0], sizes = [1, 8, 96], strides = [1, 1, 1]} : vector<8x8x96xf32> to vector<1x8x96xf32>
    %622 = vector.shape_cast %621 : vector<1x8x96xf32> to vector<8x96xf32>
    %cst_118 = arith.constant dense<0.000000e+00> : vector<8x96xf32>
    %623 = tpu.matmul %620, %566, %cst_118 {dimension_numbers = #tpu.dot_dimension_numbers<[1], [0], [0], [1], [0, 0, 1, 1], [], []>} : vector<8x32xf32>, vector<32x96xf32>, vector<8x96xf32> -> vector<8x96xf32>
    %624 = vector.broadcast %568 : vector<1x96xf32> to vector<8x96xf32>
    %625 = arith.addf %623, %624 : vector<8x96xf32>
    %626 = vector.extract_strided_slice %622 {offsets = [0, 0], sizes = [8, 32], strides = [1, 1]} : vector<8x96xf32> to vector<8x32xf32>
    %627 = vector.extract_strided_slice %625 {offsets = [0, 0], sizes = [8, 32], strides = [1, 1]} : vector<8x96xf32> to vector<8x32xf32>
    %628 = arith.addf %626, %627 : vector<8x32xf32>
    %629 = arith.negf %628 : vector<8x32xf32>
    %630 = math.exp %629 : vector<8x32xf32>
    %cst_119 = arith.constant 1.000000e+00 : f32
    %631 = vector.broadcast %cst_119 : f32 to vector<8x32xf32>
    %632 = arith.addf %631, %630 : vector<8x32xf32>
    %633 = arith.divf %631, %632 : vector<8x32xf32>
    %634 = vector.extract_strided_slice %622 {offsets = [0, 32], sizes = [8, 32], strides = [1, 1]} : vector<8x96xf32> to vector<8x32xf32>
    %635 = vector.extract_strided_slice %625 {offsets = [0, 32], sizes = [8, 32], strides = [1, 1]} : vector<8x96xf32> to vector<8x32xf32>
    %636 = arith.addf %634, %635 : vector<8x32xf32>
    %637 = arith.negf %636 : vector<8x32xf32>
    %638 = math.exp %637 : vector<8x32xf32>
    %cst_120 = arith.constant 1.000000e+00 : f32
    %639 = vector.broadcast %cst_120 : f32 to vector<8x32xf32>
    %640 = arith.addf %639, %638 : vector<8x32xf32>
    %641 = arith.divf %639, %640 : vector<8x32xf32>
    %642 = vector.extract_strided_slice %622 {offsets = [0, 64], sizes = [8, 32], strides = [1, 1]} : vector<8x96xf32> to vector<8x32xf32>
    %643 = vector.extract_strided_slice %625 {offsets = [0, 64], sizes = [8, 32], strides = [1, 1]} : vector<8x96xf32> to vector<8x32xf32>
    %644 = arith.mulf %633, %643 : vector<8x32xf32>
    %645 = arith.addf %642, %644 : vector<8x32xf32>
    %646 = math.tanh %645 : vector<8x32xf32>
    %cst_121 = arith.constant 1.000000e+00 : f32
    %647 = vector.broadcast %cst_121 : f32 to vector<8x32xf32>
    %648 = arith.subf %647, %641 : vector<8x32xf32>
    %649 = arith.mulf %648, %646 : vector<8x32xf32>
    %650 = arith.mulf %641, %620 : vector<8x32xf32>
    %651 = arith.addf %649, %650 : vector<8x32xf32>
    %652 = vector.extract_strided_slice %591 {offsets = [6, 0, 0], sizes = [1, 8, 96], strides = [1, 1, 1]} : vector<8x8x96xf32> to vector<1x8x96xf32>
    %653 = vector.shape_cast %652 : vector<1x8x96xf32> to vector<8x96xf32>
    %cst_122 = arith.constant dense<0.000000e+00> : vector<8x96xf32>
    %654 = tpu.matmul %651, %566, %cst_122 {dimension_numbers = #tpu.dot_dimension_numbers<[1], [0], [0], [1], [0, 0, 1, 1], [], []>} : vector<8x32xf32>, vector<32x96xf32>, vector<8x96xf32> -> vector<8x96xf32>
    %655 = vector.broadcast %568 : vector<1x96xf32> to vector<8x96xf32>
    %656 = arith.addf %654, %655 : vector<8x96xf32>
    %657 = vector.extract_strided_slice %653 {offsets = [0, 0], sizes = [8, 32], strides = [1, 1]} : vector<8x96xf32> to vector<8x32xf32>
    %658 = vector.extract_strided_slice %656 {offsets = [0, 0], sizes = [8, 32], strides = [1, 1]} : vector<8x96xf32> to vector<8x32xf32>
    %659 = arith.addf %657, %658 : vector<8x32xf32>
    %660 = arith.negf %659 : vector<8x32xf32>
    %661 = math.exp %660 : vector<8x32xf32>
    %cst_123 = arith.constant 1.000000e+00 : f32
    %662 = vector.broadcast %cst_123 : f32 to vector<8x32xf32>
    %663 = arith.addf %662, %661 : vector<8x32xf32>
    %664 = arith.divf %662, %663 : vector<8x32xf32>
    %665 = vector.extract_strided_slice %653 {offsets = [0, 32], sizes = [8, 32], strides = [1, 1]} : vector<8x96xf32> to vector<8x32xf32>
    %666 = vector.extract_strided_slice %656 {offsets = [0, 32], sizes = [8, 32], strides = [1, 1]} : vector<8x96xf32> to vector<8x32xf32>
    %667 = arith.addf %665, %666 : vector<8x32xf32>
    %668 = arith.negf %667 : vector<8x32xf32>
    %669 = math.exp %668 : vector<8x32xf32>
    %cst_124 = arith.constant 1.000000e+00 : f32
    %670 = vector.broadcast %cst_124 : f32 to vector<8x32xf32>
    %671 = arith.addf %670, %669 : vector<8x32xf32>
    %672 = arith.divf %670, %671 : vector<8x32xf32>
    %673 = vector.extract_strided_slice %653 {offsets = [0, 64], sizes = [8, 32], strides = [1, 1]} : vector<8x96xf32> to vector<8x32xf32>
    %674 = vector.extract_strided_slice %656 {offsets = [0, 64], sizes = [8, 32], strides = [1, 1]} : vector<8x96xf32> to vector<8x32xf32>
    %675 = arith.mulf %664, %674 : vector<8x32xf32>
    %676 = arith.addf %673, %675 : vector<8x32xf32>
    %677 = math.tanh %676 : vector<8x32xf32>
    %cst_125 = arith.constant 1.000000e+00 : f32
    %678 = vector.broadcast %cst_125 : f32 to vector<8x32xf32>
    %679 = arith.subf %678, %672 : vector<8x32xf32>
    %680 = arith.mulf %679, %677 : vector<8x32xf32>
    %681 = arith.mulf %672, %651 : vector<8x32xf32>
    %682 = arith.addf %680, %681 : vector<8x32xf32>
    %683 = vector.extract_strided_slice %591 {offsets = [5, 0, 0], sizes = [1, 8, 96], strides = [1, 1, 1]} : vector<8x8x96xf32> to vector<1x8x96xf32>
    %684 = vector.shape_cast %683 : vector<1x8x96xf32> to vector<8x96xf32>
    %cst_126 = arith.constant dense<0.000000e+00> : vector<8x96xf32>
    %685 = tpu.matmul %682, %566, %cst_126 {dimension_numbers = #tpu.dot_dimension_numbers<[1], [0], [0], [1], [0, 0, 1, 1], [], []>} : vector<8x32xf32>, vector<32x96xf32>, vector<8x96xf32> -> vector<8x96xf32>
    %686 = vector.broadcast %568 : vector<1x96xf32> to vector<8x96xf32>
    %687 = arith.addf %685, %686 : vector<8x96xf32>
    %688 = vector.extract_strided_slice %684 {offsets = [0, 0], sizes = [8, 32], strides = [1, 1]} : vector<8x96xf32> to vector<8x32xf32>
    %689 = vector.extract_strided_slice %687 {offsets = [0, 0], sizes = [8, 32], strides = [1, 1]} : vector<8x96xf32> to vector<8x32xf32>
    %690 = arith.addf %688, %689 : vector<8x32xf32>
    %691 = arith.negf %690 : vector<8x32xf32>
    %692 = math.exp %691 : vector<8x32xf32>
    %cst_127 = arith.constant 1.000000e+00 : f32
    %693 = vector.broadcast %cst_127 : f32 to vector<8x32xf32>
    %694 = arith.addf %693, %692 : vector<8x32xf32>
    %695 = arith.divf %693, %694 : vector<8x32xf32>
    %696 = vector.extract_strided_slice %684 {offsets = [0, 32], sizes = [8, 32], strides = [1, 1]} : vector<8x96xf32> to vector<8x32xf32>
    %697 = vector.extract_strided_slice %687 {offsets = [0, 32], sizes = [8, 32], strides = [1, 1]} : vector<8x96xf32> to vector<8x32xf32>
    %698 = arith.addf %696, %697 : vector<8x32xf32>
    %699 = arith.negf %698 : vector<8x32xf32>
    %700 = math.exp %699 : vector<8x32xf32>
    %cst_128 = arith.constant 1.000000e+00 : f32
    %701 = vector.broadcast %cst_128 : f32 to vector<8x32xf32>
    %702 = arith.addf %701, %700 : vector<8x32xf32>
    %703 = arith.divf %701, %702 : vector<8x32xf32>
    %704 = vector.extract_strided_slice %684 {offsets = [0, 64], sizes = [8, 32], strides = [1, 1]} : vector<8x96xf32> to vector<8x32xf32>
    %705 = vector.extract_strided_slice %687 {offsets = [0, 64], sizes = [8, 32], strides = [1, 1]} : vector<8x96xf32> to vector<8x32xf32>
    %706 = arith.mulf %695, %705 : vector<8x32xf32>
    %707 = arith.addf %704, %706 : vector<8x32xf32>
    %708 = math.tanh %707 : vector<8x32xf32>
    %cst_129 = arith.constant 1.000000e+00 : f32
    %709 = vector.broadcast %cst_129 : f32 to vector<8x32xf32>
    %710 = arith.subf %709, %703 : vector<8x32xf32>
    %711 = arith.mulf %710, %708 : vector<8x32xf32>
    %712 = arith.mulf %703, %682 : vector<8x32xf32>
    %713 = arith.addf %711, %712 : vector<8x32xf32>
    %714 = vector.extract_strided_slice %591 {offsets = [4, 0, 0], sizes = [1, 8, 96], strides = [1, 1, 1]} : vector<8x8x96xf32> to vector<1x8x96xf32>
    %715 = vector.shape_cast %714 : vector<1x8x96xf32> to vector<8x96xf32>
    %cst_130 = arith.constant dense<0.000000e+00> : vector<8x96xf32>
    %716 = tpu.matmul %713, %566, %cst_130 {dimension_numbers = #tpu.dot_dimension_numbers<[1], [0], [0], [1], [0, 0, 1, 1], [], []>} : vector<8x32xf32>, vector<32x96xf32>, vector<8x96xf32> -> vector<8x96xf32>
    %717 = vector.broadcast %568 : vector<1x96xf32> to vector<8x96xf32>
    %718 = arith.addf %716, %717 : vector<8x96xf32>
    %719 = vector.extract_strided_slice %715 {offsets = [0, 0], sizes = [8, 32], strides = [1, 1]} : vector<8x96xf32> to vector<8x32xf32>
    %720 = vector.extract_strided_slice %718 {offsets = [0, 0], sizes = [8, 32], strides = [1, 1]} : vector<8x96xf32> to vector<8x32xf32>
    %721 = arith.addf %719, %720 : vector<8x32xf32>
    %722 = arith.negf %721 : vector<8x32xf32>
    %723 = math.exp %722 : vector<8x32xf32>
    %cst_131 = arith.constant 1.000000e+00 : f32
    %724 = vector.broadcast %cst_131 : f32 to vector<8x32xf32>
    %725 = arith.addf %724, %723 : vector<8x32xf32>
    %726 = arith.divf %724, %725 : vector<8x32xf32>
    %727 = vector.extract_strided_slice %715 {offsets = [0, 32], sizes = [8, 32], strides = [1, 1]} : vector<8x96xf32> to vector<8x32xf32>
    %728 = vector.extract_strided_slice %718 {offsets = [0, 32], sizes = [8, 32], strides = [1, 1]} : vector<8x96xf32> to vector<8x32xf32>
    %729 = arith.addf %727, %728 : vector<8x32xf32>
    %730 = arith.negf %729 : vector<8x32xf32>
    %731 = math.exp %730 : vector<8x32xf32>
    %cst_132 = arith.constant 1.000000e+00 : f32
    %732 = vector.broadcast %cst_132 : f32 to vector<8x32xf32>
    %733 = arith.addf %732, %731 : vector<8x32xf32>
    %734 = arith.divf %732, %733 : vector<8x32xf32>
    %735 = vector.extract_strided_slice %715 {offsets = [0, 64], sizes = [8, 32], strides = [1, 1]} : vector<8x96xf32> to vector<8x32xf32>
    %736 = vector.extract_strided_slice %718 {offsets = [0, 64], sizes = [8, 32], strides = [1, 1]} : vector<8x96xf32> to vector<8x32xf32>
    %737 = arith.mulf %726, %736 : vector<8x32xf32>
    %738 = arith.addf %735, %737 : vector<8x32xf32>
    %739 = math.tanh %738 : vector<8x32xf32>
    %cst_133 = arith.constant 1.000000e+00 : f32
    %740 = vector.broadcast %cst_133 : f32 to vector<8x32xf32>
    %741 = arith.subf %740, %734 : vector<8x32xf32>
    %742 = arith.mulf %741, %739 : vector<8x32xf32>
    %743 = arith.mulf %734, %713 : vector<8x32xf32>
    %744 = arith.addf %742, %743 : vector<8x32xf32>
    %745 = vector.extract_strided_slice %591 {offsets = [3, 0, 0], sizes = [1, 8, 96], strides = [1, 1, 1]} : vector<8x8x96xf32> to vector<1x8x96xf32>
    %746 = vector.shape_cast %745 : vector<1x8x96xf32> to vector<8x96xf32>
    %cst_134 = arith.constant dense<0.000000e+00> : vector<8x96xf32>
    %747 = tpu.matmul %744, %566, %cst_134 {dimension_numbers = #tpu.dot_dimension_numbers<[1], [0], [0], [1], [0, 0, 1, 1], [], []>} : vector<8x32xf32>, vector<32x96xf32>, vector<8x96xf32> -> vector<8x96xf32>
    %748 = vector.broadcast %568 : vector<1x96xf32> to vector<8x96xf32>
    %749 = arith.addf %747, %748 : vector<8x96xf32>
    %750 = vector.extract_strided_slice %746 {offsets = [0, 0], sizes = [8, 32], strides = [1, 1]} : vector<8x96xf32> to vector<8x32xf32>
    %751 = vector.extract_strided_slice %749 {offsets = [0, 0], sizes = [8, 32], strides = [1, 1]} : vector<8x96xf32> to vector<8x32xf32>
    %752 = arith.addf %750, %751 : vector<8x32xf32>
    %753 = arith.negf %752 : vector<8x32xf32>
    %754 = math.exp %753 : vector<8x32xf32>
    %cst_135 = arith.constant 1.000000e+00 : f32
    %755 = vector.broadcast %cst_135 : f32 to vector<8x32xf32>
    %756 = arith.addf %755, %754 : vector<8x32xf32>
    %757 = arith.divf %755, %756 : vector<8x32xf32>
    %758 = vector.extract_strided_slice %746 {offsets = [0, 32], sizes = [8, 32], strides = [1, 1]} : vector<8x96xf32> to vector<8x32xf32>
    %759 = vector.extract_strided_slice %749 {offsets = [0, 32], sizes = [8, 32], strides = [1, 1]} : vector<8x96xf32> to vector<8x32xf32>
    %760 = arith.addf %758, %759 : vector<8x32xf32>
    %761 = arith.negf %760 : vector<8x32xf32>
    %762 = math.exp %761 : vector<8x32xf32>
    %cst_136 = arith.constant 1.000000e+00 : f32
    %763 = vector.broadcast %cst_136 : f32 to vector<8x32xf32>
    %764 = arith.addf %763, %762 : vector<8x32xf32>
    %765 = arith.divf %763, %764 : vector<8x32xf32>
    %766 = vector.extract_strided_slice %746 {offsets = [0, 64], sizes = [8, 32], strides = [1, 1]} : vector<8x96xf32> to vector<8x32xf32>
    %767 = vector.extract_strided_slice %749 {offsets = [0, 64], sizes = [8, 32], strides = [1, 1]} : vector<8x96xf32> to vector<8x32xf32>
    %768 = arith.mulf %757, %767 : vector<8x32xf32>
    %769 = arith.addf %766, %768 : vector<8x32xf32>
    %770 = math.tanh %769 : vector<8x32xf32>
    %cst_137 = arith.constant 1.000000e+00 : f32
    %771 = vector.broadcast %cst_137 : f32 to vector<8x32xf32>
    %772 = arith.subf %771, %765 : vector<8x32xf32>
    %773 = arith.mulf %772, %770 : vector<8x32xf32>
    %774 = arith.mulf %765, %744 : vector<8x32xf32>
    %775 = arith.addf %773, %774 : vector<8x32xf32>
    %776 = vector.extract_strided_slice %591 {offsets = [2, 0, 0], sizes = [1, 8, 96], strides = [1, 1, 1]} : vector<8x8x96xf32> to vector<1x8x96xf32>
    %777 = vector.shape_cast %776 : vector<1x8x96xf32> to vector<8x96xf32>
    %cst_138 = arith.constant dense<0.000000e+00> : vector<8x96xf32>
    %778 = tpu.matmul %775, %566, %cst_138 {dimension_numbers = #tpu.dot_dimension_numbers<[1], [0], [0], [1], [0, 0, 1, 1], [], []>} : vector<8x32xf32>, vector<32x96xf32>, vector<8x96xf32> -> vector<8x96xf32>
    %779 = vector.broadcast %568 : vector<1x96xf32> to vector<8x96xf32>
    %780 = arith.addf %778, %779 : vector<8x96xf32>
    %781 = vector.extract_strided_slice %777 {offsets = [0, 0], sizes = [8, 32], strides = [1, 1]} : vector<8x96xf32> to vector<8x32xf32>
    %782 = vector.extract_strided_slice %780 {offsets = [0, 0], sizes = [8, 32], strides = [1, 1]} : vector<8x96xf32> to vector<8x32xf32>
    %783 = arith.addf %781, %782 : vector<8x32xf32>
    %784 = arith.negf %783 : vector<8x32xf32>
    %785 = math.exp %784 : vector<8x32xf32>
    %cst_139 = arith.constant 1.000000e+00 : f32
    %786 = vector.broadcast %cst_139 : f32 to vector<8x32xf32>
    %787 = arith.addf %786, %785 : vector<8x32xf32>
    %788 = arith.divf %786, %787 : vector<8x32xf32>
    %789 = vector.extract_strided_slice %777 {offsets = [0, 32], sizes = [8, 32], strides = [1, 1]} : vector<8x96xf32> to vector<8x32xf32>
    %790 = vector.extract_strided_slice %780 {offsets = [0, 32], sizes = [8, 32], strides = [1, 1]} : vector<8x96xf32> to vector<8x32xf32>
    %791 = arith.addf %789, %790 : vector<8x32xf32>
    %792 = arith.negf %791 : vector<8x32xf32>
    %793 = math.exp %792 : vector<8x32xf32>
    %cst_140 = arith.constant 1.000000e+00 : f32
    %794 = vector.broadcast %cst_140 : f32 to vector<8x32xf32>
    %795 = arith.addf %794, %793 : vector<8x32xf32>
    %796 = arith.divf %794, %795 : vector<8x32xf32>
    %797 = vector.extract_strided_slice %777 {offsets = [0, 64], sizes = [8, 32], strides = [1, 1]} : vector<8x96xf32> to vector<8x32xf32>
    %798 = vector.extract_strided_slice %780 {offsets = [0, 64], sizes = [8, 32], strides = [1, 1]} : vector<8x96xf32> to vector<8x32xf32>
    %799 = arith.mulf %788, %798 : vector<8x32xf32>
    %800 = arith.addf %797, %799 : vector<8x32xf32>
    %801 = math.tanh %800 : vector<8x32xf32>
    %cst_141 = arith.constant 1.000000e+00 : f32
    %802 = vector.broadcast %cst_141 : f32 to vector<8x32xf32>
    %803 = arith.subf %802, %796 : vector<8x32xf32>
    %804 = arith.mulf %803, %801 : vector<8x32xf32>
    %805 = arith.mulf %796, %775 : vector<8x32xf32>
    %806 = arith.addf %804, %805 : vector<8x32xf32>
    %807 = vector.extract_strided_slice %591 {offsets = [1, 0, 0], sizes = [1, 8, 96], strides = [1, 1, 1]} : vector<8x8x96xf32> to vector<1x8x96xf32>
    %808 = vector.shape_cast %807 : vector<1x8x96xf32> to vector<8x96xf32>
    %cst_142 = arith.constant dense<0.000000e+00> : vector<8x96xf32>
    %809 = tpu.matmul %806, %566, %cst_142 {dimension_numbers = #tpu.dot_dimension_numbers<[1], [0], [0], [1], [0, 0, 1, 1], [], []>} : vector<8x32xf32>, vector<32x96xf32>, vector<8x96xf32> -> vector<8x96xf32>
    %810 = vector.broadcast %568 : vector<1x96xf32> to vector<8x96xf32>
    %811 = arith.addf %809, %810 : vector<8x96xf32>
    %812 = vector.extract_strided_slice %808 {offsets = [0, 0], sizes = [8, 32], strides = [1, 1]} : vector<8x96xf32> to vector<8x32xf32>
    %813 = vector.extract_strided_slice %811 {offsets = [0, 0], sizes = [8, 32], strides = [1, 1]} : vector<8x96xf32> to vector<8x32xf32>
    %814 = arith.addf %812, %813 : vector<8x32xf32>
    %815 = arith.negf %814 : vector<8x32xf32>
    %816 = math.exp %815 : vector<8x32xf32>
    %cst_143 = arith.constant 1.000000e+00 : f32
    %817 = vector.broadcast %cst_143 : f32 to vector<8x32xf32>
    %818 = arith.addf %817, %816 : vector<8x32xf32>
    %819 = arith.divf %817, %818 : vector<8x32xf32>
    %820 = vector.extract_strided_slice %808 {offsets = [0, 32], sizes = [8, 32], strides = [1, 1]} : vector<8x96xf32> to vector<8x32xf32>
    %821 = vector.extract_strided_slice %811 {offsets = [0, 32], sizes = [8, 32], strides = [1, 1]} : vector<8x96xf32> to vector<8x32xf32>
    %822 = arith.addf %820, %821 : vector<8x32xf32>
    %823 = arith.negf %822 : vector<8x32xf32>
    %824 = math.exp %823 : vector<8x32xf32>
    %cst_144 = arith.constant 1.000000e+00 : f32
    %825 = vector.broadcast %cst_144 : f32 to vector<8x32xf32>
    %826 = arith.addf %825, %824 : vector<8x32xf32>
    %827 = arith.divf %825, %826 : vector<8x32xf32>
    %828 = vector.extract_strided_slice %808 {offsets = [0, 64], sizes = [8, 32], strides = [1, 1]} : vector<8x96xf32> to vector<8x32xf32>
    %829 = vector.extract_strided_slice %811 {offsets = [0, 64], sizes = [8, 32], strides = [1, 1]} : vector<8x96xf32> to vector<8x32xf32>
    %830 = arith.mulf %819, %829 : vector<8x32xf32>
    %831 = arith.addf %828, %830 : vector<8x32xf32>
    %832 = math.tanh %831 : vector<8x32xf32>
    %cst_145 = arith.constant 1.000000e+00 : f32
    %833 = vector.broadcast %cst_145 : f32 to vector<8x32xf32>
    %834 = arith.subf %833, %827 : vector<8x32xf32>
    %835 = arith.mulf %834, %832 : vector<8x32xf32>
    %836 = arith.mulf %827, %806 : vector<8x32xf32>
    %837 = arith.addf %835, %836 : vector<8x32xf32>
    %838 = vector.shape_cast %837 : vector<8x32xf32> to vector<8x1x32xf32>
    %839 = vector.shape_cast %806 : vector<8x32xf32> to vector<8x1x32xf32>
    %840 = vector.shape_cast %775 : vector<8x32xf32> to vector<8x1x32xf32>
    %841 = vector.shape_cast %744 : vector<8x32xf32> to vector<8x1x32xf32>
    %842 = vector.shape_cast %713 : vector<8x32xf32> to vector<8x1x32xf32>
    %843 = vector.shape_cast %682 : vector<8x32xf32> to vector<8x1x32xf32>
    %844 = vector.shape_cast %651 : vector<8x32xf32> to vector<8x1x32xf32>
    %845 = vector.shape_cast %620 : vector<8x32xf32> to vector<8x1x32xf32>
    %846 = tpu.concatenate %838, %839, %840, %841, %842, %843, %844, %845 in 1 : vector<8x1x32xf32>, vector<8x1x32xf32>, vector<8x1x32xf32>, vector<8x1x32xf32>, vector<8x1x32xf32>, vector<8x1x32xf32>, vector<8x1x32xf32>, vector<8x1x32xf32> -> vector<8x8x32xf32>
    %847 = vector.shape_cast %570 : vector<1x32xf32> to vector<1x1x32xf32>
    %848 = vector.broadcast %847 : vector<1x1x32xf32> to vector<8x8x32xf32>
    %849 = arith.mulf %846, %848 : vector<8x8x32xf32>
    %cst_146 = arith.constant dense<0.000000e+00> : vector<8x8xf32>
    %850 = vector.multi_reduction <add>, %849, %cst_146 [2] : vector<8x8x32xf32> to vector<8x8xf32>
    %851 = vector.broadcast %572 : vector<1x1xf32> to vector<8x8xf32>
    %852 = arith.addf %850, %851 : vector<8x8xf32>
    %c1_i32 = arith.constant 1 : i32
    %853 = vector.broadcast %c1_i32 : i32 to vector<8x1xi32>
    %854 = arith.cmpi eq, %1, %853 : vector<8x1xi32>
    %855 = vector.shape_cast %854 : vector<8x1xi1> to vector<8x1xi1>
    %856 = vector.broadcast %855 : vector<8x1xi1> to vector<8x8xi1>
    %857 = arith.select %856, %852, %560 : vector<8x8xi1>, vector<8x8xf32>
    %c2 = arith.constant 2 : index
    %c0_147 = arith.constant 0 : index
    %c0_148 = arith.constant 0 : index
    %858 = vector.load %arg7[%c2, %c0_147, %c0_148] : memref<3x1x96xf32, #tpu.memory_space<vmem>>, vector<1x1x96xf32>
    %859 = vector.shape_cast %858 : vector<1x1x96xf32> to vector<1x96xf32>
    %c2_149 = arith.constant 2 : index
    %c0_150 = arith.constant 0 : index
    %c0_151 = arith.constant 0 : index
    %860 = vector.load %arg8[%c2_149, %c0_150, %c0_151] : memref<3x1x96xf32, #tpu.memory_space<vmem>>, vector<1x1x96xf32>
    %861 = vector.shape_cast %860 : vector<1x1x96xf32> to vector<1x96xf32>
    %c2_152 = arith.constant 2 : index
    %c0_153 = arith.constant 0 : index
    %c0_154 = arith.constant 0 : index
    %862 = vector.load %arg9[%c2_152, %c0_153, %c0_154] : memref<3x32x96xf32, #tpu.memory_space<vmem>>, vector<1x32x96xf32>
    %863 = vector.shape_cast %862 : vector<1x32x96xf32> to vector<32x96xf32>
    %c2_155 = arith.constant 2 : index
    %c0_156 = arith.constant 0 : index
    %c0_157 = arith.constant 0 : index
    %864 = vector.load %arg10[%c2_155, %c0_156, %c0_157] : memref<3x1x96xf32, #tpu.memory_space<vmem>>, vector<1x1x96xf32>
    %865 = vector.shape_cast %864 : vector<1x1x96xf32> to vector<1x96xf32>
    %c2_158 = arith.constant 2 : index
    %c0_159 = arith.constant 0 : index
    %c0_160 = arith.constant 0 : index
    %866 = vector.load %arg11[%c2_158, %c0_159, %c0_160] : memref<3x1x32xf32, #tpu.memory_space<vmem>>, vector<1x1x32xf32>
    %867 = vector.shape_cast %866 : vector<1x1x32xf32> to vector<1x32xf32>
    %c2_161 = arith.constant 2 : index
    %c0_162 = arith.constant 0 : index
    %c0_163 = arith.constant 0 : index
    %868 = vector.load %arg12[%c2_161, %c0_162, %c0_163] : memref<3x1x1xf32, #tpu.memory_space<vmem>>, vector<1x1x1xf32>
    %869 = vector.shape_cast %868 : vector<1x1x1xf32> to vector<1x1xf32>
    %870 = vector.broadcast %867 : vector<1x32xf32> to vector<8x32xf32>
    %871 = arith.mulf %262, %870 : vector<8x32xf32>
    %cst_164 = arith.constant dense<0.000000e+00> : vector<8xf32>
    %872 = vector.multi_reduction <add>, %871, %cst_164 [1] : vector<8x32xf32> to vector<8xf32>
    %873 = vector.shape_cast %872 : vector<8xf32> to vector<8x1xf32>
    %874 = vector.broadcast %869 : vector<1x1xf32> to vector<8x1xf32>
    %875 = arith.addf %873, %874 : vector<8x1xf32>
    %876 = vector.broadcast %875 : vector<8x1xf32> to vector<8x96xf32>
    %877 = vector.broadcast %859 : vector<1x96xf32> to vector<8x96xf32>
    %878 = arith.mulf %876, %877 : vector<8x96xf32>
    %879 = vector.broadcast %861 : vector<1x96xf32> to vector<8x96xf32>
    %880 = arith.addf %878, %879 : vector<8x96xf32>
    %881 = vector.shape_cast %0 : vector<8x8xf32> to vector<8x8x1xf32>
    %882 = vector.shape_cast %859 : vector<1x96xf32> to vector<1x1x96xf32>
    %883 = vector.broadcast %881 : vector<8x8x1xf32> to vector<8x8x96xf32>
    %884 = vector.broadcast %882 : vector<1x1x96xf32> to vector<8x8x96xf32>
    %885 = arith.mulf %883, %884 : vector<8x8x96xf32>
    %886 = vector.shape_cast %861 : vector<1x96xf32> to vector<1x1x96xf32>
    %887 = vector.broadcast %886 : vector<1x1x96xf32> to vector<8x8x96xf32>
    %888 = arith.addf %885, %887 : vector<8x8x96xf32>
    %cst_165 = arith.constant dense<0.000000e+00> : vector<8x96xf32>
    %889 = tpu.matmul %262, %863, %cst_165 {dimension_numbers = #tpu.dot_dimension_numbers<[1], [0], [0], [1], [0, 0, 1, 1], [], []>} : vector<8x32xf32>, vector<32x96xf32>, vector<8x96xf32> -> vector<8x96xf32>
    %890 = vector.broadcast %865 : vector<1x96xf32> to vector<8x96xf32>
    %891 = arith.addf %889, %890 : vector<8x96xf32>
    %892 = vector.extract_strided_slice %880 {offsets = [0, 0], sizes = [8, 32], strides = [1, 1]} : vector<8x96xf32> to vector<8x32xf32>
    %893 = vector.extract_strided_slice %891 {offsets = [0, 0], sizes = [8, 32], strides = [1, 1]} : vector<8x96xf32> to vector<8x32xf32>
    %894 = arith.addf %892, %893 : vector<8x32xf32>
    %895 = arith.negf %894 : vector<8x32xf32>
    %896 = math.exp %895 : vector<8x32xf32>
    %cst_166 = arith.constant 1.000000e+00 : f32
    %897 = vector.broadcast %cst_166 : f32 to vector<8x32xf32>
    %898 = arith.addf %897, %896 : vector<8x32xf32>
    %899 = arith.divf %897, %898 : vector<8x32xf32>
    %900 = vector.extract_strided_slice %880 {offsets = [0, 32], sizes = [8, 32], strides = [1, 1]} : vector<8x96xf32> to vector<8x32xf32>
    %901 = vector.extract_strided_slice %891 {offsets = [0, 32], sizes = [8, 32], strides = [1, 1]} : vector<8x96xf32> to vector<8x32xf32>
    %902 = arith.addf %900, %901 : vector<8x32xf32>
    %903 = arith.negf %902 : vector<8x32xf32>
    %904 = math.exp %903 : vector<8x32xf32>
    %cst_167 = arith.constant 1.000000e+00 : f32
    %905 = vector.broadcast %cst_167 : f32 to vector<8x32xf32>
    %906 = arith.addf %905, %904 : vector<8x32xf32>
    %907 = arith.divf %905, %906 : vector<8x32xf32>
    %908 = vector.extract_strided_slice %880 {offsets = [0, 64], sizes = [8, 32], strides = [1, 1]} : vector<8x96xf32> to vector<8x32xf32>
    %909 = vector.extract_strided_slice %891 {offsets = [0, 64], sizes = [8, 32], strides = [1, 1]} : vector<8x96xf32> to vector<8x32xf32>
    %910 = arith.mulf %899, %909 : vector<8x32xf32>
    %911 = arith.addf %908, %910 : vector<8x32xf32>
    %912 = math.tanh %911 : vector<8x32xf32>
    %cst_168 = arith.constant 1.000000e+00 : f32
    %913 = vector.broadcast %cst_168 : f32 to vector<8x32xf32>
    %914 = arith.subf %913, %907 : vector<8x32xf32>
    %915 = arith.mulf %914, %912 : vector<8x32xf32>
    %916 = arith.mulf %907, %262 : vector<8x32xf32>
    %917 = arith.addf %915, %916 : vector<8x32xf32>
    %918 = vector.extract_strided_slice %888 {offsets = [7, 0, 0], sizes = [1, 8, 96], strides = [1, 1, 1]} : vector<8x8x96xf32> to vector<1x8x96xf32>
    %919 = vector.shape_cast %918 : vector<1x8x96xf32> to vector<8x96xf32>
    %cst_169 = arith.constant dense<0.000000e+00> : vector<8x96xf32>
    %920 = tpu.matmul %917, %863, %cst_169 {dimension_numbers = #tpu.dot_dimension_numbers<[1], [0], [0], [1], [0, 0, 1, 1], [], []>} : vector<8x32xf32>, vector<32x96xf32>, vector<8x96xf32> -> vector<8x96xf32>
    %921 = vector.broadcast %865 : vector<1x96xf32> to vector<8x96xf32>
    %922 = arith.addf %920, %921 : vector<8x96xf32>
    %923 = vector.extract_strided_slice %919 {offsets = [0, 0], sizes = [8, 32], strides = [1, 1]} : vector<8x96xf32> to vector<8x32xf32>
    %924 = vector.extract_strided_slice %922 {offsets = [0, 0], sizes = [8, 32], strides = [1, 1]} : vector<8x96xf32> to vector<8x32xf32>
    %925 = arith.addf %923, %924 : vector<8x32xf32>
    %926 = arith.negf %925 : vector<8x32xf32>
    %927 = math.exp %926 : vector<8x32xf32>
    %cst_170 = arith.constant 1.000000e+00 : f32
    %928 = vector.broadcast %cst_170 : f32 to vector<8x32xf32>
    %929 = arith.addf %928, %927 : vector<8x32xf32>
    %930 = arith.divf %928, %929 : vector<8x32xf32>
    %931 = vector.extract_strided_slice %919 {offsets = [0, 32], sizes = [8, 32], strides = [1, 1]} : vector<8x96xf32> to vector<8x32xf32>
    %932 = vector.extract_strided_slice %922 {offsets = [0, 32], sizes = [8, 32], strides = [1, 1]} : vector<8x96xf32> to vector<8x32xf32>
    %933 = arith.addf %931, %932 : vector<8x32xf32>
    %934 = arith.negf %933 : vector<8x32xf32>
    %935 = math.exp %934 : vector<8x32xf32>
    %cst_171 = arith.constant 1.000000e+00 : f32
    %936 = vector.broadcast %cst_171 : f32 to vector<8x32xf32>
    %937 = arith.addf %936, %935 : vector<8x32xf32>
    %938 = arith.divf %936, %937 : vector<8x32xf32>
    %939 = vector.extract_strided_slice %919 {offsets = [0, 64], sizes = [8, 32], strides = [1, 1]} : vector<8x96xf32> to vector<8x32xf32>
    %940 = vector.extract_strided_slice %922 {offsets = [0, 64], sizes = [8, 32], strides = [1, 1]} : vector<8x96xf32> to vector<8x32xf32>
    %941 = arith.mulf %930, %940 : vector<8x32xf32>
    %942 = arith.addf %939, %941 : vector<8x32xf32>
    %943 = math.tanh %942 : vector<8x32xf32>
    %cst_172 = arith.constant 1.000000e+00 : f32
    %944 = vector.broadcast %cst_172 : f32 to vector<8x32xf32>
    %945 = arith.subf %944, %938 : vector<8x32xf32>
    %946 = arith.mulf %945, %943 : vector<8x32xf32>
    %947 = arith.mulf %938, %917 : vector<8x32xf32>
    %948 = arith.addf %946, %947 : vector<8x32xf32>
    %949 = vector.extract_strided_slice %888 {offsets = [6, 0, 0], sizes = [1, 8, 96], strides = [1, 1, 1]} : vector<8x8x96xf32> to vector<1x8x96xf32>
    %950 = vector.shape_cast %949 : vector<1x8x96xf32> to vector<8x96xf32>
    %cst_173 = arith.constant dense<0.000000e+00> : vector<8x96xf32>
    %951 = tpu.matmul %948, %863, %cst_173 {dimension_numbers = #tpu.dot_dimension_numbers<[1], [0], [0], [1], [0, 0, 1, 1], [], []>} : vector<8x32xf32>, vector<32x96xf32>, vector<8x96xf32> -> vector<8x96xf32>
    %952 = vector.broadcast %865 : vector<1x96xf32> to vector<8x96xf32>
    %953 = arith.addf %951, %952 : vector<8x96xf32>
    %954 = vector.extract_strided_slice %950 {offsets = [0, 0], sizes = [8, 32], strides = [1, 1]} : vector<8x96xf32> to vector<8x32xf32>
    %955 = vector.extract_strided_slice %953 {offsets = [0, 0], sizes = [8, 32], strides = [1, 1]} : vector<8x96xf32> to vector<8x32xf32>
    %956 = arith.addf %954, %955 : vector<8x32xf32>
    %957 = arith.negf %956 : vector<8x32xf32>
    %958 = math.exp %957 : vector<8x32xf32>
    %cst_174 = arith.constant 1.000000e+00 : f32
    %959 = vector.broadcast %cst_174 : f32 to vector<8x32xf32>
    %960 = arith.addf %959, %958 : vector<8x32xf32>
    %961 = arith.divf %959, %960 : vector<8x32xf32>
    %962 = vector.extract_strided_slice %950 {offsets = [0, 32], sizes = [8, 32], strides = [1, 1]} : vector<8x96xf32> to vector<8x32xf32>
    %963 = vector.extract_strided_slice %953 {offsets = [0, 32], sizes = [8, 32], strides = [1, 1]} : vector<8x96xf32> to vector<8x32xf32>
    %964 = arith.addf %962, %963 : vector<8x32xf32>
    %965 = arith.negf %964 : vector<8x32xf32>
    %966 = math.exp %965 : vector<8x32xf32>
    %cst_175 = arith.constant 1.000000e+00 : f32
    %967 = vector.broadcast %cst_175 : f32 to vector<8x32xf32>
    %968 = arith.addf %967, %966 : vector<8x32xf32>
    %969 = arith.divf %967, %968 : vector<8x32xf32>
    %970 = vector.extract_strided_slice %950 {offsets = [0, 64], sizes = [8, 32], strides = [1, 1]} : vector<8x96xf32> to vector<8x32xf32>
    %971 = vector.extract_strided_slice %953 {offsets = [0, 64], sizes = [8, 32], strides = [1, 1]} : vector<8x96xf32> to vector<8x32xf32>
    %972 = arith.mulf %961, %971 : vector<8x32xf32>
    %973 = arith.addf %970, %972 : vector<8x32xf32>
    %974 = math.tanh %973 : vector<8x32xf32>
    %cst_176 = arith.constant 1.000000e+00 : f32
    %975 = vector.broadcast %cst_176 : f32 to vector<8x32xf32>
    %976 = arith.subf %975, %969 : vector<8x32xf32>
    %977 = arith.mulf %976, %974 : vector<8x32xf32>
    %978 = arith.mulf %969, %948 : vector<8x32xf32>
    %979 = arith.addf %977, %978 : vector<8x32xf32>
    %980 = vector.extract_strided_slice %888 {offsets = [5, 0, 0], sizes = [1, 8, 96], strides = [1, 1, 1]} : vector<8x8x96xf32> to vector<1x8x96xf32>
    %981 = vector.shape_cast %980 : vector<1x8x96xf32> to vector<8x96xf32>
    %cst_177 = arith.constant dense<0.000000e+00> : vector<8x96xf32>
    %982 = tpu.matmul %979, %863, %cst_177 {dimension_numbers = #tpu.dot_dimension_numbers<[1], [0], [0], [1], [0, 0, 1, 1], [], []>} : vector<8x32xf32>, vector<32x96xf32>, vector<8x96xf32> -> vector<8x96xf32>
    %983 = vector.broadcast %865 : vector<1x96xf32> to vector<8x96xf32>
    %984 = arith.addf %982, %983 : vector<8x96xf32>
    %985 = vector.extract_strided_slice %981 {offsets = [0, 0], sizes = [8, 32], strides = [1, 1]} : vector<8x96xf32> to vector<8x32xf32>
    %986 = vector.extract_strided_slice %984 {offsets = [0, 0], sizes = [8, 32], strides = [1, 1]} : vector<8x96xf32> to vector<8x32xf32>
    %987 = arith.addf %985, %986 : vector<8x32xf32>
    %988 = arith.negf %987 : vector<8x32xf32>
    %989 = math.exp %988 : vector<8x32xf32>
    %cst_178 = arith.constant 1.000000e+00 : f32
    %990 = vector.broadcast %cst_178 : f32 to vector<8x32xf32>
    %991 = arith.addf %990, %989 : vector<8x32xf32>
    %992 = arith.divf %990, %991 : vector<8x32xf32>
    %993 = vector.extract_strided_slice %981 {offsets = [0, 32], sizes = [8, 32], strides = [1, 1]} : vector<8x96xf32> to vector<8x32xf32>
    %994 = vector.extract_strided_slice %984 {offsets = [0, 32], sizes = [8, 32], strides = [1, 1]} : vector<8x96xf32> to vector<8x32xf32>
    %995 = arith.addf %993, %994 : vector<8x32xf32>
    %996 = arith.negf %995 : vector<8x32xf32>
    %997 = math.exp %996 : vector<8x32xf32>
    %cst_179 = arith.constant 1.000000e+00 : f32
    %998 = vector.broadcast %cst_179 : f32 to vector<8x32xf32>
    %999 = arith.addf %998, %997 : vector<8x32xf32>
    %1000 = arith.divf %998, %999 : vector<8x32xf32>
    %1001 = vector.extract_strided_slice %981 {offsets = [0, 64], sizes = [8, 32], strides = [1, 1]} : vector<8x96xf32> to vector<8x32xf32>
    %1002 = vector.extract_strided_slice %984 {offsets = [0, 64], sizes = [8, 32], strides = [1, 1]} : vector<8x96xf32> to vector<8x32xf32>
    %1003 = arith.mulf %992, %1002 : vector<8x32xf32>
    %1004 = arith.addf %1001, %1003 : vector<8x32xf32>
    %1005 = math.tanh %1004 : vector<8x32xf32>
    %cst_180 = arith.constant 1.000000e+00 : f32
    %1006 = vector.broadcast %cst_180 : f32 to vector<8x32xf32>
    %1007 = arith.subf %1006, %1000 : vector<8x32xf32>
    %1008 = arith.mulf %1007, %1005 : vector<8x32xf32>
    %1009 = arith.mulf %1000, %979 : vector<8x32xf32>
    %1010 = arith.addf %1008, %1009 : vector<8x32xf32>
    %1011 = vector.extract_strided_slice %888 {offsets = [4, 0, 0], sizes = [1, 8, 96], strides = [1, 1, 1]} : vector<8x8x96xf32> to vector<1x8x96xf32>
    %1012 = vector.shape_cast %1011 : vector<1x8x96xf32> to vector<8x96xf32>
    %cst_181 = arith.constant dense<0.000000e+00> : vector<8x96xf32>
    %1013 = tpu.matmul %1010, %863, %cst_181 {dimension_numbers = #tpu.dot_dimension_numbers<[1], [0], [0], [1], [0, 0, 1, 1], [], []>} : vector<8x32xf32>, vector<32x96xf32>, vector<8x96xf32> -> vector<8x96xf32>
    %1014 = vector.broadcast %865 : vector<1x96xf32> to vector<8x96xf32>
    %1015 = arith.addf %1013, %1014 : vector<8x96xf32>
    %1016 = vector.extract_strided_slice %1012 {offsets = [0, 0], sizes = [8, 32], strides = [1, 1]} : vector<8x96xf32> to vector<8x32xf32>
    %1017 = vector.extract_strided_slice %1015 {offsets = [0, 0], sizes = [8, 32], strides = [1, 1]} : vector<8x96xf32> to vector<8x32xf32>
    %1018 = arith.addf %1016, %1017 : vector<8x32xf32>
    %1019 = arith.negf %1018 : vector<8x32xf32>
    %1020 = math.exp %1019 : vector<8x32xf32>
    %cst_182 = arith.constant 1.000000e+00 : f32
    %1021 = vector.broadcast %cst_182 : f32 to vector<8x32xf32>
    %1022 = arith.addf %1021, %1020 : vector<8x32xf32>
    %1023 = arith.divf %1021, %1022 : vector<8x32xf32>
    %1024 = vector.extract_strided_slice %1012 {offsets = [0, 32], sizes = [8, 32], strides = [1, 1]} : vector<8x96xf32> to vector<8x32xf32>
    %1025 = vector.extract_strided_slice %1015 {offsets = [0, 32], sizes = [8, 32], strides = [1, 1]} : vector<8x96xf32> to vector<8x32xf32>
    %1026 = arith.addf %1024, %1025 : vector<8x32xf32>
    %1027 = arith.negf %1026 : vector<8x32xf32>
    %1028 = math.exp %1027 : vector<8x32xf32>
    %cst_183 = arith.constant 1.000000e+00 : f32
    %1029 = vector.broadcast %cst_183 : f32 to vector<8x32xf32>
    %1030 = arith.addf %1029, %1028 : vector<8x32xf32>
    %1031 = arith.divf %1029, %1030 : vector<8x32xf32>
    %1032 = vector.extract_strided_slice %1012 {offsets = [0, 64], sizes = [8, 32], strides = [1, 1]} : vector<8x96xf32> to vector<8x32xf32>
    %1033 = vector.extract_strided_slice %1015 {offsets = [0, 64], sizes = [8, 32], strides = [1, 1]} : vector<8x96xf32> to vector<8x32xf32>
    %1034 = arith.mulf %1023, %1033 : vector<8x32xf32>
    %1035 = arith.addf %1032, %1034 : vector<8x32xf32>
    %1036 = math.tanh %1035 : vector<8x32xf32>
    %cst_184 = arith.constant 1.000000e+00 : f32
    %1037 = vector.broadcast %cst_184 : f32 to vector<8x32xf32>
    %1038 = arith.subf %1037, %1031 : vector<8x32xf32>
    %1039 = arith.mulf %1038, %1036 : vector<8x32xf32>
    %1040 = arith.mulf %1031, %1010 : vector<8x32xf32>
    %1041 = arith.addf %1039, %1040 : vector<8x32xf32>
    %1042 = vector.extract_strided_slice %888 {offsets = [3, 0, 0], sizes = [1, 8, 96], strides = [1, 1, 1]} : vector<8x8x96xf32> to vector<1x8x96xf32>
    %1043 = vector.shape_cast %1042 : vector<1x8x96xf32> to vector<8x96xf32>
    %cst_185 = arith.constant dense<0.000000e+00> : vector<8x96xf32>
    %1044 = tpu.matmul %1041, %863, %cst_185 {dimension_numbers = #tpu.dot_dimension_numbers<[1], [0], [0], [1], [0, 0, 1, 1], [], []>} : vector<8x32xf32>, vector<32x96xf32>, vector<8x96xf32> -> vector<8x96xf32>
    %1045 = vector.broadcast %865 : vector<1x96xf32> to vector<8x96xf32>
    %1046 = arith.addf %1044, %1045 : vector<8x96xf32>
    %1047 = vector.extract_strided_slice %1043 {offsets = [0, 0], sizes = [8, 32], strides = [1, 1]} : vector<8x96xf32> to vector<8x32xf32>
    %1048 = vector.extract_strided_slice %1046 {offsets = [0, 0], sizes = [8, 32], strides = [1, 1]} : vector<8x96xf32> to vector<8x32xf32>
    %1049 = arith.addf %1047, %1048 : vector<8x32xf32>
    %1050 = arith.negf %1049 : vector<8x32xf32>
    %1051 = math.exp %1050 : vector<8x32xf32>
    %cst_186 = arith.constant 1.000000e+00 : f32
    %1052 = vector.broadcast %cst_186 : f32 to vector<8x32xf32>
    %1053 = arith.addf %1052, %1051 : vector<8x32xf32>
    %1054 = arith.divf %1052, %1053 : vector<8x32xf32>
    %1055 = vector.extract_strided_slice %1043 {offsets = [0, 32], sizes = [8, 32], strides = [1, 1]} : vector<8x96xf32> to vector<8x32xf32>
    %1056 = vector.extract_strided_slice %1046 {offsets = [0, 32], sizes = [8, 32], strides = [1, 1]} : vector<8x96xf32> to vector<8x32xf32>
    %1057 = arith.addf %1055, %1056 : vector<8x32xf32>
    %1058 = arith.negf %1057 : vector<8x32xf32>
    %1059 = math.exp %1058 : vector<8x32xf32>
    %cst_187 = arith.constant 1.000000e+00 : f32
    %1060 = vector.broadcast %cst_187 : f32 to vector<8x32xf32>
    %1061 = arith.addf %1060, %1059 : vector<8x32xf32>
    %1062 = arith.divf %1060, %1061 : vector<8x32xf32>
    %1063 = vector.extract_strided_slice %1043 {offsets = [0, 64], sizes = [8, 32], strides = [1, 1]} : vector<8x96xf32> to vector<8x32xf32>
    %1064 = vector.extract_strided_slice %1046 {offsets = [0, 64], sizes = [8, 32], strides = [1, 1]} : vector<8x96xf32> to vector<8x32xf32>
    %1065 = arith.mulf %1054, %1064 : vector<8x32xf32>
    %1066 = arith.addf %1063, %1065 : vector<8x32xf32>
    %1067 = math.tanh %1066 : vector<8x32xf32>
    %cst_188 = arith.constant 1.000000e+00 : f32
    %1068 = vector.broadcast %cst_188 : f32 to vector<8x32xf32>
    %1069 = arith.subf %1068, %1062 : vector<8x32xf32>
    %1070 = arith.mulf %1069, %1067 : vector<8x32xf32>
    %1071 = arith.mulf %1062, %1041 : vector<8x32xf32>
    %1072 = arith.addf %1070, %1071 : vector<8x32xf32>
    %1073 = vector.extract_strided_slice %888 {offsets = [2, 0, 0], sizes = [1, 8, 96], strides = [1, 1, 1]} : vector<8x8x96xf32> to vector<1x8x96xf32>
    %1074 = vector.shape_cast %1073 : vector<1x8x96xf32> to vector<8x96xf32>
    %cst_189 = arith.constant dense<0.000000e+00> : vector<8x96xf32>
    %1075 = tpu.matmul %1072, %863, %cst_189 {dimension_numbers = #tpu.dot_dimension_numbers<[1], [0], [0], [1], [0, 0, 1, 1], [], []>} : vector<8x32xf32>, vector<32x96xf32>, vector<8x96xf32> -> vector<8x96xf32>
    %1076 = vector.broadcast %865 : vector<1x96xf32> to vector<8x96xf32>
    %1077 = arith.addf %1075, %1076 : vector<8x96xf32>
    %1078 = vector.extract_strided_slice %1074 {offsets = [0, 0], sizes = [8, 32], strides = [1, 1]} : vector<8x96xf32> to vector<8x32xf32>
    %1079 = vector.extract_strided_slice %1077 {offsets = [0, 0], sizes = [8, 32], strides = [1, 1]} : vector<8x96xf32> to vector<8x32xf32>
    %1080 = arith.addf %1078, %1079 : vector<8x32xf32>
    %1081 = arith.negf %1080 : vector<8x32xf32>
    %1082 = math.exp %1081 : vector<8x32xf32>
    %cst_190 = arith.constant 1.000000e+00 : f32
    %1083 = vector.broadcast %cst_190 : f32 to vector<8x32xf32>
    %1084 = arith.addf %1083, %1082 : vector<8x32xf32>
    %1085 = arith.divf %1083, %1084 : vector<8x32xf32>
    %1086 = vector.extract_strided_slice %1074 {offsets = [0, 32], sizes = [8, 32], strides = [1, 1]} : vector<8x96xf32> to vector<8x32xf32>
    %1087 = vector.extract_strided_slice %1077 {offsets = [0, 32], sizes = [8, 32], strides = [1, 1]} : vector<8x96xf32> to vector<8x32xf32>
    %1088 = arith.addf %1086, %1087 : vector<8x32xf32>
    %1089 = arith.negf %1088 : vector<8x32xf32>
    %1090 = math.exp %1089 : vector<8x32xf32>
    %cst_191 = arith.constant 1.000000e+00 : f32
    %1091 = vector.broadcast %cst_191 : f32 to vector<8x32xf32>
    %1092 = arith.addf %1091, %1090 : vector<8x32xf32>
    %1093 = arith.divf %1091, %1092 : vector<8x32xf32>
    %1094 = vector.extract_strided_slice %1074 {offsets = [0, 64], sizes = [8, 32], strides = [1, 1]} : vector<8x96xf32> to vector<8x32xf32>
    %1095 = vector.extract_strided_slice %1077 {offsets = [0, 64], sizes = [8, 32], strides = [1, 1]} : vector<8x96xf32> to vector<8x32xf32>
    %1096 = arith.mulf %1085, %1095 : vector<8x32xf32>
    %1097 = arith.addf %1094, %1096 : vector<8x32xf32>
    %1098 = math.tanh %1097 : vector<8x32xf32>
    %cst_192 = arith.constant 1.000000e+00 : f32
    %1099 = vector.broadcast %cst_192 : f32 to vector<8x32xf32>
    %1100 = arith.subf %1099, %1093 : vector<8x32xf32>
    %1101 = arith.mulf %1100, %1098 : vector<8x32xf32>
    %1102 = arith.mulf %1093, %1072 : vector<8x32xf32>
    %1103 = arith.addf %1101, %1102 : vector<8x32xf32>
    %1104 = vector.extract_strided_slice %888 {offsets = [1, 0, 0], sizes = [1, 8, 96], strides = [1, 1, 1]} : vector<8x8x96xf32> to vector<1x8x96xf32>
    %1105 = vector.shape_cast %1104 : vector<1x8x96xf32> to vector<8x96xf32>
    %cst_193 = arith.constant dense<0.000000e+00> : vector<8x96xf32>
    %1106 = tpu.matmul %1103, %863, %cst_193 {dimension_numbers = #tpu.dot_dimension_numbers<[1], [0], [0], [1], [0, 0, 1, 1], [], []>} : vector<8x32xf32>, vector<32x96xf32>, vector<8x96xf32> -> vector<8x96xf32>
    %1107 = vector.broadcast %865 : vector<1x96xf32> to vector<8x96xf32>
    %1108 = arith.addf %1106, %1107 : vector<8x96xf32>
    %1109 = vector.extract_strided_slice %1105 {offsets = [0, 0], sizes = [8, 32], strides = [1, 1]} : vector<8x96xf32> to vector<8x32xf32>
    %1110 = vector.extract_strided_slice %1108 {offsets = [0, 0], sizes = [8, 32], strides = [1, 1]} : vector<8x96xf32> to vector<8x32xf32>
    %1111 = arith.addf %1109, %1110 : vector<8x32xf32>
    %1112 = arith.negf %1111 : vector<8x32xf32>
    %1113 = math.exp %1112 : vector<8x32xf32>
    %cst_194 = arith.constant 1.000000e+00 : f32
    %1114 = vector.broadcast %cst_194 : f32 to vector<8x32xf32>
    %1115 = arith.addf %1114, %1113 : vector<8x32xf32>
    %1116 = arith.divf %1114, %1115 : vector<8x32xf32>
    %1117 = vector.extract_strided_slice %1105 {offsets = [0, 32], sizes = [8, 32], strides = [1, 1]} : vector<8x96xf32> to vector<8x32xf32>
    %1118 = vector.extract_strided_slice %1108 {offsets = [0, 32], sizes = [8, 32], strides = [1, 1]} : vector<8x96xf32> to vector<8x32xf32>
    %1119 = arith.addf %1117, %1118 : vector<8x32xf32>
    %1120 = arith.negf %1119 : vector<8x32xf32>
    %1121 = math.exp %1120 : vector<8x32xf32>
    %cst_195 = arith.constant 1.000000e+00 : f32
    %1122 = vector.broadcast %cst_195 : f32 to vector<8x32xf32>
    %1123 = arith.addf %1122, %1121 : vector<8x32xf32>
    %1124 = arith.divf %1122, %1123 : vector<8x32xf32>
    %1125 = vector.extract_strided_slice %1105 {offsets = [0, 64], sizes = [8, 32], strides = [1, 1]} : vector<8x96xf32> to vector<8x32xf32>
    %1126 = vector.extract_strided_slice %1108 {offsets = [0, 64], sizes = [8, 32], strides = [1, 1]} : vector<8x96xf32> to vector<8x32xf32>
    %1127 = arith.mulf %1116, %1126 : vector<8x32xf32>
    %1128 = arith.addf %1125, %1127 : vector<8x32xf32>
    %1129 = math.tanh %1128 : vector<8x32xf32>
    %cst_196 = arith.constant 1.000000e+00 : f32
    %1130 = vector.broadcast %cst_196 : f32 to vector<8x32xf32>
    %1131 = arith.subf %1130, %1124 : vector<8x32xf32>
    %1132 = arith.mulf %1131, %1129 : vector<8x32xf32>
    %1133 = arith.mulf %1124, %1103 : vector<8x32xf32>
    %1134 = arith.addf %1132, %1133 : vector<8x32xf32>
    %1135 = vector.shape_cast %1134 : vector<8x32xf32> to vector<8x1x32xf32>
    %1136 = vector.shape_cast %1103 : vector<8x32xf32> to vector<8x1x32xf32>
    %1137 = vector.shape_cast %1072 : vector<8x32xf32> to vector<8x1x32xf32>
    %1138 = vector.shape_cast %1041 : vector<8x32xf32> to vector<8x1x32xf32>
    %1139 = vector.shape_cast %1010 : vector<8x32xf32> to vector<8x1x32xf32>
    %1140 = vector.shape_cast %979 : vector<8x32xf32> to vector<8x1x32xf32>
    %1141 = vector.shape_cast %948 : vector<8x32xf32> to vector<8x1x32xf32>
    %1142 = vector.shape_cast %917 : vector<8x32xf32> to vector<8x1x32xf32>
    %1143 = tpu.concatenate %1135, %1136, %1137, %1138, %1139, %1140, %1141, %1142 in 1 : vector<8x1x32xf32>, vector<8x1x32xf32>, vector<8x1x32xf32>, vector<8x1x32xf32>, vector<8x1x32xf32>, vector<8x1x32xf32>, vector<8x1x32xf32>, vector<8x1x32xf32> -> vector<8x8x32xf32>
    %1144 = vector.shape_cast %867 : vector<1x32xf32> to vector<1x1x32xf32>
    %1145 = vector.broadcast %1144 : vector<1x1x32xf32> to vector<8x8x32xf32>
    %1146 = arith.mulf %1143, %1145 : vector<8x8x32xf32>
    %cst_197 = arith.constant dense<0.000000e+00> : vector<8x8xf32>
    %1147 = vector.multi_reduction <add>, %1146, %cst_197 [2] : vector<8x8x32xf32> to vector<8x8xf32>
    %1148 = vector.broadcast %869 : vector<1x1xf32> to vector<8x8xf32>
    %1149 = arith.addf %1147, %1148 : vector<8x8xf32>
    %c2_i32 = arith.constant 2 : i32
    %1150 = vector.broadcast %c2_i32 : i32 to vector<8x1xi32>
    %1151 = arith.cmpi eq, %1, %1150 : vector<8x1xi32>
    %1152 = vector.shape_cast %1151 : vector<8x1xi1> to vector<8x1xi1>
    %1153 = vector.broadcast %1152 : vector<8x1xi1> to vector<8x8xi1>
    %1154 = arith.select %1153, %1149, %857 : vector<8x8xi1>, vector<8x8xf32>
    %c0_198 = arith.constant 0 : index
    %c0_199 = arith.constant 0 : index
    %1155 = vector.load %arg13[%c0_198, %c0_199] : memref<8x8xf32, #tpu.memory_space<vmem>>, vector<8x8xf32>
    tpu.vector_store %arg13[%c0_198, %c0_199], %1154 {strides = array<i32>} : memref<8x8xf32, #tpu.memory_space<vmem>>, vector<8x8xf32>,
    return
  }
  func.func @transform_0(%arg0: i32) -> (i32, i32) {
    %c0_i32 = arith.constant 0 : i32
    %c0_i32_0 = arith.constant 0 : i32
    %c0_i32_1 = arith.constant 0 : i32
    return %c0_i32, %c0_i32_0 : i32, i32
  }
  func.func @transform_1(%arg0: i32) -> (i32, i32) {
    %c0_i32 = arith.constant 0 : i32
    %c0_i32_0 = arith.constant 0 : i32
    %c0_i32_1 = arith.constant 0 : i32
    return %c0_i32, %c0_i32_0 : i32, i32
  }
  func.func @transform_2(%arg0: i32) -> (i32, i32) {
    %c0_i32 = arith.constant 0 : i32
    %c0_i32_0 = arith.constant 0 : i32
    %c0_i32_1 = arith.constant 0 : i32
    return %c0_i32, %c0_i32_0 : i32, i32
  }
  func.func @transform_3(%arg0: i32) -> (i32, i32) {
    %c0_i32 = arith.constant 0 : i32
    %c0_i32_0 = arith.constant 0 : i32
    %c0_i32_1 = arith.constant 0 : i32
    return %c0_i32, %c0_i32_0 : i32, i32
  }
  func.func @transform_4(%arg0: i32) -> (i32, i32) {
    %c0_i32 = arith.constant 0 : i32
    %c0_i32_0 = arith.constant 0 : i32
    %c0_i32_1 = arith.constant 0 : i32
    return %c0_i32, %c0_i32_0 : i32, i32
  }
  func.func @transform_5(%arg0: i32) -> (i32, i32) {
    %c0_i32 = arith.constant 0 : i32
    %c0_i32_0 = arith.constant 0 : i32
    %c0_i32_1 = arith.constant 0 : i32
    return %c0_i32, %c0_i32_0 : i32, i32
  }
  func.func @transform_6(%arg0: i32) -> (i32, i32, i32) {
    %c0_i32 = arith.constant 0 : i32
    %c0_i32_0 = arith.constant 0 : i32
    %c0_i32_1 = arith.constant 0 : i32
    %c0_i32_2 = arith.constant 0 : i32
    return %c0_i32, %c0_i32_0, %c0_i32_1 : i32, i32, i32
  }
  func.func @transform_7(%arg0: i32) -> (i32, i32, i32) {
    %c0_i32 = arith.constant 0 : i32
    %c0_i32_0 = arith.constant 0 : i32
    %c0_i32_1 = arith.constant 0 : i32
    %c0_i32_2 = arith.constant 0 : i32
    return %c0_i32, %c0_i32_0, %c0_i32_1 : i32, i32, i32
  }
  func.func @transform_8(%arg0: i32) -> (i32, i32, i32) {
    %c0_i32 = arith.constant 0 : i32
    %c0_i32_0 = arith.constant 0 : i32
    %c0_i32_1 = arith.constant 0 : i32
    %c0_i32_2 = arith.constant 0 : i32
    return %c0_i32, %c0_i32_0, %c0_i32_1 : i32, i32, i32
  }
  func.func @transform_9(%arg0: i32) -> (i32, i32, i32) {
    %c0_i32 = arith.constant 0 : i32
    %c0_i32_0 = arith.constant 0 : i32
    %c0_i32_1 = arith.constant 0 : i32
    %c0_i32_2 = arith.constant 0 : i32
    return %c0_i32, %c0_i32_0, %c0_i32_1 : i32, i32, i32
  }
  func.func @transform_10(%arg0: i32) -> (i32, i32, i32) {
    %c0_i32 = arith.constant 0 : i32
    %c0_i32_0 = arith.constant 0 : i32
    %c0_i32_1 = arith.constant 0 : i32
    %c0_i32_2 = arith.constant 0 : i32
    return %c0_i32, %c0_i32_0, %c0_i32_1 : i32, i32, i32
  }
  func.func @transform_11(%arg0: i32) -> (i32, i32, i32) {
    %c0_i32 = arith.constant 0 : i32
    %c0_i32_0 = arith.constant 0 : i32
    %c0_i32_1 = arith.constant 0 : i32
    %c0_i32_2 = arith.constant 0 : i32
    return %c0_i32, %c0_i32_0, %c0_i32_1 : i32, i32, i32
  }
  func.func @transform_12(%arg0: i32) -> (i32, i32) {
    %c0_i32 = arith.constant 0 : i32
    %c0_i32_0 = arith.constant 0 : i32
    %c0_i32_1 = arith.constant 0 : i32
    return %c0_i32, %c0_i32_0 : i32, i32
  }
}

</mosaic_0001>

<bundles_post_ra>
// kernel: tpu_custom_call.1
= control target key start
LH: loop header
LB: loop body
LE: loop exit
PB: predicated region body
PF: predicated region fallthrough
CT: control target
= control target key end

     0   :  { %17 = vsyncpa [#allocation3], 0  ;;  %s9457_s0 = inlined_call_operand.vmem [shape: f32[8,8], index: 0, kind: input, shape index: {}]   ;;  %s9458_s1 = inlined_call_operand.vmem [shape: s32[8,1], index: 1, kind: input, shape index: {}]   ;;  %s9459_s2 = inlined_call_operand.hbm [shape: f32[1,96], index: 2, kind: input, shape index: {}]   ;;  %s9460_s3 = inlined_call_operand.hbm [shape: f32[1,96], index: 3, kind: input, shape index: {}]   ;;  %s9461_s4 = inlined_call_operand.hbm [shape: f32[32,96], index: 4, kind: input, shape index: {}]   ;;  %s9462_s5 = inlined_call_operand.vmem [shape: f32[1,96], index: 5, kind: input, shape index: {}]   ;;  %s9463_s6 = inlined_call_operand.vmem [shape: f32[3,1,96], index: 6, kind: input, shape index: {}]   ;;  %s9464_s7 = inlined_call_operand.vmem [shape: f32[3,1,96], index: 7, kind: input, shape index: {}]   ;;  %s9465_s8 = inlined_call_operand.hbm [shape: f32[3,32,96], index: 8, kind: input, shape index: {}]   ;;  %s9466_s9 = inlined_call_operand.vmem [shape: f32[3,1,96], index: 9, kind: input, shape index: {}]   ;;  %s9467_s10 = inlined_call_operand.vmem [shape: f32[3,1,32], index: 10, kind: input, shape index: {}]   ;;  %s9468_s11 = inlined_call_operand.vmem [shape: f32[3,1,1], index: 11, kind: input, shape index: {}]   ;;  %s9469_s12 = inlined_call_operand.hbm [shape: f32[8,8], index: 12, kind: output, shape index: {}]  }
   0x1   :  { %18 = vsyncpa [#allocation6], 0 }
   0x2   :  { %19 = vsyncpa [#allocation9], 0 }
   0x3   :  { %20 = vsyncpa [#allocation4], 0  ;;  %s7207_s21 = smov [#allocation5]   ;;  %s7208_s23 = smov [#allocation2]  }
   0x4   :  { %s41_s22 = sshll.u32 %s7207_s21, 4  ;;  %s31_s24 = sshll.u32 %s7208_s23, 4  ;;  %s42_s22 = int_to_ptr.vmem [resolvable:$true] %s41_s22  ;;  %s32_s24 = int_to_ptr.vmem [resolvable:$true] %s31_s24 }
   0x5   :  { %s7107_s25 = scalar_lea.vmem %s42_s22, 16  ;;  %s7111_s26 = scalar_lea.vmem %s42_s22, 32 }
   0x6   :  { %p7108_p0 = scmp.ne.s32.totalorder %s42_s22, %s7107_s25  ;;  %p7112_p1 = scmp.lt.s32.totalorder %s42_s22, %s42_s22 }
   0x7   :  { %p7113_p2 = scmp.lt.s32.totalorder %s7111_s26, %s7107_s25 }
   0x9   :  { %p7114_p3 = por %p7113_p2, %p7112_p1 }
   0xb   :  { %p7115_p4 = pnand %p7114_p3, %p7108_p0 }
   0xd   :  { %7118 = shalt.err (!%p7115_p4)
}
   0xe   :  { %44 = dma.hbm_to_vmem [thread:$0]  %s9460_s3, 16, %s42_s22, [#allocation6]  }
   0xf   :  { %s7127_s29 = scalar_lea.vmem %s32_s24, 16  ;;  %s7131_s30 = scalar_lea.vmem %s32_s24, 32 }
  0x10   :  { %p7128_p5 = scmp.ne.s32.totalorder %s32_s24, %s7127_s29  ;;  %p7132_p6 = scmp.lt.s32.totalorder %s32_s24, %s32_s24 }
  0x11   :  { %p7133_p7 = scmp.lt.s32.totalorder %s7131_s30, %s7127_s29 }
  0x13   :  { %p7134_p8 = por %p7133_p7, %p7132_p6 }
  0x15   :  { %p7135_p9 = pnand %p7134_p8, %p7128_p5 }
  0x17   :  { %7138 = shalt.err (!%p7135_p9)
}
  0x18   :  { %34 = dma.hbm_to_vmem [thread:$0]  %s9459_s2, 16, %s32_s24, [#allocation3]  }
  0x19   :  { %s7209_s15 = smov [#allocation7]  }
  0x1a   :  { %s50_s16 = sshll.u32 %s7209_s15, 4  ;;  %s51_s16 = int_to_ptr.vmem [resolvable:$true] %s50_s16 }
  0x1b   :  { %s7147_s17 = scalar_lea.vmem %s51_s16, 512  ;;  %p7152_p11 = scmp.lt.s32.totalorder %s51_s16, %s51_s16 }
  0x1c   :  { %p7148_p10 = scmp.ne.s32.totalorder %s51_s16, %s7147_s17  ;;  %p7153_p12 = scmp.lt.s32.totalorder %s7147_s17, %s7147_s17 }
  0x1e   :  { %p7154_p13 = por %p7153_p12, %p7152_p11 }
  0x20   :  { %p7155_p0 = pnand %p7154_p13, %p7148_p10 }
  0x22   :  { %7158 = shalt.err (!%p7155_p0)
}
  0x23   :  { %s7210_s3 = smov 128   ;;  %s7211_s18 = smov 8  }
  0x24   :  { %56 = dma.hbm_to_vmem [thread:$0]  %s9461_s4, 512, %s51_s16, [#allocation6], %s7210_s3, %s7210_s3, %s7211_s18  }
  0x25   :  { %s7212_s21 = smov [#allocation8]  }
  0x26   :  { %s68_s22 = sshll.u32 %s7212_s21, 4  ;;  %s69_s22 = int_to_ptr.vmem [resolvable:$true] %s68_s22 }
  0x27   :  { %s7167_s2 = scalar_lea.vmem %s69_s22, 1536  ;;  %p7172_p2 = scmp.lt.s32.totalorder %s69_s22, %s69_s22 }
  0x28   :  { %p7168_p1 = scmp.ne.s32.totalorder %s69_s22, %s7167_s2  ;;  %p7173_p3 = scmp.lt.s32.totalorder %s7167_s2, %s7167_s2 }
  0x2a   :  { %p7174_p4 = por %p7173_p3, %p7172_p2 }
  0x2c   :  { %p7175_p5 = pnand %p7174_p4, %p7168_p1 }
  0x2e   :  { %7178 = shalt.err (!%p7175_p5)
}
  0x2f   :  { %74 = dma.hbm_to_vmem [thread:$0]  %s9465_s8, 1536, %s69_s22, [#allocation9], %s7210_s3, %s7210_s3, %s7211_s18  }
  0x30   :  { %7199 = dma.done.wait [#allocation3], 16  }
  0x31   :  { %7200 = vsyncadd [#allocation3], 4294967280 }
  0x32   :  { %7201 = dma.done.wait [#allocation6], 528  }
  0x33   :  { %7202 = vsyncadd [#allocation6], 4294966768 }
  0x34   :  { %7203 = dma.done.wait [#allocation9], 1536  }
  0x35   :  { %7204 = vsyncadd [#allocation9], 4294965760  ;;  %v9470_v0 = vlaneseq  ;;  %v7213_v1 = vmov 0.0   ;;  %vm7214_vm0 = vmmov 0   ;;  %v7310_v4 = vld [vmem:[#allocation7 + $0x18] sm:$0xff]  ;;  %v7312_v5 = vld [vmem:[#allocation7 + $0x10] sm:$0xff] }
  0x36   :  { %6528 = vmatprep.subr.mxu0 %v7213_v1  ;;  %6536 = vmatprep.mubr.msk.f32.mxu0 %vm7214_vm0, %v7213_v1  ;;  %v7318_v6 = vld [vmem:[%s9457_s0] sm:$0xff]  ;;  %v7322_v7 = vld [vmem:[#allocation7 + $0x8] sm:$0xff]  ;;  %s7215_s26 = smov 64   ;;  %vm192_vm1 = vcmask 261120   ;;  %s7217_s29 = smov 32   ;;  %vm2559_vm2 = vcmask 1040384  }
  0x37   :  { %v7302_v2 = vshrl.u32 %v9470_v0, 7  ;;  %6539 = vmatprep.subr.mxu1 %v7213_v1  ;;  %6547 = vmatprep.mubr.msk.f32.mxu1 %vm7214_vm0, %v7213_v1  ;;  %v7330_v9 = vld [vmem:[#allocation7] sm:$0xff]  ;;  %v7355_v10 = vld [vmem:[%s9462_s5] ss:$0 sm:$0xff]  ;;  %v7362_v17 = vld [vmem:[#allocation5] ss:$0 sm:$0xff] }
  0x38   :  { %6529 = vmatpush3.msra.mxu0 %v7310_v4  ;;  %6540 = vmatpush3.msra.mxu1 %v7310_v4  ;;  %v7359_v14 = vld [vmem:[#allocation2] ss:$0 sm:$0xff]  ;;  %s7216_s5 = smov 96   ;;  %vm2568_vm3 = vcmask 1041408   ;;  %vm2577_vm4 = vcmask 1042432   ;;  %vm2586_vm5 = vcmask 1043456  }
  0x39   :  { %9515 = vst [vmem:[#allocation15_spill] sm:$0xff] %v7302_v2  ;;  %v7308_v3 = vsub.s32 0, %v7302_v2  ;;  %6530 = vmatprep.subr.mxu0 %v7213_v1  ;;  %6541 = vmatprep.subr.mxu1 %v7213_v1  ;;  %v111_v29 = vsub.s32 1, %v7302_v2  ;;  %v118_v53 = vsub.s32 2, %v7302_v2  ;;  %vm2595_vm6 = vcmask 1044480  }
  0x3a   :  { %6531 = vmatpush3.msra.mxu0 %v7312_v5  ;;  %6542 = vmatpush3.msra.mxu1 %v7312_v5  ;;  %vm2604_vm7 = vcmask 1045504   ;;  %vm2613_vm8 = vcmask 1046528   ;;  %vm2746_vm10 = vcmask 1041409   ;;  %vm2748_vm11 = vcmask 1042434  }
  0x3b   :  { %v105_v8 = vrot.slane %v7318_v6, %v7308_v3  ;;  %6532 = vmatprep.subr.mxu0 %v7213_v1  ;;  %6543 = vmatprep.subr.mxu1 %v7213_v1  ;;  %v112_v30 = vrot.slane %v7318_v6, %v111_v29  ;;  %v119_v54 = vrot.slane %v7318_v6, %v118_v53  ;;  %vm2750_vm12 = vcmask 1043459  }
  0x3c   :  { %6533 = vmatpush3.msra.mxu0 %v7322_v7  ;;  %6544 = vmatpush3.msra.mxu1 %v7322_v7  ;;  %vm2752_vm13 = vcmask 1044484   ;;  %vm2754_vm14 = vcmask 1045509   ;;  %vm2756_vm15 = vcmask 1046534  }
  0x3d   :  { %107 = vbcast.lane.b32.xlu0 %v105_v8, 256  ;;  %6534 = vmatprep.subr.mxu0 %v7213_v1 }
  0x3e   :  { %6535 = vmatpush3.msra.mxu0 %v7330_v9  ;;  %6545 = vmatprep.subr.mxu1 %v7213_v1 }
  0x3f   :  { %6537 = vmatmul.mubr.f32.vlgmr.msra.gmra.mxu0 %v7213_v1  ;;  %6546 = vmatpush3.msra.mxu1 %v7330_v9 }
  0x40   :  { %6550 = vmatprep.subr.mxu0 %v7213_v1  ;;  %6558 = vmatprep.mubr.msk.f32.mxu0 %vm7214_vm0, %v7213_v1 }
  0x41   :  { %6551 = vmatpush3.msra.mxu0 %v7310_v4  ;;  %6561 = vmatprep.subr.mxu1 %v7213_v1 }
  0x42   :  { %6552 = vmatprep.subr.mxu0 %v7213_v1 }
  0x43   :  { %6553 = vmatpush3.msra.mxu0 %v7312_v5 }
  0x44   :  { %6554 = vmatprep.subr.mxu0 %v7213_v1 }
  0x45   :  { %6555 = vmatpush3.msra.mxu0 %v7322_v7 }
  0x46   :  { %6556 = vmatprep.subr.mxu0 %v7213_v1 }
  0x47   :  { %6557 = vmatpush3.msra.mxu0 %v7330_v9 }
  0x48   :  { %6572 = vmatprep.subr.mxu0 %v7213_v1 }
  0xaf   :  { %v108_v15 = vpop.permute.xlu0 %107 }
  0xb0   :  { %v164_v16 = vmul.f32 %v7359_v14, %v108_v15 }
  0xb2   :  { %v178_v18 = vadd.f32 %v7362_v17, %v164_v16 }
  0xff   :  { %v262_v11 = vpop.f32.mrf.mxu0 }
 0x100   :  { %v263_v12 = vadd.f32 %v7355_v10, %v262_v11 }
 0x101   :  { %v6538_v13 = vpop.f32.mrf.mxu0 }
 0x102   :  { %274 = vrot.lane.b32.xlu0 %v263_v12, %s7215_s26  ;;  %v266_v19 = vadd.f32 %v263_v12, %v178_v18 }
 0x104   :  { %v6280_v20 = vmul.f32 -1.442695, %v266_v19 }
 0x106   :  { %6896 = vpow2.f32 %v6280_v20 }
 0x113   :  { %v6897_v21 = vpop.eup %6896 }
 0x114   :  { %v270_v22 = vadd.f32 1.0, %v6897_v21 }
 0x116   :  { %6898 = vrcp.f32 %v270_v22 }
 0x123   :  { %v6899_v23 = vpop.eup %6898 }
 0x124   :  { %v284_v31 = vsub.f32 1.0, %v6899_v23  ;;  %v290_v33 = vmul.f32 0.0, %v6899_v23 }
 0x174   :  { %v275_v24 = vpop.permute.xlu0 %274 }
 0x175   :  { %v277_v25 = vmul.f32 %v6899_v23, %v275_v24 }
 0x177   :  { %279 = vrot.lane.b32.xlu1 %v277_v25, %s7215_s26  ;;  %v125_v25 = vsub.s32 3, %v7302_v2 }
 0x1e9   :  { %v280_v26 = vpop.permute.xlu1 %279 }
 0x1ea   :  { %v282_v27 = vadd.f32 %v280_v26, %v178_v18  ;;  %v126_v26 = vrot.slane %v7318_v6, %v125_v25 }
 0x1ec   :  { %6900 = vtanh.f32 %v282_v27 }
 0x1f9   :  { %v6901_v28 = vpop.eup %6900 }
 0x1fa   :  { %286 = vrot.lane.b32.xlu1 %v6901_v28, %s7216_s5 }
 0x1fe   :  { %114 = vbcast.lane.b32.xlu1 %v112_v30, 256 }
 0x26c   :  { %v287_v32 = vpop.permute.xlu1 %286 }
 0x26d   :  { %v289_v34 = vmul.f32 %v287_v32, %v284_v31 }
 0x26f   :  { %v291_v35 = vadd.f32 %v290_v33, %v289_v34 }
 0x270   :  { %v7383_v40 = vpop.permute.xlu1 %114 }
 0x271   :  { %293 = vrot.lane.b32.xlu0 %v291_v35, %s7216_s5  ;;  %9516 = vst [vmem:[#allocation16_spill] sm:$0xff] %v7383_v40  ;;  %v165_v41 = vmul.f32 %v7359_v14, %v7383_v40 }
 0x273   :  { %v179_v42 = vadd.f32 %v7362_v17, %v165_v41 }
 0x2e3   :  { %v294_v36 = vpop.permute.xlu0 %293 }
 0x2e4   :  { %6548 = vmatmul.mubr.msk.f32.vlgmr.msra.gmra.mxu1 %vm192_vm1, %v294_v36 }
 0x2e5   :  { %6562 = vmatpush3.msra.mxu1 %v7310_v4  ;;  %6569 = vmatprep.mubr.msk.f32.mxu1 %vm7214_vm0, %v7213_v1 }
 0x2e6   :  { %6563 = vmatprep.subr.mxu1 %v7213_v1 }
 0x2e7   :  { %6564 = vmatpush3.msra.mxu1 %v7312_v5 }
 0x2e8   :  { %6565 = vmatprep.subr.mxu1 %v7213_v1 }
 0x2e9   :  { %6566 = vmatpush3.msra.mxu1 %v7322_v7 }
 0x2ea   :  { %6567 = vmatprep.subr.mxu1 %v7213_v1 }
 0x2eb   :  { %6568 = vmatpush3.msra.mxu1 %v7330_v9 }
 0x2ec   :  { %6583 = vmatprep.subr.mxu1 %v7213_v1 }
 0x3a4   :  { %v363_v37 = vpop.f32.mrf.mxu1 }
 0x3a5   :  { %v364_v38 = vadd.f32 %v7355_v10, %v363_v37 }
 0x3a6   :  { %v6549_v39 = vpop.f32.mrf.mxu1 }
 0x3a7   :  { %375 = vrot.lane.b32.xlu0 %v364_v38, %s7215_s26  ;;  %v367_v43 = vadd.f32 %v364_v38, %v179_v42 }
 0x3a9   :  { %v6282_v44 = vmul.f32 -1.442695, %v367_v43 }
 0x3ab   :  { %6902 = vpow2.f32 %v6282_v44 }
 0x3b8   :  { %v6903_v45 = vpop.eup %6902 }
 0x3b9   :  { %v371_v46 = vadd.f32 1.0, %v6903_v45 }
 0x3bb   :  { %6904 = vrcp.f32 %v371_v46 }
 0x3c8   :  { %v6905_v47 = vpop.eup %6904 }
 0x3c9   :  { %v385_v55 = vsub.f32 1.0, %v6905_v47  ;;  %v391_v57 = vmul.f32 %v6905_v47, %v291_v35 }
 0x419   :  { %v376_v48 = vpop.permute.xlu0 %375 }
 0x41a   :  { %v378_v49 = vmul.f32 %v6905_v47, %v376_v48 }
 0x41c   :  { %380 = vrot.lane.b32.xlu1 %v378_v49, %s7215_s26 }
 0x48e   :  { %v381_v50 = vpop.permute.xlu1 %380 }
 0x48f   :  { %v383_v51 = vadd.f32 %v381_v50, %v179_v42  ;;  %v132_v50 = vsub.s32 4, %v7302_v2 }
 0x491   :  { %6906 = vtanh.f32 %v383_v51  ;;  %v133_v51 = vrot.slane %v7318_v6, %v132_v50 }
 0x49e   :  { %v6907_v52 = vpop.eup %6906 }
 0x49f   :  { %387 = vrot.lane.b32.xlu0 %v6907_v52, %s7216_s5 }
 0x4a3   :  { %121 = vbcast.lane.b32.xlu0 %v119_v54, 256 }
 0x511   :  { %v388_v56 = vpop.permute.xlu0 %387 }
 0x512   :  { %v390_v58 = vmul.f32 %v388_v56, %v385_v55 }
 0x514   :  { %v392_v59 = vadd.f32 %v391_v57, %v390_v58 }
 0x515   :  { %v7406_v8 = vpop.permute.xlu0 %121 }
 0x516   :  { %394 = vrot.lane.b32.xlu1 %v392_v59, %s7216_s5  ;;  %v166_v11 = vmul.f32 %v7359_v14, %v7406_v8 }
 0x518   :  { %v180_v12 = vadd.f32 %v7362_v17, %v166_v11 }
 0x588   :  { %v395_v60 = vpop.permute.xlu1 %394 }
 0x589   :  { %6559 = vmatmul.mubr.msk.f32.vlgmr.msra.gmra.mxu0 %vm192_vm1, %v395_v60 }
 0x58a   :  { %6573 = vmatpush3.msra.mxu0 %v7310_v4  ;;  %6580 = vmatprep.mubr.msk.f32.mxu0 %vm7214_vm0, %v7213_v1 }
 0x58b   :  { %6574 = vmatprep.subr.mxu0 %v7213_v1 }
 0x58c   :  { %6575 = vmatpush3.msra.mxu0 %v7312_v5 }
 0x58d   :  { %6576 = vmatprep.subr.mxu0 %v7213_v1 }
 0x58e   :  { %6577 = vmatpush3.msra.mxu0 %v7322_v7 }
 0x58f   :  { %6578 = vmatprep.subr.mxu0 %v7213_v1 }
 0x590   :  { %6579 = vmatpush3.msra.mxu0 %v7330_v9 }
 0x591   :  { %6594 = vmatprep.subr.mxu0 %v7213_v1 }
 0x649   :  { %v464_v61 = vpop.f32.mrf.mxu0 }
 0x64a   :  { %v465_v62 = vadd.f32 %v7355_v10, %v464_v61 }
 0x64b   :  { %v6560_v63 = vpop.f32.mrf.mxu0 }
 0x64c   :  { %476 = vrot.lane.b32.xlu1 %v465_v62, %s7215_s26  ;;  %v468_v13 = vadd.f32 %v465_v62, %v180_v12 }
 0x64e   :  { %v6284_v15 = vmul.f32 -1.442695, %v468_v13 }
 0x650   :  { %6908 = vpow2.f32 %v6284_v15 }
 0x65d   :  { %v6909_v16 = vpop.eup %6908 }
 0x65e   :  { %v472_v18 = vadd.f32 1.0, %v6909_v16 }
 0x660   :  { %6910 = vrcp.f32 %v472_v18 }
 0x66d   :  { %v6911_v19 = vpop.eup %6910 }
 0x66e   :  { %v486_v27 = vsub.f32 1.0, %v6911_v19  ;;  %v492_v29 = vmul.f32 %v6911_v19, %v392_v59 }
 0x6be   :  { %v477_v20 = vpop.permute.xlu1 %476 }
 0x6bf   :  { %v479_v21 = vmul.f32 %v6911_v19, %v477_v20 }
 0x6c1   :  { %481 = vrot.lane.b32.xlu0 %v479_v21, %s7215_s26 }
 0x733   :  { %v482_v22 = vpop.permute.xlu0 %481 }
 0x734   :  { %v484_v23 = vadd.f32 %v482_v22, %v180_v12 }
 0x736   :  { %6912 = vtanh.f32 %v484_v23  ;;  %v139_v23 = vsub.s32 5, %v7302_v2 }
 0x743   :  { %v6913_v24 = vpop.eup %6912 }
 0x744   :  { %488 = vrot.lane.b32.xlu1 %v6913_v24, %s7216_s5  ;;  %v140_v24 = vrot.slane %v7318_v6, %v139_v23 }
 0x748   :  { %128 = vbcast.lane.b32.xlu1 %v126_v26, 256 }
 0x7b6   :  { %v489_v28 = vpop.permute.xlu1 %488 }
 0x7b7   :  { %v491_v30 = vmul.f32 %v489_v28, %v486_v27 }
 0x7b9   :  { %v493_v31 = vadd.f32 %v492_v29, %v491_v30 }
 0x7ba   :  { %v7429_v36 = vpop.permute.xlu1 %128 }
 0x7bb   :  { %495 = vrot.lane.b32.xlu0 %v493_v31, %s7216_s5  ;;  %v167_v37 = vmul.f32 %v7359_v14, %v7429_v36 }
 0x7bd   :  { %v181_v38 = vadd.f32 %v7362_v17, %v167_v37 }
 0x82d   :  { %v496_v32 = vpop.permute.xlu0 %495 }
 0x82e   :  { %6570 = vmatmul.mubr.msk.f32.vlgmr.msra.gmra.mxu1 %vm192_vm1, %v496_v32 }
 0x82f   :  { %6584 = vmatpush3.msra.mxu1 %v7310_v4  ;;  %6591 = vmatprep.mubr.msk.f32.mxu1 %vm7214_vm0, %v7213_v1 }
 0x830   :  { %6585 = vmatprep.subr.mxu1 %v7213_v1 }
 0x831   :  { %6586 = vmatpush3.msra.mxu1 %v7312_v5 }
 0x832   :  { %6587 = vmatprep.subr.mxu1 %v7213_v1 }
 0x833   :  { %6588 = vmatpush3.msra.mxu1 %v7322_v7 }
 0x834   :  { %6589 = vmatprep.subr.mxu1 %v7213_v1 }
 0x835   :  { %6590 = vmatpush3.msra.mxu1 %v7330_v9 }
 0x836   :  { %6605 = vmatprep.subr.mxu1 %v7213_v1 }
 0x8ee   :  { %v565_v33 = vpop.f32.mrf.mxu1 }
 0x8ef   :  { %v566_v34 = vadd.f32 %v7355_v10, %v565_v33 }
 0x8f0   :  { %v6571_v35 = vpop.f32.mrf.mxu1 }
 0x8f1   :  { %577 = vrot.lane.b32.xlu0 %v566_v34, %s7215_s26  ;;  %v569_v39 = vadd.f32 %v566_v34, %v181_v38 }
 0x8f3   :  { %v6286_v41 = vmul.f32 -1.442695, %v569_v39 }
 0x8f5   :  { %6914 = vpow2.f32 %v6286_v41 }
 0x902   :  { %v6915_v42 = vpop.eup %6914 }
 0x903   :  { %v573_v43 = vadd.f32 1.0, %v6915_v42 }
 0x905   :  { %6916 = vrcp.f32 %v573_v43 }
 0x912   :  { %v6917_v44 = vpop.eup %6916 }
 0x913   :  { %v587_v52 = vsub.f32 1.0, %v6917_v44  ;;  %v593_v54 = vmul.f32 %v6917_v44, %v493_v31 }
 0x963   :  { %v578_v45 = vpop.permute.xlu0 %577 }
 0x964   :  { %v580_v46 = vmul.f32 %v6917_v44, %v578_v45  ;;  %v146_v45 = vsub.s32 6, %v7302_v2 }
 0x966   :  { %582 = vrot.lane.b32.xlu1 %v580_v46, %s7215_s26  ;;  %v147_v46 = vrot.slane %v7318_v6, %v146_v45 }
 0x9d8   :  { %v583_v47 = vpop.permute.xlu1 %582 }
 0x9d9   :  { %v585_v48 = vadd.f32 %v583_v47, %v181_v38 }
 0x9db   :  { %6918 = vtanh.f32 %v585_v48 }
 0x9e8   :  { %v6919_v49 = vpop.eup %6918 }
 0x9e9   :  { %589 = vrot.lane.b32.xlu0 %v6919_v49, %s7216_s5 }
 0x9ed   :  { %135 = vbcast.lane.b32.xlu0 %v133_v51, 256 }
 0xa5b   :  { %v590_v53 = vpop.permute.xlu0 %589 }
 0xa5c   :  { %v592_v55 = vmul.f32 %v590_v53, %v587_v52 }
 0xa5e   :  { %v594_v56 = vadd.f32 %v593_v54, %v592_v55 }
 0xa5f   :  { %v7452_v61 = vpop.permute.xlu0 %135 }
 0xa60   :  { %596 = vrot.lane.b32.xlu1 %v594_v56, %s7216_s5  ;;  %v168_v62 = vmul.f32 %v7359_v14, %v7452_v61 }
 0xa62   :  { %v182_v63 = vadd.f32 %v7362_v17, %v168_v62 }
 0xad2   :  { %v597_v57 = vpop.permute.xlu1 %596 }
 0xad3   :  { %6581 = vmatmul.mubr.msk.f32.vlgmr.msra.gmra.mxu0 %vm192_vm1, %v597_v57 }
 0xad4   :  { %6595 = vmatpush3.msra.mxu0 %v7310_v4  ;;  %6602 = vmatprep.mubr.msk.f32.mxu0 %vm7214_vm0, %v7213_v1 }
 0xad5   :  { %6596 = vmatprep.subr.mxu0 %v7213_v1 }
 0xad6   :  { %6597 = vmatpush3.msra.mxu0 %v7312_v5 }
 0xad7   :  { %6598 = vmatprep.subr.mxu0 %v7213_v1 }
 0xad8   :  { %6599 = vmatpush3.msra.mxu0 %v7322_v7 }
 0xad9   :  { %6600 = vmatprep.subr.mxu0 %v7213_v1 }
 0xada   :  { %6601 = vmatpush3.msra.mxu0 %v7330_v9 }
 0xadb   :  { %6616 = vmatprep.subr.mxu0 %v7213_v1 }
 0xb93   :  { %v666_v58 = vpop.f32.mrf.mxu0 }
 0xb94   :  { %v667_v59 = vadd.f32 %v7355_v10, %v666_v58 }
 0xb95   :  { %v6582_v60 = vpop.f32.mrf.mxu0 }
 0xb96   :  { %678 = vrot.lane.b32.xlu1 %v667_v59, %s7215_s26  ;;  %v670_v11 = vadd.f32 %v667_v59, %v182_v63 }
 0xb98   :  { %v6288_v12 = vmul.f32 -1.442695, %v670_v11 }
 0xb9a   :  { %6920 = vpow2.f32 %v6288_v12 }
 0xba7   :  { %v6921_v13 = vpop.eup %6920 }
 0xba8   :  { %v674_v15 = vadd.f32 1.0, %v6921_v13 }
 0xbaa   :  { %6922 = vrcp.f32 %v674_v15 }
 0xbb7   :  { %v6923_v16 = vpop.eup %6922 }
 0xbb8   :  { %v688_v25 = vsub.f32 1.0, %v6923_v16  ;;  %v694_v27 = vmul.f32 %v6923_v16, %v594_v56 }
 0xc08   :  { %v679_v18 = vpop.permute.xlu1 %678 }
 0xc09   :  { %v681_v19 = vmul.f32 %v6923_v16, %v679_v18 }
 0xc0b   :  { %683 = vrot.lane.b32.xlu0 %v681_v19, %s7215_s26  ;;  %v153_v19 = vsub.s32 7, %v7302_v2 }
 0xc7d   :  { %v684_v20 = vpop.permute.xlu0 %683 }
 0xc7e   :  { %v686_v21 = vadd.f32 %v684_v20, %v182_v63  ;;  %v154_v20 = vrot.slane %v7318_v6, %v153_v19 }
 0xc80   :  { %6924 = vtanh.f32 %v686_v21 }
 0xc8d   :  { %v6925_v22 = vpop.eup %6924 }
 0xc8e   :  { %690 = vrot.lane.b32.xlu1 %v6925_v22, %s7216_s5 }
 0xc92   :  { %142 = vbcast.lane.b32.xlu1 %v140_v24, 256 }
 0xd00   :  { %v691_v26 = vpop.permute.xlu1 %690 }
 0xd01   :  { %v693_v28 = vmul.f32 %v691_v26, %v688_v25 }
 0xd03   :  { %v695_v29 = vadd.f32 %v694_v27, %v693_v28 }
 0xd04   :  { %v7475_v33 = vpop.permute.xlu1 %142 }
 0xd05   :  { %697 = vrot.lane.b32.xlu0 %v695_v29, %s7216_s5 }
 0xd77   :  { %v698_v30 = vpop.permute.xlu0 %697 }
 0xd78   :  { %6592 = vmatmul.mubr.msk.f32.vlgmr.msra.gmra.mxu1 %vm192_vm1, %v698_v30 }
 0xd79   :  { %6606 = vmatpush3.msra.mxu1 %v7310_v4  ;;  %6613 = vmatprep.mubr.msk.f32.mxu1 %vm7214_vm0, %v7213_v1 }
 0xd7a   :  { %6607 = vmatprep.subr.mxu1 %v7213_v1 }
 0xd7b   :  { %6608 = vmatpush3.msra.mxu1 %v7312_v5  ;;  %v169_v5 = vmul.f32 %v7359_v14, %v7475_v33 }
 0xd7c   :  { %6609 = vmatprep.subr.mxu1 %v7213_v1 }
 0xd7d   :  { %6610 = vmatpush3.msra.mxu1 %v7322_v7  ;;  %v183_v34 = vadd.f32 %v7362_v17, %v169_v5 }
 0xd7e   :  { %6611 = vmatprep.subr.mxu1 %v7213_v1 }
 0xd7f   :  { %6612 = vmatpush3.msra.mxu1 %v7330_v9 }
 0xd80   :  { %6627 = vmatprep.subr.mxu1 %v7213_v1 }
 0xe38   :  { %v767_v31 = vpop.f32.mrf.mxu1 }
 0xe39   :  { %v768_v4 = vadd.f32 %v7355_v10, %v767_v31 }
 0xe3a   :  { %v6593_v32 = vpop.f32.mrf.mxu1 }
 0xe3b   :  { %779 = vrot.lane.b32.xlu0 %v768_v4, %s7215_s26  ;;  %v771_v7 = vadd.f32 %v768_v4, %v183_v34 }
 0xe3d   :  { %v6290_v35 = vmul.f32 -1.442695, %v771_v7 }
 0xe3f   :  { %6926 = vpow2.f32 %v6290_v35 }
 0xe4c   :  { %v6927_v37 = vpop.eup %6926 }
 0xe4d   :  { %v775_v9 = vadd.f32 1.0, %v6927_v37 }
 0xe4f   :  { %6928 = vrcp.f32 %v775_v9 }
 0xe5c   :  { %v6929_v38 = vpop.eup %6928 }
 0xe5d   :  { %v789_v47 = vsub.f32 1.0, %v6929_v38  ;;  %v795_v49 = vmul.f32 %v6929_v38, %v695_v29 }
 0xead   :  { %v780_v39 = vpop.permute.xlu0 %779 }
 0xeae   :  { %v782_v41 = vmul.f32 %v6929_v38, %v780_v39  ;;  %v7511_v38 = vld [vmem:[#allocation8 + $0x18] sm:$0xff]  ;;  %v7513_v39 = vld [vmem:[#allocation8 + $0x10] sm:$0xff] }
 0xeb0   :  { %784 = vrot.lane.b32.xlu1 %v782_v41, %s7215_s26  ;;  %v7524_v41 = vld [vmem:[#allocation8] sm:$0xff] }
 0xf22   :  { %v785_v42 = vpop.permute.xlu1 %784 }
 0xf23   :  { %v787_v43 = vadd.f32 %v785_v42, %v183_v34  ;;  %v6295_v42 = vld [vmem:[%s9467_s10] ss:$0 sm:$0xff] }
 0xf25   :  { %6930 = vtanh.f32 %v787_v43 }
 0xf32   :  { %v6931_v44 = vpop.eup %6930 }
 0xf33   :  { %791 = vrot.lane.b32.xlu0 %v6931_v44, %s7216_s5 }
 0xf37   :  { %149 = vbcast.lane.b32.xlu0 %v147_v46, 256 }
 0xfa5   :  { %v792_v48 = vpop.permute.xlu0 %791 }
 0xfa6   :  { %v794_v50 = vmul.f32 %v792_v48, %v789_v47 }
 0xfa8   :  { %v796_v51 = vadd.f32 %v795_v49, %v794_v50 }
 0xfa9   :  { %v7490_v56 = vpop.permute.xlu0 %149 }
 0xfaa   :  { %798 = vrot.lane.b32.xlu1 %v796_v51, %s7216_s5  ;;  %v170_v57 = vmul.f32 %v7359_v14, %v7490_v56 }
 0xfac   :  { %v184_v58 = vadd.f32 %v7362_v17, %v170_v57 }
0x101c   :  { %v799_v52 = vpop.permute.xlu1 %798 }
0x101d   :  { %6603 = vmatmul.mubr.msk.f32.vlgmr.msra.gmra.mxu0 %vm192_vm1, %v799_v52 }
0x101e   :  { %6624 = vmatprep.mubr.msk.f32.mxu0 %vm7214_vm0, %v7213_v1  ;;  %6617 = vmatpush3.msra.mxu0 %v7511_v38 }
0x101f   :  { %6618 = vmatprep.subr.mxu0 %v7213_v1 }
0x1020   :  { %6619 = vmatpush3.msra.mxu0 %v7513_v39 }
0x1021   :  { %6620 = vmatprep.subr.mxu0 %v7213_v1 }
0x10dd   :  { %v868_v53 = vpop.f32.mrf.mxu0 }
0x10de   :  { %v869_v54 = vadd.f32 %v7355_v10, %v868_v53  ;;  %v9471_v53 = vmov 0  }
0x10df   :  { %v6604_v55 = vpop.f32.mrf.mxu0  ;;  %6894 = vset.pattern.permute.xlu1 %v9471_v53  ;;  %6895 = vset.pattern.permute.xlu0 %v9471_v53 }
0x10e0   :  { %880 = vrot.lane.b32.xlu1 %v869_v54, %s7215_s26  ;;  %v872_v59 = vadd.f32 %v869_v54, %v184_v58  ;;  %v6296_v54 = vld [vmem:[%s9468_s11] ss:$0 sm:$0xff] }
0x10e2   :  { %v6292_v60 = vmul.f32 -1.442695, %v872_v59 }
0x10e4   :  { %6932 = vpow2.f32 %v6292_v60 }
0x10f1   :  { %v6933_v62 = vpop.eup %6932 }
0x10f2   :  { %v876_v63 = vadd.f32 1.0, %v6933_v62 }
0x10f4   :  { %6934 = vrcp.f32 %v876_v63  ;;  %v7579_v63 = vld [vmem:[%s9463_s6] ss:$0 sm:$0xff] }
0x1101   :  { %v6935_v11 = vpop.eup %6934 }
0x1102   :  { %v890_v21 = vsub.f32 1.0, %v6935_v11  ;;  %v896_v23 = vmul.f32 %v6935_v11, %v796_v51 }
0x1152   :  { %v881_v12 = vpop.permute.xlu1 %880 }
0x1153   :  { %v883_v13 = vmul.f32 %v6935_v11, %v881_v12 }
0x1155   :  { %885 = vrot.lane.b32.xlu0 %v883_v13, %s7215_s26  ;;  %v7585_v13 = vld [vmem:[%s9464_s7] ss:$0 sm:$0xff] }
0x11c7   :  { %v886_v15 = vpop.permute.xlu0 %885 }
0x11c8   :  { %v888_v16 = vadd.f32 %v886_v15, %v184_v58  ;;  %v7572_v58 = vld [vmem:[%s9466_s9] ss:$0 sm:$0xff] }
0x11ca   :  { %6936 = vtanh.f32 %v888_v16 }
0x11d7   :  { %v6937_v18 = vpop.eup %6936 }
0x11d8   :  { %892 = vrot.lane.b32.xlu1 %v6937_v18, %s7216_s5 }
0x11dc   :  { %156 = vbcast.lane.b32.xlu1 %v154_v20, 256 }
0x124a   :  { %v893_v22 = vpop.permute.xlu1 %892 }
0x124b   :  { %v895_v24 = vmul.f32 %v893_v22, %v890_v21 }
0x124d   :  { %v897_v25 = vadd.f32 %v896_v23, %v895_v24 }
0x124e   :  { %v7505_v6 = vpop.permute.xlu1 %156 }
0x124f   :  { %899 = vrot.lane.b32.xlu0 %v897_v25, %s7216_s5  ;;  %v171_v30 = vmul.f32 %v7359_v14, %v7505_v6  ;;  %v7518_v14 = vld [vmem:[#allocation8 + $0x8] sm:$0xff] }
0x1250   :  { %6621 = vmatpush3.msra.mxu0 %v7518_v14 }
0x1251   :  { %v185_v31 = vadd.f32 %v7362_v17, %v171_v30  ;;  %6622 = vmatprep.subr.mxu0 %v7213_v1 }
0x1252   :  { %6623 = vmatpush3.msra.mxu0 %v7524_v41 }
0x1253   :  { %6638 = vmatprep.subr.mxu0 %v7213_v1 }
0x12c1   :  { %v900_v26 = vpop.permute.xlu0 %899 }
0x12c2   :  { %6614 = vmatmul.mubr.msk.f32.vlgmr.msra.gmra.mxu1 %vm192_vm1, %v900_v26 }
0x12c3   :  { %6635 = vmatprep.mubr.msk.f32.mxu1 %vm7214_vm0, %v7213_v1  ;;  %6628 = vmatpush3.msra.mxu1 %v7511_v38 }
0x12c4   :  { %6629 = vmatprep.subr.mxu1 %v7213_v1 }
0x12c5   :  { %6630 = vmatpush3.msra.mxu1 %v7513_v39 }
0x12c6   :  { %6631 = vmatprep.subr.mxu1 %v7213_v1 }
0x12c7   :  { %6632 = vmatpush3.msra.mxu1 %v7518_v14 }
0x12c8   :  { %6633 = vmatprep.subr.mxu1 %v7213_v1 }
0x12c9   :  { %6634 = vmatpush3.msra.mxu1 %v7524_v41 }
0x12ca   :  { %6649 = vmatprep.subr.mxu1 %v7213_v1 }
0x1382   :  { %v969_v27 = vpop.f32.mrf.mxu1 }
0x1383   :  { %v970_v28 = vadd.f32 %v7355_v10, %v969_v27 }
0x1384   :  { %v6615_v29 = vpop.f32.mrf.mxu1 }
0x1385   :  { %981 = vrot.lane.b32.xlu0 %v970_v28, %s7215_s26  ;;  %v973_v4 = vadd.f32 %v970_v28, %v185_v31 }
0x1387   :  { %v6294_v32 = vmul.f32 -1.442695, %v973_v4 }
0x1389   :  { %6938 = vpow2.f32 %v6294_v32 }
0x1396   :  { %v6939_v5 = vpop.eup %6938 }
0x1397   :  { %v977_v34 = vadd.f32 1.0, %v6939_v5 }
0x1399   :  { %6940 = vrcp.f32 %v977_v34 }
0x13a6   :  { %v6941_v7 = vpop.eup %6940 }
0x13a7   :  { %v991_v43 = vsub.f32 1.0, %v6941_v7  ;;  %v997_v45 = vmul.f32 %v6941_v7, %v897_v25 }
0x13f7   :  { %v982_v35 = vpop.permute.xlu0 %981 }
0x13f8   :  { %v984_v37 = vmul.f32 %v6941_v7, %v982_v35  ;;  %v1056_v7 = vmul.f32 %v7579_v63, %v7505_v6 }
0x13fa   :  { %986 = vrot.lane.b32.xlu1 %v984_v37, %s7215_s26  ;;  %v1063_v35 = vadd.f32 %v7585_v13, %v1056_v7 }
0x146c   :  { %v987_v10 = vpop.permute.xlu1 %986 }
0x146d   :  { %v989_v9 = vadd.f32 %v987_v10, %v185_v31 }
0x146f   :  { %6942 = vtanh.f32 %v989_v9 }
0x147c   :  { %v6943_v17 = vpop.eup %6942 }
0x147d   :  { %993 = vrot.lane.b32.xlu0 %v6943_v17, %s7216_s5 }
0x1481   :  { %1013 = vrot.lane.b32.xlu0 %v6295_v42, %s7217_s29 }
0x14ef   :  { %v994_v44 = vpop.permute.xlu0 %993 }
0x14f0   :  { %v996_v46 = vmul.f32 %v994_v44, %v991_v43 }
0x14f2   :  { %v7540_v47 = vadd.f32 %v997_v45, %v996_v46 }
0x14f3   :  { %v7542_v48 = vpop.permute.xlu0 %1013 }
0x14f4   :  { %1071 = vrot.lane.b32.xlu1 %v7540_v47, %s7216_s5  ;;  %v1016_v49 = vmul.f32 %v7542_v48, %v7540_v47 }
0x14f8   :  { %1018 = vrot.lane.b32.xlu1 %v1016_v49, %s7216_s5 }
0x1566   :  { %v7549_v50 = vpop.permute.xlu1 %1071 }
0x1567   :  { %6625 = vmatmul.mubr.msk.f32.vlgmr.msra.gmra.mxu0 %vm192_vm1, %v7549_v50 }
0x1568   :  { %6639 = vmatpush3.msra.mxu0 %v7511_v38  ;;  %6646 = vmatprep.mubr.msk.f32.mxu0 %vm7214_vm0, %v7213_v1 }
0x1569   :  { %6640 = vmatprep.subr.mxu0 %v7213_v1 }
0x156a   :  { %v1019_v51 = vpop.permute.xlu1 %1018  ;;  %6641 = vmatpush3.msra.mxu0 %v7513_v39 }
0x156b   :  { %v1021_v52 = vsel %vm192_vm1, %v1019_v51, 0.0  ;;  %6642 = vmatprep.subr.mxu0 %v7213_v1 }
0x156c   :  { %1022 = vadd.xlane.f32.xlu0 %v1021_v52  ;;  %6643 = vmatpush3.msra.mxu0 %v7518_v14 }
0x156d   :  { %6644 = vmatprep.subr.mxu0 %v7213_v1 }
0x156e   :  { %6645 = vmatpush3.msra.mxu0 %v7524_v41 }
0x156f   :  { %6660 = vmatprep.subr.mxu0 %v7213_v1 }
0x15f5   :  { %v1023_v55 = vpop.xlane.xlu0 %1022 }
0x15f6   :  { %v1030_v57 = vadd.f32 %v6296_v54, %v1023_v55 }
0x15f8   :  { %1033 = vperm.xlu1 %6894, %v1030_v57  }
0x1627   :  { %v1141_v59 = vpop.f32.mrf.mxu0 }
0x1628   :  { %v1142_v60 = vadd.f32 %v7572_v58, %v1141_v59 }
0x1629   :  { %v6626_v62 = vpop.f32.mrf.mxu0 }
0x162a   :  { %1153 = vrot.lane.b32.xlu1 %v1142_v60, %s7215_s26 }
0x1673   :  { %v1034_v11 = vpop.permute.xlu1 %1033 }
0x1674   :  { %v1042_v12 = vmul.f32 %v7579_v63, %v1034_v11 }
0x1676   :  { %v1049_v15 = vadd.f32 %v7585_v13, %v1042_v12  ;;  %v1055_v12 = vmul.f32 %v7579_v63, %v7490_v56 }
0x1678   :  { %v1145_v16 = vadd.f32 %v1142_v60, %v1049_v15 }
0x167a   :  { %v6301_v18 = vmul.f32 -1.442695, %v1145_v16 }
0x167c   :  { %6944 = vpow2.f32 %v6301_v18 }
0x1689   :  { %v6945_v19 = vpop.eup %6944 }
0x168a   :  { %v1149_v20 = vadd.f32 1.0, %v6945_v19 }
0x168c   :  { %6946 = vrcp.f32 %v1149_v20 }
0x1699   :  { %v6947_v21 = vpop.eup %6946 }
0x169a   :  { %v1163_v27 = vsub.f32 1.0, %v6947_v21  ;;  %v1169_v29 = vmul.f32 %v6947_v21, %v7540_v47 }
0x169c   :  { %v1154_v22 = vpop.permute.xlu1 %1153 }
0x169d   :  { %v1156_v23 = vmul.f32 %v6947_v21, %v1154_v22 }
0x169f   :  { %1158 = vrot.lane.b32.xlu1 %v1156_v23, %s7215_s26 }
0x1711   :  { %v1159_v24 = vpop.permute.xlu1 %1158 }
0x1712   :  { %v1161_v25 = vadd.f32 %v1159_v24, %v1049_v15  ;;  %v1062_v15 = vadd.f32 %v7585_v13, %v1055_v12 }
0x1714   :  { %6948 = vtanh.f32 %v1161_v25 }
0x1721   :  { %v6949_v26 = vpop.eup %6948 }
0x1722   :  { %1165 = vrot.lane.b32.xlu1 %v6949_v26, %s7216_s5 }
0x1794   :  { %v1166_v28 = vpop.permute.xlu1 %1165 }
0x1795   :  { %v1168_v30 = vmul.f32 %v1166_v28, %v1163_v27 }
0x1797   :  { %v7591_v31 = vadd.f32 %v1169_v29, %v1168_v30 }
0x1799   :  { %1172 = vrot.lane.b32.xlu1 %v7591_v31, %s7216_s5 }
0x180b   :  { %v1173_v4 = vpop.permute.xlu1 %1172 }
0x180c   :  { %6636 = vmatmul.mubr.msk.f32.vlgmr.msra.gmra.mxu1 %vm192_vm1, %v1173_v4 }
0x180d   :  { %6650 = vmatpush3.msra.mxu1 %v7511_v38  ;;  %6657 = vmatprep.mubr.msk.f32.mxu1 %vm7214_vm0, %v7213_v1 }
0x180e   :  { %6651 = vmatprep.subr.mxu1 %v7213_v1 }
0x180f   :  { %6652 = vmatpush3.msra.mxu1 %v7513_v39 }
0x1810   :  { %6653 = vmatprep.subr.mxu1 %v7213_v1 }
0x1811   :  { %6654 = vmatpush3.msra.mxu1 %v7518_v14 }
0x1812   :  { %6655 = vmatprep.subr.mxu1 %v7213_v1 }
0x1813   :  { %6656 = vmatpush3.msra.mxu1 %v7524_v41 }
0x1814   :  { %6671 = vmatprep.subr.mxu1 %v7213_v1 }
0x18cc   :  { %v1242_v32 = vpop.f32.mrf.mxu1 }
0x18cd   :  { %v1243_v5 = vadd.f32 %v7572_v58, %v1242_v32 }
0x18ce   :  { %v6637_v34 = vpop.f32.mrf.mxu1 }
0x18cf   :  { %1254 = vrot.lane.b32.xlu1 %v1243_v5, %s7215_s26  ;;  %v1246_v37 = vadd.f32 %v1243_v5, %v1063_v35 }
0x18d1   :  { %v6303_v10 = vmul.f32 -1.442695, %v1246_v37 }
0x18d3   :  { %6950 = vpow2.f32 %v6303_v10 }
0x18e0   :  { %v6951_v9 = vpop.eup %6950 }
0x18e1   :  { %v1250_v17 = vadd.f32 1.0, %v6951_v9 }
0x18e3   :  { %6952 = vrcp.f32 %v1250_v17 }
0x18f0   :  { %v6953_v42 = vpop.eup %6952 }
0x18f1   :  { %v1264_v51 = vsub.f32 1.0, %v6953_v42  ;;  %v1270_v54 = vmul.f32 %v6953_v42, %v7591_v31 }
0x1941   :  { %v1255_v43 = vpop.permute.xlu1 %1254 }
0x1942   :  { %v1257_v44 = vmul.f32 %v6953_v42, %v1255_v43 }
0x1944   :  { %1259 = vrot.lane.b32.xlu1 %v1257_v44, %s7215_s26 }
0x19b6   :  { %v1260_v45 = vpop.permute.xlu1 %1259 }
0x19b7   :  { %v1262_v46 = vadd.f32 %v1260_v45, %v1063_v35  ;;  %v1054_v35 = vmul.f32 %v7579_v63, %v7475_v33 }
0x19b9   :  { %6954 = vtanh.f32 %v1262_v46  ;;  %v1061_v37 = vadd.f32 %v7585_v13, %v1054_v35 }
0x19c6   :  { %v6955_v49 = vpop.eup %6954 }
0x19c7   :  { %1266 = vrot.lane.b32.xlu1 %v6955_v49, %s7216_s5 }
0x1a39   :  { %v1267_v52 = vpop.permute.xlu1 %1266 }
0x1a3a   :  { %v1269_v55 = vmul.f32 %v1267_v52, %v1264_v51 }
0x1a3c   :  { %v7614_v57 = vadd.f32 %v1270_v54, %v1269_v55 }
0x1a3e   :  { %1273 = vrot.lane.b32.xlu0 %v7614_v57, %s7216_s5 }
0x1ab0   :  { %v1274_v59 = vpop.permute.xlu0 %1273 }
0x1ab1   :  { %6647 = vmatmul.mubr.msk.f32.vlgmr.msra.gmra.mxu0 %vm192_vm1, %v1274_v59 }
0x1ab2   :  { %6661 = vmatpush3.msra.mxu0 %v7511_v38  ;;  %6668 = vmatprep.mubr.msk.f32.mxu0 %vm7214_vm0, %v7213_v1 }
0x1ab3   :  { %6662 = vmatprep.subr.mxu0 %v7213_v1 }
0x1ab4   :  { %6663 = vmatpush3.msra.mxu0 %v7513_v39 }
0x1ab5   :  { %6664 = vmatprep.subr.mxu0 %v7213_v1 }
0x1ab6   :  { %6665 = vmatpush3.msra.mxu0 %v7518_v14 }
0x1ab7   :  { %6666 = vmatprep.subr.mxu0 %v7213_v1 }
0x1ab8   :  { %6667 = vmatpush3.msra.mxu0 %v7524_v41 }
0x1ab9   :  { %6682 = vmatprep.subr.mxu0 %v7213_v1 }
0x1b71   :  { %v1343_v60 = vpop.f32.mrf.mxu0 }
0x1b72   :  { %v1344_v62 = vadd.f32 %v7572_v58, %v1343_v60 }
0x1b73   :  { %v6648_v11 = vpop.f32.mrf.mxu0 }
0x1b74   :  { %1355 = vrot.lane.b32.xlu1 %v1344_v62, %s7215_s26  ;;  %v1347_v16 = vadd.f32 %v1344_v62, %v1062_v15 }
0x1b76   :  { %v6305_v18 = vmul.f32 -1.442695, %v1347_v16  ;;  %v1053_v16 = vmul.f32 %v7579_v63, %v7452_v61 }
0x1b78   :  { %6956 = vpow2.f32 %v6305_v18  ;;  %v1060_v18 = vadd.f32 %v7585_v13, %v1053_v16 }
0x1b85   :  { %v6957_v19 = vpop.eup %6956 }
0x1b86   :  { %v1351_v20 = vadd.f32 1.0, %v6957_v19 }
0x1b88   :  { %6958 = vrcp.f32 %v1351_v20 }
0x1b95   :  { %v6959_v21 = vpop.eup %6958 }
0x1b96   :  { %v1365_v27 = vsub.f32 1.0, %v6959_v21  ;;  %v1371_v29 = vmul.f32 %v6959_v21, %v7614_v57 }
0x1be6   :  { %v1356_v22 = vpop.permute.xlu1 %1355 }
0x1be7   :  { %v1358_v23 = vmul.f32 %v6959_v21, %v1356_v22 }
0x1be9   :  { %1360 = vrot.lane.b32.xlu1 %v1358_v23, %s7215_s26 }
0x1c5b   :  { %v1361_v24 = vpop.permute.xlu1 %1360 }
0x1c5c   :  { %v1363_v25 = vadd.f32 %v1361_v24, %v1062_v15 }
0x1c5e   :  { %6960 = vtanh.f32 %v1363_v25 }
0x1c6b   :  { %v6961_v26 = vpop.eup %6960 }
0x1c6c   :  { %1367 = vrot.lane.b32.xlu1 %v6961_v26, %s7216_s5 }
0x1cde   :  { %v1368_v28 = vpop.permute.xlu1 %1367 }
0x1cdf   :  { %v1370_v30 = vmul.f32 %v1368_v28, %v1365_v27 }
0x1ce1   :  { %v7637_v4 = vadd.f32 %v1371_v29, %v1370_v30 }
0x1ce3   :  { %1374 = vrot.lane.b32.xlu1 %v7637_v4, %s7216_s5 }
0x1d55   :  { %v1375_v32 = vpop.permute.xlu1 %1374 }
0x1d56   :  { %6658 = vmatmul.mubr.msk.f32.vlgmr.msra.gmra.mxu1 %vm192_vm1, %v1375_v32 }
0x1d57   :  { %6672 = vmatpush3.msra.mxu1 %v7511_v38  ;;  %6679 = vmatprep.mubr.msk.f32.mxu1 %vm7214_vm0, %v7213_v1 }
0x1d58   :  { %6673 = vmatprep.subr.mxu1 %v7213_v1 }
0x1d59   :  { %6674 = vmatpush3.msra.mxu1 %v7513_v39 }
0x1d5a   :  { %6675 = vmatprep.subr.mxu1 %v7213_v1 }
0x1d5b   :  { %6676 = vmatpush3.msra.mxu1 %v7518_v14 }
0x1d5c   :  { %6677 = vmatprep.subr.mxu1 %v7213_v1 }
0x1d5d   :  { %6678 = vmatpush3.msra.mxu1 %v7524_v41 }
0x1d5e   :  { %6693 = vmatprep.subr.mxu1 %v7213_v1 }
0x1e16   :  { %v1444_v5 = vpop.f32.mrf.mxu1 }
0x1e17   :  { %v1445_v34 = vadd.f32 %v7572_v58, %v1444_v5 }
0x1e18   :  { %v6659_v7 = vpop.f32.mrf.mxu1 }
0x1e19   :  { %1456 = vrot.lane.b32.xlu1 %v1445_v34, %s7215_s26  ;;  %v1448_v10 = vadd.f32 %v1445_v34, %v1061_v37 }
0x1e1b   :  { %v6307_v9 = vmul.f32 -1.442695, %v1448_v10  ;;  %v1052_v10 = vmul.f32 %v7579_v63, %v7429_v36 }
0x1e1d   :  { %6962 = vpow2.f32 %v6307_v9 }
0x1e2a   :  { %v6963_v17 = vpop.eup %6962 }
0x1e2b   :  { %v1452_v42 = vadd.f32 1.0, %v6963_v17 }
0x1e2d   :  { %6964 = vrcp.f32 %v1452_v42 }
0x1e3a   :  { %v6965_v43 = vpop.eup %6964 }
0x1e3b   :  { %v1466_v52 = vsub.f32 1.0, %v6965_v43  ;;  %v1472_v55 = vmul.f32 %v6965_v43, %v7637_v4 }
0x1e8b   :  { %v1457_v44 = vpop.permute.xlu1 %1456 }
0x1e8c   :  { %v1459_v45 = vmul.f32 %v6965_v43, %v1457_v44 }
0x1e8e   :  { %1461 = vrot.lane.b32.xlu1 %v1459_v45, %s7215_s26 }
0x1f00   :  { %v1462_v46 = vpop.permute.xlu1 %1461 }
0x1f01   :  { %v1464_v49 = vadd.f32 %v1462_v46, %v1061_v37 }
0x1f03   :  { %6966 = vtanh.f32 %v1464_v49 }
0x1f10   :  { %v6967_v51 = vpop.eup %6966 }
0x1f11   :  { %1468 = vrot.lane.b32.xlu0 %v6967_v51, %s7216_s5  ;;  %v6321_v51 = vld [vmem:[%s9467_s10 + $0x1] ss:$0 sm:$0xff] }
0x1f83   :  { %v1469_v54 = vpop.permute.xlu0 %1468 }
0x1f84   :  { %v1471_v59 = vmul.f32 %v1469_v54, %v1466_v52 }
0x1f86   :  { %v7660_v60 = vadd.f32 %v1472_v55, %v1471_v59 }
0x1f88   :  { %1475 = vrot.lane.b32.xlu1 %v7660_v60, %s7216_s5 }
0x1ffa   :  { %v1476_v62 = vpop.permute.xlu1 %1475 }
0x1ffb   :  { %6669 = vmatmul.mubr.msk.f32.vlgmr.msra.gmra.mxu0 %vm192_vm1, %v1476_v62 }
0x1ffc   :  { %6683 = vmatpush3.msra.mxu0 %v7511_v38  ;;  %6690 = vmatprep.mubr.msk.f32.mxu0 %vm7214_vm0, %v7213_v1 }
0x1ffd   :  { %6684 = vmatprep.subr.mxu0 %v7213_v1 }
0x1ffe   :  { %6685 = vmatpush3.msra.mxu0 %v7513_v39 }
0x1fff   :  { %6686 = vmatprep.subr.mxu0 %v7213_v1 }
0x2000   :  { %6687 = vmatpush3.msra.mxu0 %v7518_v14 }
0x2001   :  { %6688 = vmatprep.subr.mxu0 %v7213_v1 }
0x2002   :  { %6689 = vmatpush3.msra.mxu0 %v7524_v41 }
0x2003   :  { %6704 = vmatprep.subr.mxu0 %v7213_v1 }
0x20bb   :  { %v1545_v11 = vpop.f32.mrf.mxu0 }
0x20bc   :  { %v1546_v12 = vadd.f32 %v7572_v58, %v1545_v11 }
0x20bd   :  { %v6670_v15 = vpop.f32.mrf.mxu0 }
0x20be   :  { %1557 = vrot.lane.b32.xlu0 %v1546_v12, %s7215_s26  ;;  %v1549_v19 = vadd.f32 %v1546_v12, %v1060_v18  ;;  %v7719_v15 = vld [vmem:[#allocation8 + $0x38] sm:$0xff] }
0x20c0   :  { %v6309_v20 = vmul.f32 -1.442695, %v1549_v19  ;;  %v7728_v19 = vld [vmem:[#allocation8 + $0x28] sm:$0xff] }
0x20c2   :  { %6968 = vpow2.f32 %v6309_v20 }
0x20cf   :  { %v6969_v21 = vpop.eup %6968 }
0x20d0   :  { %v1553_v22 = vadd.f32 1.0, %v6969_v21 }
0x20d2   :  { %6970 = vrcp.f32 %v1553_v22  ;;  %v7733_v22 = vld [vmem:[#allocation8 + $0x20] sm:$0xff] }
0x20df   :  { %v6971_v23 = vpop.eup %6970 }
0x20e0   :  { %v1567_v29 = vsub.f32 1.0, %v6971_v23  ;;  %v1573_v32 = vmul.f32 %v6971_v23, %v7660_v60 }
0x2130   :  { %v1558_v24 = vpop.permute.xlu0 %1557 }
0x2131   :  { %v1560_v25 = vmul.f32 %v6971_v23, %v1558_v24  ;;  %v6322_v23 = vld [vmem:[%s9468_s11 + $0x1] ss:$0 sm:$0xff] }
0x2133   :  { %1562 = vrot.lane.b32.xlu1 %v1560_v25, %s7215_s26 }
0x21a5   :  { %v1563_v26 = vpop.permute.xlu1 %1562 }
0x21a6   :  { %v1565_v27 = vadd.f32 %v1563_v26, %v1060_v18  ;;  %v7722_v18 = vld [vmem:[#allocation8 + $0x30] sm:$0xff] }
0x21a8   :  { %6972 = vtanh.f32 %v1565_v27 }
0x21b5   :  { %v6973_v28 = vpop.eup %6972 }
0x21b6   :  { %1569 = vrot.lane.b32.xlu0 %v6973_v28, %s7216_s5 }
0x2228   :  { %v1570_v30 = vpop.permute.xlu0 %1569 }
0x2229   :  { %v1572_v5 = vmul.f32 %v1570_v30, %v1567_v29  ;;  %v7759_v29 = vld [vmem:[%s9466_s9 + $0x1] ss:$0 sm:$0xff] }
0x222b   :  { %v7683_v34 = vadd.f32 %v1573_v32, %v1572_v5 }
0x222d   :  { %1576 = vrot.lane.b32.xlu1 %v7683_v34, %s7216_s5 }
0x229f   :  { %v1577_v7 = vpop.permute.xlu1 %1576 }
0x22a0   :  { %6680 = vmatmul.mubr.msk.f32.vlgmr.msra.gmra.mxu1 %vm192_vm1, %v1577_v7  ;;  %v1051_v7 = vmul.f32 %v7579_v63, %v7406_v8 }
0x22a1   :  { %6694 = vmatpush3.msra.mxu1 %v7511_v38  ;;  %6701 = vmatprep.mubr.msk.f32.mxu1 %vm7214_vm0, %v7213_v1 }
0x22a2   :  { %6695 = vmatprep.subr.mxu1 %v7213_v1 }
0x22a3   :  { %6696 = vmatpush3.msra.mxu1 %v7513_v39  ;;  %v1059_v39 = vadd.f32 %v7585_v13, %v1052_v10 }
0x22a4   :  { %6697 = vmatprep.subr.mxu1 %v7213_v1 }
0x22a5   :  { %6698 = vmatpush3.msra.mxu1 %v7518_v14 }
0x22a6   :  { %6699 = vmatprep.subr.mxu1 %v7213_v1 }
0x22a7   :  { %6700 = vmatpush3.msra.mxu1 %v7524_v41 }
0x22a8   :  { %6715 = vmatprep.subr.mxu1 %v7213_v1 }
0x2360   :  { %v1646_v35 = vpop.f32.mrf.mxu1 }
0x2361   :  { %v1647_v38 = vadd.f32 %v7572_v58, %v1646_v35  ;;  %v1058_v35 = vadd.f32 %v7585_v13, %v1051_v7 }
0x2362   :  { %v6681_v37 = vpop.f32.mrf.mxu1 }
0x2363   :  { %1658 = vrot.lane.b32.xlu0 %v1647_v38, %s7215_s26  ;;  %v1650_v9 = vadd.f32 %v1647_v38, %v1059_v39  ;;  %v7769_v38 = vld [vmem:[%s9463_s6 + $0x1] ss:$0 sm:$0xff] }
0x2365   :  { %v6311_v17 = vmul.f32 -1.442695, %v1650_v9 }
0x2367   :  { %6974 = vpow2.f32 %v6311_v17 }
0x2374   :  { %v6975_v14 = vpop.eup %6974 }
0x2375   :  { %v1654_v42 = vadd.f32 1.0, %v6975_v14 }
0x2377   :  { %6976 = vrcp.f32 %v1654_v42 }
0x2384   :  { %v6977_v41 = vpop.eup %6976 }
0x2385   :  { %v1668_v52 = vsub.f32 1.0, %v6977_v41  ;;  %v1674_v55 = vmul.f32 %v6977_v41, %v7683_v34 }
0x23d5   :  { %v1659_v43 = vpop.permute.xlu0 %1658 }
0x23d6   :  { %v1661_v44 = vmul.f32 %v6977_v41, %v1659_v43 }
0x23d8   :  { %1663 = vrot.lane.b32.xlu1 %v1661_v44, %s7215_s26 }
0x244a   :  { %v1664_v45 = vpop.permute.xlu1 %1663 }
0x244b   :  { %v1666_v46 = vadd.f32 %v1664_v45, %v1059_v39  ;;  %v7775_v39 = vld [vmem:[%s9464_s7 + $0x1] ss:$0 sm:$0xff] }
0x244d   :  { %6978 = vtanh.f32 %v1666_v46 }
0x245a   :  { %v6979_v49 = vpop.eup %6978 }
0x245b   :  { %1670 = vrot.lane.b32.xlu0 %v6979_v49, %s7216_s5 }
0x245f   :  { %2782 = vrot.lane.b32.xlu0 %v6321_v51, %s7217_s29 }
0x24cd   :  { %v1671_v54 = vpop.permute.xlu0 %1670 }
0x24ce   :  { %v1673_v59 = vmul.f32 %v1671_v54, %v1668_v52 }
0x24d0   :  { %v7710_v62 = vadd.f32 %v1674_v55, %v1673_v59 }
0x24d1   :  { %v7712_v11 = vpop.permute.xlu0 %2782 }
0x24d2   :  { %9517 = vst [vmem:[#allocation17_spill] sm:$0xff] %v7712_v11  ;;  %1677 = vrot.lane.b32.xlu1 %v7710_v62, %s7216_s5  ;;  %v2785_v12 = vmul.f32 %v7712_v11, %v7540_v47 }
0x24d6   :  { %2787 = vrot.lane.b32.xlu1 %v2785_v12, %s7216_s5 }
0x2544   :  { %v1678_v16 = vpop.permute.xlu1 %1677 }
0x2545   :  { %6691 = vmatmul.mubr.msk.f32.vlgmr.msra.gmra.mxu0 %vm192_vm1, %v1678_v16 }
0x2546   :  { %6705 = vmatpush3.msra.mxu0 %v7719_v15  ;;  %6712 = vmatprep.mubr.msk.f32.mxu0 %vm7214_vm0, %v7213_v1 }
0x2547   :  { %6706 = vmatprep.subr.mxu0 %v7213_v1 }
0x2548   :  { %6707 = vmatpush3.msra.mxu0 %v7722_v18  ;;  %v2788_v20 = vpop.permute.xlu1 %2787 }
0x2549   :  { %6708 = vmatprep.subr.mxu0 %v7213_v1  ;;  %v2790_v21 = vsel %vm192_vm1, %v2788_v20, 0.0 }
0x254a   :  { %6709 = vmatpush3.msra.mxu0 %v7728_v19  ;;  %2791 = vadd.xlane.f32.xlu0 %v2790_v21 }
0x254b   :  { %6710 = vmatprep.subr.mxu0 %v7213_v1 }
0x254c   :  { %6711 = vmatpush3.msra.mxu0 %v7733_v22 }
0x254d   :  { %6713 = vmatmul.mubr.msk.f32.vlgmr.msra.gmra.mxu0 %vm192_vm1, %v7549_v50  ;;  %6726 = vmatprep.subr.mxu0 %v7213_v1 }
0x254e   :  { %6727 = vmatpush3.msra.mxu0 %v7719_v15  ;;  %6734 = vmatprep.mubr.msk.f32.mxu0 %vm7214_vm0, %v7213_v1 }
0x254f   :  { %6728 = vmatprep.subr.mxu0 %v7213_v1 }
0x2550   :  { %6729 = vmatpush3.msra.mxu0 %v7722_v18 }
0x2551   :  { %6730 = vmatprep.subr.mxu0 %v7213_v1 }
0x2552   :  { %6731 = vmatpush3.msra.mxu0 %v7728_v19 }
0x2553   :  { %6732 = vmatprep.subr.mxu0 %v7213_v1 }
0x2554   :  { %6733 = vmatpush3.msra.mxu0 %v7733_v22 }
0x2555   :  { %6748 = vmatprep.subr.mxu0 %v7213_v1 }
0x25d3   :  { %v2792_v24 = vpop.xlane.xlu0 %2791 }
0x25d4   :  { %v2799_v25 = vadd.f32 %v6322_v23, %v2792_v24 }
0x25d6   :  { %2802 = vperm.xlu1 %6894, %v2799_v25  }
0x2605   :  { %v1747_v26 = vpop.f32.mrf.mxu0 }
0x2606   :  { %v1748_v27 = vadd.f32 %v7572_v58, %v1747_v26 }
0x2607   :  { %v6692_v28 = vpop.f32.mrf.mxu0 }
0x2608   :  { %1759 = vrot.lane.b32.xlu1 %v1748_v27, %s7215_s26  ;;  %v1751_v58 = vadd.f32 %v1748_v27, %v1058_v35 }
0x260a   :  { %v6313_v9 = vmul.f32 -1.442695, %v1751_v58 }
0x260c   :  { %6980 = vpow2.f32 %v6313_v9 }
0x260d   :  { %v2905_v30 = vpop.f32.mrf.mxu0 }
0x260e   :  { %v2906_v32 = vadd.f32 %v7759_v29, %v2905_v30 }
0x260f   :  { %v6714_v5 = vpop.f32.mrf.mxu0 }
0x2610   :  { %2917 = vrot.lane.b32.xlu1 %v2906_v32, %s7215_s26 }
0x2619   :  { %v6981_v14 = vpop.eup %6980 }
0x261a   :  { %v1755_v42 = vadd.f32 1.0, %v6981_v14 }
0x2651   :  { %v2803_v37 = vpop.permute.xlu1 %2802 }
0x2652   :  { %v2811_v10 = vmul.f32 %v7769_v38, %v2803_v37 }
0x2654   :  { %v2818_v17 = vadd.f32 %v7775_v39, %v2811_v10 }
0x2656   :  { %v2909_v63 = vadd.f32 %v2906_v32, %v2818_v17 }
0x2658   :  { %v6327_v13 = vmul.f32 -1.442695, %v2909_v63  ;;  %v2825_v63 = vmul.f32 %v7769_v38, %v7505_v6 }
0x265a   :  { %6982 = vpow2.f32 %v6327_v13  ;;  %v2832_v13 = vadd.f32 %v7775_v39, %v2825_v63 }
0x265b   :  { %6984 = vrcp.f32 %v1755_v42 }
0x2667   :  { %v6983_v41 = vpop.eup %6982 }
0x2668   :  { %v2913_v43 = vadd.f32 1.0, %v6983_v41  ;;  %v6985_v44 = vpop.eup %6984 }
0x2669   :  { %v1769_v21 = vsub.f32 1.0, %v6985_v44  ;;  %v1775_v24 = vmul.f32 %v6985_v44, %v7710_v62 }
0x266a   :  { %6986 = vrcp.f32 %v2913_v43 }
0x2677   :  { %v6987_v49 = vpop.eup %6986 }
0x2678   :  { %v2927_v27 = vsub.f32 1.0, %v6987_v49  ;;  %v2933_v30 = vmul.f32 %v6987_v49, %v7540_v47 }
0x267a   :  { %v1760_v45 = vpop.permute.xlu1 %1759 }
0x267b   :  { %v1762_v46 = vmul.f32 %v6985_v44, %v1760_v45 }
0x267d   :  { %1764 = vrot.lane.b32.xlu1 %v1762_v46, %s7215_s26 }
0x2682   :  { %v2918_v51 = vpop.permute.xlu1 %2917 }
0x2683   :  { %v2920_v52 = vmul.f32 %v6987_v49, %v2918_v51 }
0x2685   :  { %2922 = vrot.lane.b32.xlu1 %v2920_v52, %s7215_s26 }
0x26ef   :  { %v1765_v54 = vpop.permute.xlu1 %1764 }
0x26f0   :  { %v1767_v55 = vadd.f32 %v1765_v54, %v1058_v35 }
0x26f2   :  { %6988 = vtanh.f32 %v1767_v55 }
0x26f7   :  { %v2923_v59 = vpop.permute.xlu1 %2922 }
0x26f8   :  { %v2925_v12 = vadd.f32 %v2923_v59, %v2818_v17 }
0x26fa   :  { %6990 = vtanh.f32 %v2925_v12 }
0x26ff   :  { %v6989_v16 = vpop.eup %6988 }
0x2700   :  { %1771 = vrot.lane.b32.xlu1 %v6989_v16, %s7216_s5 }
0x2707   :  { %v6991_v20 = vpop.eup %6990 }
0x2708   :  { %2929 = vrot.lane.b32.xlu1 %v6991_v20, %s7216_s5 }
0x2772   :  { %v1772_v23 = vpop.permute.xlu1 %1771 }
0x2773   :  { %v1774_v25 = vmul.f32 %v1772_v23, %v1769_v21 }
0x2775   :  { %v7783_v26 = vadd.f32 %v1775_v24, %v1774_v25  ;;  %v2824_v25 = vmul.f32 %v7769_v38, %v7490_v56 }
0x2777   :  { %1778 = vrot.lane.b32.xlu0 %v7783_v26, %s7216_s5 }
0x277a   :  { %v2930_v28 = vpop.permute.xlu1 %2929 }
0x277b   :  { %v2932_v32 = vmul.f32 %v2930_v28, %v2927_v27  ;;  %v2831_v27 = vadd.f32 %v7775_v39, %v2824_v25 }
0x277d   :  { %v7788_v5 = vadd.f32 %v2933_v30, %v2932_v32 }
0x277f   :  { %9518 = vst [vmem:[#allocation18_spill] sm:$0xff] %v7788_v5  ;;  %2936 = vrot.lane.b32.xlu1 %v7788_v5, %s7216_s5 }
0x27e9   :  { %v1779_v7 = vpop.permute.xlu0 %1778 }
0x27ea   :  { %6702 = vmatmul.mubr.msk.f32.vlgmr.msra.gmra.mxu1 %vm192_vm1, %v1779_v7 }
0x27eb   :  { %6716 = vmatpush3.msra.mxu1 %v7719_v15  ;;  %6723 = vmatprep.mubr.msk.f32.mxu1 %vm7214_vm0, %v7213_v1 }
0x27ec   :  { %6717 = vmatprep.subr.mxu1 %v7213_v1 }
0x27ed   :  { %6718 = vmatpush3.msra.mxu1 %v7722_v18 }
0x27ee   :  { %6719 = vmatprep.subr.mxu1 %v7213_v1 }
0x27ef   :  { %6720 = vmatpush3.msra.mxu1 %v7728_v19 }
0x27f0   :  { %6721 = vmatprep.subr.mxu1 %v7213_v1 }
0x27f1   :  { %6722 = vmatpush3.msra.mxu1 %v7733_v22  ;;  %v2937_v35 = vpop.permute.xlu1 %2936 }
0x27f2   :  { %6737 = vmatprep.subr.mxu1 %v7213_v1  ;;  %6724 = vmatmul.mubr.msk.f32.vlgmr.msra.gmra.mxu1 %vm192_vm1, %v2937_v35 }
0x27f3   :  { %6738 = vmatpush3.msra.mxu1 %v7719_v15  ;;  %6745 = vmatprep.mubr.msk.f32.mxu1 %vm7214_vm0, %v7213_v1 }
0x27f4   :  { %6739 = vmatprep.subr.mxu1 %v7213_v1 }
0x27f5   :  { %6740 = vmatpush3.msra.mxu1 %v7722_v18 }
0x27f6   :  { %6741 = vmatprep.subr.mxu1 %v7213_v1 }
0x27f7   :  { %6742 = vmatpush3.msra.mxu1 %v7728_v19 }
0x27f8   :  { %6743 = vmatprep.subr.mxu1 %v7213_v1 }
0x27f9   :  { %6744 = vmatpush3.msra.mxu1 %v7733_v22 }
0x27fa   :  { %6759 = vmatprep.subr.mxu1 %v7213_v1 }
0x28aa   :  { %v7814_v58 = vpop.f32.mrf.mxu1 }
0x28ac   :  { %v6703_v37 = vpop.f32.mrf.mxu1 }
0x28b2   :  { %v3006_v10 = vpop.f32.mrf.mxu1 }
0x28b3   :  { %v3007_v9 = vadd.f32 %v7759_v29, %v3006_v10 }
0x28b4   :  { %v6725_v17 = vpop.f32.mrf.mxu1 }
0x28b5   :  { %3018 = vrot.lane.b32.xlu1 %v3007_v9, %s7215_s26  ;;  %v3010_v14 = vadd.f32 %v3007_v9, %v2832_v13 }
0x28b7   :  { %v6329_v42 = vmul.f32 -1.442695, %v3010_v14 }
0x28b9   :  { %6992 = vpow2.f32 %v6329_v42 }
0x28c6   :  { %v6993_v41 = vpop.eup %6992 }
0x28c7   :  { %v3014_v43 = vadd.f32 1.0, %v6993_v41 }
0x28c9   :  { %6994 = vrcp.f32 %v3014_v43 }
0x28d6   :  { %v6995_v44 = vpop.eup %6994 }
0x28d7   :  { %v3028_v54 = vsub.f32 1.0, %v6995_v44  ;;  %v3034_v59 = vmul.f32 %v6995_v44, %v7788_v5 }
0x2927   :  { %v3019_v45 = vpop.permute.xlu1 %3018 }
0x2928   :  { %v3021_v46 = vmul.f32 %v6995_v44, %v3019_v45 }
0x292a   :  { %3023 = vrot.lane.b32.xlu1 %v3021_v46, %s7215_s26 }
0x299c   :  { %v3024_v49 = vpop.permute.xlu1 %3023 }
0x299d   :  { %v3026_v51 = vadd.f32 %v3024_v49, %v2832_v13 }
0x299f   :  { %6996 = vtanh.f32 %v3026_v51  ;;  %v2823_v51 = vmul.f32 %v7769_v38, %v7475_v33 }
0x29ac   :  { %v6997_v52 = vpop.eup %6996 }
0x29ad   :  { %3030 = vrot.lane.b32.xlu1 %v6997_v52, %s7216_s5  ;;  %v2830_v52 = vadd.f32 %v7775_v39, %v2823_v51 }
0x2a1f   :  { %v3031_v55 = vpop.permute.xlu1 %3030 }
0x2a20   :  { %v3033_v12 = vmul.f32 %v3031_v55, %v3028_v54 }
0x2a22   :  { %v7824_v16 = vadd.f32 %v3034_v59, %v3033_v12 }
0x2a24   :  { %9519 = vst [vmem:[#allocation19_spill] sm:$0xff] %v7824_v16  ;;  %3037 = vrot.lane.b32.xlu1 %v7824_v16, %s7216_s5 }
0x2a96   :  { %v3038_v20 = vpop.permute.xlu1 %3037 }
0x2a97   :  { %6735 = vmatmul.mubr.msk.f32.vlgmr.msra.gmra.mxu0 %vm192_vm1, %v3038_v20 }
0x2a98   :  { %6749 = vmatpush3.msra.mxu0 %v7719_v15  ;;  %6756 = vmatprep.mubr.msk.f32.mxu0 %vm7214_vm0, %v7213_v1 }
0x2a99   :  { %6750 = vmatprep.subr.mxu0 %v7213_v1 }
0x2a9a   :  { %6751 = vmatpush3.msra.mxu0 %v7722_v18 }
0x2a9b   :  { %6752 = vmatprep.subr.mxu0 %v7213_v1 }
0x2a9c   :  { %6753 = vmatpush3.msra.mxu0 %v7728_v19 }
0x2a9d   :  { %6754 = vmatprep.subr.mxu0 %v7213_v1 }
0x2a9e   :  { %6755 = vmatpush3.msra.mxu0 %v7733_v22 }
0x2a9f   :  { %6770 = vmatprep.subr.mxu0 %v7213_v1 }
0x2b57   :  { %v3107_v21 = vpop.f32.mrf.mxu0 }
0x2b58   :  { %v3108_v23 = vadd.f32 %v7759_v29, %v3107_v21 }
0x2b59   :  { %v6736_v24 = vpop.f32.mrf.mxu0 }
0x2b5a   :  { %3119 = vrot.lane.b32.xlu1 %v3108_v23, %s7215_s26  ;;  %v3111_v28 = vadd.f32 %v3108_v23, %v2831_v27 }
0x2b5c   :  { %v6331_v30 = vmul.f32 -1.442695, %v3111_v28 }
0x2b5e   :  { %6998 = vpow2.f32 %v6331_v30 }
0x2b6b   :  { %v6999_v32 = vpop.eup %6998 }
0x2b6c   :  { %v3115_v7 = vadd.f32 1.0, %v6999_v32 }
0x2b6e   :  { %7000 = vrcp.f32 %v3115_v7 }
0x2b7b   :  { %v7001_v35 = vpop.eup %7000 }
0x2b7c   :  { %v3129_v13 = vsub.f32 1.0, %v7001_v35  ;;  %v3135_v42 = vmul.f32 %v7001_v35, %v7824_v16 }
0x2bcc   :  { %v3120_v37 = vpop.permute.xlu1 %3119 }
0x2bcd   :  { %v3122_v10 = vmul.f32 %v7001_v35, %v3120_v37 }
0x2bcf   :  { %3124 = vrot.lane.b32.xlu0 %v3122_v10, %s7215_s26 }
0x2c41   :  { %v3125_v9 = vpop.permute.xlu0 %3124 }
0x2c42   :  { %v3127_v17 = vadd.f32 %v3125_v9, %v2831_v27 }
0x2c44   :  { %7002 = vtanh.f32 %v3127_v17 }
0x2c51   :  { %v7003_v63 = vpop.eup %7002 }
0x2c52   :  { %3131 = vrot.lane.b32.xlu1 %v7003_v63, %s7216_s5  ;;  %v2822_v63 = vmul.f32 %v7769_v38, %v7452_v61 }
0x2cc4   :  { %v3132_v14 = vpop.permute.xlu1 %3131 }
0x2cc5   :  { %v3134_v41 = vmul.f32 %v3132_v14, %v3129_v13  ;;  %v2829_v13 = vadd.f32 %v7775_v39, %v2822_v63  ;;  %v6347_v63 = vld [vmem:[%s9467_s10 + $0x2] ss:$0 sm:$0xff] }
0x2cc7   :  { %v7847_v43 = vadd.f32 %v3135_v42, %v3134_v41 }
0x2cc9   :  { %9520 = vst [vmem:[#allocation20_spill] sm:$0xff] %v7847_v43  ;;  %3138 = vrot.lane.b32.xlu0 %v7847_v43, %s7216_s5 }
0x2d3b   :  { %v3139_v44 = vpop.permute.xlu0 %3138 }
0x2d3c   :  { %6746 = vmatmul.mubr.msk.f32.vlgmr.msra.gmra.mxu1 %vm192_vm1, %v3139_v44 }
0x2d3d   :  { %6760 = vmatpush3.msra.mxu1 %v7719_v15  ;;  %6767 = vmatprep.mubr.msk.f32.mxu1 %vm7214_vm0, %v7213_v1 }
0x2d3e   :  { %6761 = vmatprep.subr.mxu1 %v7213_v1 }
0x2d3f   :  { %6762 = vmatpush3.msra.mxu1 %v7722_v18 }
0x2d40   :  { %6763 = vmatprep.subr.mxu1 %v7213_v1 }
0x2d41   :  { %6764 = vmatpush3.msra.mxu1 %v7728_v19 }
0x2d42   :  { %6765 = vmatprep.subr.mxu1 %v7213_v1 }
0x2d43   :  { %6766 = vmatpush3.msra.mxu1 %v7733_v22 }
0x2d44   :  { %6781 = vmatprep.subr.mxu1 %v7213_v1 }
0x2dfc   :  { %v3208_v45 = vpop.f32.mrf.mxu1 }
0x2dfd   :  { %v3209_v46 = vadd.f32 %v7759_v29, %v3208_v45 }
0x2dfe   :  { %v6747_v49 = vpop.f32.mrf.mxu1 }
0x2dff   :  { %3220 = vrot.lane.b32.xlu1 %v3209_v46, %s7215_s26  ;;  %v3212_v54 = vadd.f32 %v3209_v46, %v2830_v52 }
0x2e01   :  { %v6333_v55 = vmul.f32 -1.442695, %v3212_v54 }
0x2e03   :  { %7004 = vpow2.f32 %v6333_v55 }
0x2e10   :  { %v7005_v59 = vpop.eup %7004 }
0x2e11   :  { %v3216_v12 = vadd.f32 1.0, %v7005_v59 }
0x2e13   :  { %7006 = vrcp.f32 %v3216_v12 }
0x2e20   :  { %v7007_v20 = vpop.eup %7006 }
0x2e21   :  { %v3230_v28 = vsub.f32 1.0, %v7007_v20  ;;  %v3236_v32 = vmul.f32 %v7007_v20, %v7847_v43 }
0x2e71   :  { %v3221_v21 = vpop.permute.xlu1 %3220 }
0x2e72   :  { %v3223_v23 = vmul.f32 %v7007_v20, %v3221_v21 }
0x2e74   :  { %3225 = vrot.lane.b32.xlu0 %v3223_v23, %s7215_s26 }
0x2ee6   :  { %v3226_v24 = vpop.permute.xlu0 %3225 }
0x2ee7   :  { %v3228_v25 = vadd.f32 %v3226_v24, %v2830_v52 }
0x2ee9   :  { %7008 = vtanh.f32 %v3228_v25 }
0x2ef6   :  { %v7009_v27 = vpop.eup %7008 }
0x2ef7   :  { %3232 = vrot.lane.b32.xlu1 %v7009_v27, %s7216_s5  ;;  %v2821_v27 = vmul.f32 %v7769_v38, %v7429_v36 }
0x2f69   :  { %v3233_v30 = vpop.permute.xlu1 %3232 }
0x2f6a   :  { %v3235_v7 = vmul.f32 %v3233_v30, %v3230_v28 }
0x2f6c   :  { %v7870_v35 = vadd.f32 %v3236_v32, %v3235_v7 }
0x2f6e   :  { %9521 = vst [vmem:[#allocation21_spill] sm:$0xff] %v7870_v35  ;;  %3239 = vrot.lane.b32.xlu0 %v7870_v35, %s7216_s5 }
0x2fe0   :  { %v3240_v37 = vpop.permute.xlu0 %3239 }
0x2fe1   :  { %6757 = vmatmul.mubr.msk.f32.vlgmr.msra.gmra.mxu0 %vm192_vm1, %v3240_v37 }
0x2fe2   :  { %6771 = vmatpush3.msra.mxu0 %v7719_v15  ;;  %6778 = vmatprep.mubr.msk.f32.mxu0 %vm7214_vm0, %v7213_v1 }
0x2fe3   :  { %6772 = vmatprep.subr.mxu0 %v7213_v1 }
0x2fe4   :  { %6773 = vmatpush3.msra.mxu0 %v7722_v18 }
0x2fe5   :  { %6774 = vmatprep.subr.mxu0 %v7213_v1 }
0x2fe6   :  { %6775 = vmatpush3.msra.mxu0 %v7728_v19 }
0x2fe7   :  { %6776 = vmatprep.subr.mxu0 %v7213_v1 }
0x2fe8   :  { %6777 = vmatpush3.msra.mxu0 %v7733_v22 }
0x2fe9   :  { %6792 = vmatprep.subr.mxu0 %v7213_v1 }
0x30a1   :  { %v3309_v10 = vpop.f32.mrf.mxu0 }
0x30a2   :  { %v3310_v9 = vadd.f32 %v7759_v29, %v3309_v10 }
0x30a3   :  { %v6758_v17 = vpop.f32.mrf.mxu0 }
0x30a4   :  { %3321 = vrot.lane.b32.xlu1 %v3310_v9, %s7215_s26  ;;  %v3313_v14 = vadd.f32 %v3310_v9, %v2829_v13 }
0x30a6   :  { %v6335_v42 = vmul.f32 -1.442695, %v3313_v14 }
0x30a8   :  { %7010 = vpow2.f32 %v6335_v42 }
0x30b5   :  { %v7011_v41 = vpop.eup %7010 }
0x30b6   :  { %v3317_v44 = vadd.f32 1.0, %v7011_v41 }
0x30b8   :  { %7012 = vrcp.f32 %v3317_v44 }
0x30c5   :  { %v7013_v45 = vpop.eup %7012 }
0x30c6   :  { %v3331_v55 = vsub.f32 1.0, %v7013_v45  ;;  %v3337_v12 = vmul.f32 %v7013_v45, %v7870_v35 }
0x3116   :  { %v3322_v46 = vpop.permute.xlu1 %3321 }
0x3117   :  { %v3324_v49 = vmul.f32 %v7013_v45, %v3322_v46 }
0x3119   :  { %3326 = vrot.lane.b32.xlu0 %v3324_v49, %s7215_s26  ;;  %v7929_v49 = vld [vmem:[#allocation8 + $0x58] sm:$0xff] }
0x318b   :  { %v3327_v51 = vpop.permute.xlu0 %3326 }
0x318c   :  { %v3329_v52 = vadd.f32 %v3327_v51, %v2829_v13 }
0x318e   :  { %7014 = vtanh.f32 %v3329_v52  ;;  %v7932_v52 = vld [vmem:[#allocation8 + $0x50] sm:$0xff] }
0x319b   :  { %v7015_v54 = vpop.eup %7014 }
0x319c   :  { %3333 = vrot.lane.b32.xlu1 %v7015_v54, %s7216_s5  ;;  %v7938_v54 = vld [vmem:[#allocation8 + $0x48] sm:$0xff] }
0x320e   :  { %v3334_v59 = vpop.permute.xlu1 %3333 }
0x320f   :  { %v3336_v20 = vmul.f32 %v3334_v59, %v3331_v55 }
0x3211   :  { %v7893_v21 = vadd.f32 %v3337_v12, %v3336_v20  ;;  %v7943_v12 = vld [vmem:[#allocation8 + $0x40] sm:$0xff] }
0x3213   :  { %9522 = vst [vmem:[#allocation22_spill] sm:$0xff] %v7893_v21  ;;  %3340 = vrot.lane.b32.xlu0 %v7893_v21, %s7216_s5 }
0x3285   :  { %v3341_v23 = vpop.permute.xlu0 %3340 }
0x3286   :  { %6768 = vmatmul.mubr.msk.f32.vlgmr.msra.gmra.mxu1 %vm192_vm1, %v3341_v23 }
0x3287   :  { %6782 = vmatpush3.msra.mxu1 %v7719_v15  ;;  %6789 = vmatprep.mubr.msk.f32.mxu1 %vm7214_vm0, %v7213_v1 }
0x3288   :  { %6783 = vmatprep.subr.mxu1 %v7213_v1 }
0x3289   :  { %6784 = vmatpush3.msra.mxu1 %v7722_v18  ;;  %v2828_v18 = vadd.f32 %v7775_v39, %v2821_v27  ;;  %v7969_v27 = vld [vmem:[%s9466_s9 + $0x2] ss:$0 sm:$0xff] }
0x328a   :  { %6785 = vmatprep.subr.mxu1 %v7213_v1 }
0x328b   :  { %6786 = vmatpush3.msra.mxu1 %v7728_v19 }
0x328c   :  { %6787 = vmatprep.subr.mxu1 %v7213_v1 }
0x328d   :  { %6788 = vmatpush3.msra.mxu1 %v7733_v22 }
0x328e   :  { %6803 = vmatprep.subr.mxu1 %v7213_v1 }
0x3346   :  { %v3410_v24 = vpop.f32.mrf.mxu1 }
0x3347   :  { %v3411_v15 = vadd.f32 %v7759_v29, %v3410_v24 }
0x3348   :  { %v6769_v25 = vpop.f32.mrf.mxu1 }
0x3349   :  { %3422 = vrot.lane.b32.xlu1 %v3411_v15, %s7215_s26  ;;  %v3414_v28 = vadd.f32 %v3411_v15, %v2828_v18 }
0x334b   :  { %v6337_v30 = vmul.f32 -1.442695, %v3414_v28 }
0x334d   :  { %7016 = vpow2.f32 %v6337_v30 }
0x335a   :  { %v7017_v19 = vpop.eup %7016 }
0x335b   :  { %v3418_v32 = vadd.f32 1.0, %v7017_v19  ;;  %v2820_v19 = vmul.f32 %v7769_v38, %v7406_v8 }
0x335d   :  { %7018 = vrcp.f32 %v3418_v32  ;;  %v2827_v32 = vadd.f32 %v7775_v39, %v2820_v19 }
0x336a   :  { %v7019_v22 = vpop.eup %7018 }
0x336b   :  { %v3432_v13 = vsub.f32 1.0, %v7019_v22  ;;  %v3438_v42 = vmul.f32 %v7019_v22, %v7893_v21 }
0x33bb   :  { %v3423_v7 = vpop.permute.xlu1 %3422 }
0x33bc   :  { %v3425_v37 = vmul.f32 %v7019_v22, %v3423_v7  ;;  %v7979_v22 = vld [vmem:[%s9463_s6 + $0x2] ss:$0 sm:$0xff] }
0x33be   :  { %3427 = vrot.lane.b32.xlu0 %v3425_v37, %s7215_s26 }
0x3430   :  { %v3428_v10 = vpop.permute.xlu0 %3427 }
0x3431   :  { %v3430_v9 = vadd.f32 %v3428_v10, %v2828_v18  ;;  %v7985_v10 = vld [vmem:[%s9464_s7 + $0x2] ss:$0 sm:$0xff] }
0x3433   :  { %7020 = vtanh.f32 %v3430_v9 }
0x3440   :  { %v7021_v17 = vpop.eup %7020 }
0x3441   :  { %3434 = vrot.lane.b32.xlu1 %v7021_v17, %s7216_s5 }
0x3445   :  { %4530 = vrot.lane.b32.xlu1 %v6347_v63, %s7217_s29 }
0x34b3   :  { %v3435_v14 = vpop.permute.xlu1 %3434 }
0x34b4   :  { %v3437_v41 = vmul.f32 %v3435_v14, %v3432_v13 }
0x34b6   :  { %v7920_v44 = vadd.f32 %v3438_v42, %v3437_v41 }
0x34b7   :  { %v7922_v45 = vpop.permute.xlu1 %4530 }
0x34b8   :  { %9523 = vst [vmem:[#allocation23_spill] sm:$0xff] %v7920_v44  ;;  %9524 = vst [vmem:[#allocation24_spill] sm:$0xff] %v7922_v45  ;;  %3441 = vrot.lane.b32.xlu0 %v7920_v44, %s7216_s5  ;;  %v4533_v46 = vmul.f32 %v7922_v45, %v7540_v47 }
0x34bc   :  { %4535 = vrot.lane.b32.xlu0 %v4533_v46, %s7216_s5 }
0x352a   :  { %v3442_v51 = vpop.permute.xlu0 %3441 }
0x352b   :  { %6779 = vmatmul.mubr.msk.f32.vlgmr.msra.gmra.mxu0 %vm192_vm1, %v3442_v51 }
0x352c   :  { %6793 = vmatpush3.msra.mxu0 %v7929_v49  ;;  %6800 = vmatprep.mubr.msk.f32.mxu0 %vm7214_vm0, %v7213_v1 }
0x352d   :  { %6794 = vmatprep.subr.mxu0 %v7213_v1 }
0x352e   :  { %6795 = vmatpush3.msra.mxu0 %v7932_v52  ;;  %v4536_v55 = vpop.permute.xlu0 %4535 }
0x352f   :  { %6796 = vmatprep.subr.mxu0 %v7213_v1  ;;  %v4538_v59 = vsel %vm192_vm1, %v4536_v55, 0.0 }
0x3530   :  { %6797 = vmatpush3.msra.mxu0 %v7938_v54  ;;  %4539 = vadd.xlane.f32.xlu1 %v4538_v59 }
0x3531   :  { %6798 = vmatprep.subr.mxu0 %v7213_v1 }
0x3532   :  { %6799 = vmatpush3.msra.mxu0 %v7943_v12 }
0x3533   :  { %6801 = vmatmul.mubr.msk.f32.vlgmr.msra.gmra.mxu0 %vm192_vm1, %v7549_v50  ;;  %6814 = vmatprep.subr.mxu0 %v7213_v1  ;;  %v6348_v50 = vld [vmem:[%s9468_s11 + $0x2] ss:$0 sm:$0xff] }
0x3534   :  { %6815 = vmatpush3.msra.mxu0 %v7929_v49  ;;  %6822 = vmatprep.mubr.msk.f32.mxu0 %vm7214_vm0, %v7213_v1 }
0x3535   :  { %6816 = vmatprep.subr.mxu0 %v7213_v1 }
0x3536   :  { %6817 = vmatpush3.msra.mxu0 %v7932_v52 }
0x3537   :  { %6818 = vmatprep.subr.mxu0 %v7213_v1 }
0x3538   :  { %6819 = vmatpush3.msra.mxu0 %v7938_v54 }
0x3539   :  { %6820 = vmatprep.subr.mxu0 %v7213_v1 }
0x353a   :  { %6821 = vmatpush3.msra.mxu0 %v7943_v12 }
0x353b   :  { %6836 = vmatprep.subr.mxu0 %v7213_v1 }
0x35b9   :  { %v4540_v20 = vpop.xlane.xlu1 %4539 }
0x35ba   :  { %v4547_v23 = vadd.f32 %v6348_v50, %v4540_v20 }
0x35bc   :  { %4550 = vperm.xlu0 %6895, %v4547_v23  }
0x35eb   :  { %v3511_v24 = vpop.f32.mrf.mxu0 }
0x35ec   :  { %v3512_v15 = vadd.f32 %v7759_v29, %v3511_v24 }
0x35ed   :  { %v6780_v25 = vpop.f32.mrf.mxu0 }
0x35ee   :  { %3523 = vrot.lane.b32.xlu0 %v3512_v15, %s7215_s26  ;;  %v3515_v29 = vadd.f32 %v3512_v15, %v2827_v32 }
0x35f0   :  { %v6339_v9 = vmul.f32 -1.442695, %v3515_v29 }
0x35f2   :  { %7022 = vpow2.f32 %v6339_v9 }
0x35f3   :  { %v4653_v18 = vpop.f32.mrf.mxu0 }
0x35f4   :  { %v4654_v28 = vadd.f32 %v7969_v27, %v4653_v18 }
0x35f5   :  { %v6802_v30 = vpop.f32.mrf.mxu0 }
0x35f6   :  { %4665 = vrot.lane.b32.xlu0 %v4654_v28, %s7215_s26 }
0x35ff   :  { %v7023_v63 = vpop.eup %7022 }
0x3600   :  { %v3519_v13 = vadd.f32 1.0, %v7023_v63 }
0x3637   :  { %v4551_v7 = vpop.permute.xlu0 %4550 }
0x3638   :  { %v4559_v37 = vmul.f32 %v7979_v22, %v4551_v7 }
0x363a   :  { %v4566_v17 = vadd.f32 %v7985_v10, %v4559_v37 }
0x363c   :  { %v4657_v38 = vadd.f32 %v4654_v28, %v4566_v17 }
0x363e   :  { %v6353_v39 = vmul.f32 -1.442695, %v4657_v38 }
0x3640   :  { %7024 = vpow2.f32 %v6353_v39 }
0x3641   :  { %7026 = vrcp.f32 %v3519_v13 }
0x364d   :  { %v7025_v14 = vpop.eup %7024 }
0x364e   :  { %v4661_v42 = vadd.f32 1.0, %v7025_v14  ;;  %v7027_v41 = vpop.eup %7026 }
0x364f   :  { %v3533_v28 = vsub.f32 1.0, %v7027_v41  ;;  %v3539_v19 = vmul.f32 %v7027_v41, %v7920_v44 }
0x3650   :  { %7028 = vrcp.f32 %v4661_v42 }
0x365d   :  { %v7029_v55 = vpop.eup %7028 }
0x365e   :  { %v4681_v9 = vmul.f32 %v7029_v55, %v7540_v47 }
0x3660   :  { %v3524_v46 = vpop.permute.xlu0 %3523 }
0x3661   :  { %v3526_v51 = vmul.f32 %v7027_v41, %v3524_v46  ;;  %v4573_v46 = vmul.f32 %v7979_v22, %v7505_v6 }
0x3663   :  { %3528 = vrot.lane.b32.xlu0 %v3526_v51, %s7215_s26  ;;  %v4580_v51 = vadd.f32 %v7985_v10, %v4573_v46 }
0x3668   :  { %v4666_v59 = vpop.permute.xlu0 %4665 }
0x3669   :  { %v4668_v50 = vmul.f32 %v7029_v55, %v4666_v59 }
0x366b   :  { %4670 = vrot.lane.b32.xlu0 %v4668_v50, %s7215_s26 }
0x36d5   :  { %v3529_v20 = vpop.permute.xlu0 %3528 }
0x36d6   :  { %v3531_v23 = vadd.f32 %v3529_v20, %v2827_v32  ;;  %v4675_v32 = vsub.f32 1.0, %v7029_v55 }
0x36d8   :  { %7030 = vtanh.f32 %v3531_v23 }
0x36dd   :  { %v4671_v24 = vpop.permute.xlu0 %4670 }
0x36de   :  { %v4673_v15 = vadd.f32 %v4671_v24, %v4566_v17 }
0x36e0   :  { %7032 = vtanh.f32 %v4673_v15 }
0x36e5   :  { %v7031_v25 = vpop.eup %7030 }
0x36e6   :  { %3535 = vrot.lane.b32.xlu0 %v7031_v25, %s7216_s5 }
0x36ed   :  { %v7033_v18 = vpop.eup %7032 }
0x36ee   :  { %4677 = vrot.lane.b32.xlu0 %v7033_v18, %s7216_s5 }
0x3758   :  { %v3536_v30 = vpop.permute.xlu0 %3535 }
0x3759   :  { %v3538_v29 = vmul.f32 %v3536_v30, %v3533_v28 }
0x375b   :  { %v7993_v7 = vadd.f32 %v3539_v19, %v3538_v29 }
0x375d   :  { %9525 = vst [vmem:[#allocation25_spill] sm:$0xff] %v7993_v7  ;;  %3542 = vrot.lane.b32.xlu0 %v7993_v7, %s7216_s5 }
0x3760   :  { %v4678_v37 = vpop.permute.xlu0 %4677 }
0x3761   :  { %v4680_v17 = vmul.f32 %v4678_v37, %v4675_v32 }
0x3763   :  { %v7998_v38 = vadd.f32 %v4681_v9, %v4680_v17 }
0x3765   :  { %9526 = vst [vmem:[#allocation26_spill] sm:$0xff] %v7998_v38  ;;  %4684 = vrot.lane.b32.xlu1 %v7998_v38, %s7216_s5 }
0x37cf   :  { %v3543_v39 = vpop.permute.xlu0 %3542 }
0x37d0   :  { %6790 = vmatmul.mubr.msk.f32.vlgmr.msra.gmra.mxu1 %vm192_vm1, %v3543_v39 }
0x37d1   :  { %6804 = vmatpush3.msra.mxu1 %v7929_v49  ;;  %6811 = vmatprep.mubr.msk.f32.mxu1 %vm7214_vm0, %v7213_v1 }
0x37d2   :  { %6805 = vmatprep.subr.mxu1 %v7213_v1 }
0x37d3   :  { %6806 = vmatpush3.msra.mxu1 %v7932_v52 }
0x37d4   :  { %6807 = vmatprep.subr.mxu1 %v7213_v1 }
0x37d5   :  { %6808 = vmatpush3.msra.mxu1 %v7938_v54 }
0x37d6   :  { %6809 = vmatprep.subr.mxu1 %v7213_v1 }
0x37d7   :  { %6810 = vmatpush3.msra.mxu1 %v7943_v12  ;;  %v4685_v47 = vpop.permute.xlu1 %4684 }
0x37d8   :  { %6825 = vmatprep.subr.mxu1 %v7213_v1  ;;  %6812 = vmatmul.mubr.msk.f32.vlgmr.msra.gmra.mxu1 %vm192_vm1, %v4685_v47  ;;  %v4572_v47 = vmul.f32 %v7979_v22, %v7490_v56 }
0x37d9   :  { %6826 = vmatpush3.msra.mxu1 %v7929_v49  ;;  %6833 = vmatprep.mubr.msk.f32.mxu1 %vm7214_vm0, %v7213_v1 }
0x37da   :  { %6827 = vmatprep.subr.mxu1 %v7213_v1 }
0x37db   :  { %6828 = vmatpush3.msra.mxu1 %v7932_v52 }
0x37dc   :  { %6829 = vmatprep.subr.mxu1 %v7213_v1 }
0x37dd   :  { %6830 = vmatpush3.msra.mxu1 %v7938_v54 }
0x37de   :  { %6831 = vmatprep.subr.mxu1 %v7213_v1 }
0x37df   :  { %6832 = vmatpush3.msra.mxu1 %v7943_v12 }
0x37e0   :  { %6847 = vmatprep.subr.mxu1 %v7213_v1 }
0x3890   :  { %v8024_v63 = vpop.f32.mrf.mxu1 }
0x3892   :  { %v6791_v13 = vpop.f32.mrf.mxu1 }
0x3893   :  { %v4579_v13 = vadd.f32 %v7985_v10, %v4572_v47 }
0x3898   :  { %v4754_v14 = vpop.f32.mrf.mxu1 }
0x3899   :  { %v4755_v42 = vadd.f32 %v7969_v27, %v4754_v14 }
0x389a   :  { %v6813_v41 = vpop.f32.mrf.mxu1 }
0x389b   :  { %4766 = vrot.lane.b32.xlu0 %v4755_v42, %s7215_s26  ;;  %v4758_v55 = vadd.f32 %v4755_v42, %v4580_v51 }
0x389d   :  { %v6355_v59 = vmul.f32 -1.442695, %v4758_v55 }
0x389f   :  { %7034 = vpow2.f32 %v6355_v59 }
0x38ac   :  { %v7035_v50 = vpop.eup %7034 }
0x38ad   :  { %v4762_v20 = vadd.f32 1.0, %v7035_v50 }
0x38af   :  { %7036 = vrcp.f32 %v4762_v20 }
0x38bc   :  { %v7037_v23 = vpop.eup %7036 }
0x38bd   :  { %v4776_v6 = vsub.f32 1.0, %v7037_v23  ;;  %v4782_v19 = vmul.f32 %v7037_v23, %v7998_v38 }
0x390d   :  { %v4767_v24 = vpop.permute.xlu0 %4766 }
0x390e   :  { %v4769_v15 = vmul.f32 %v7037_v23, %v4767_v24 }
0x3910   :  { %4771 = vrot.lane.b32.xlu0 %v4769_v15, %s7215_s26 }
0x3982   :  { %v4772_v25 = vpop.permute.xlu0 %4771 }
0x3983   :  { %v4774_v18 = vadd.f32 %v4772_v25, %v4580_v51 }
0x3985   :  { %7038 = vtanh.f32 %v4774_v18 }
0x3992   :  { %v7039_v28 = vpop.eup %7038 }
0x3993   :  { %4778 = vrot.lane.b32.xlu0 %v7039_v28, %s7216_s5 }
0x3a05   :  { %v4779_v30 = vpop.permute.xlu0 %4778 }
0x3a06   :  { %v4781_v29 = vmul.f32 %v4779_v30, %v4776_v6 }
0x3a08   :  { %v8034_v32 = vadd.f32 %v4782_v19, %v4781_v29  ;;  %v4571_v29 = vmul.f32 %v7979_v22, %v7475_v33 }
0x3a0a   :  { %9527 = vst [vmem:[#allocation27_spill] sm:$0xff] %v8034_v32  ;;  %4785 = vrot.lane.b32.xlu0 %v8034_v32, %s7216_s5 }
0x3a7c   :  { %v4786_v37 = vpop.permute.xlu0 %4785 }
0x3a7d   :  { %6823 = vmatmul.mubr.msk.f32.vlgmr.msra.gmra.mxu0 %vm192_vm1, %v4786_v37  ;;  %v4578_v37 = vadd.f32 %v7985_v10, %v4571_v29 }
0x3a7e   :  { %6837 = vmatpush3.msra.mxu0 %v7929_v49  ;;  %6844 = vmatprep.mubr.msk.f32.mxu0 %vm7214_vm0, %v7213_v1 }
0x3a7f   :  { %6838 = vmatprep.subr.mxu0 %v7213_v1 }
0x3a80   :  { %6839 = vmatpush3.msra.mxu0 %v7932_v52 }
0x3a81   :  { %6840 = vmatprep.subr.mxu0 %v7213_v1 }
0x3a82   :  { %6841 = vmatpush3.msra.mxu0 %v7938_v54 }
0x3a83   :  { %6842 = vmatprep.subr.mxu0 %v7213_v1 }
0x3a84   :  { %6843 = vmatpush3.msra.mxu0 %v7943_v12 }
0x3a85   :  { %6858 = vmatprep.subr.mxu0 %v7213_v1 }
0x3b3d   :  { %v4855_v9 = vpop.f32.mrf.mxu0 }
0x3b3e   :  { %v4856_v17 = vadd.f32 %v7969_v27, %v4855_v9 }
0x3b3f   :  { %v6824_v39 = vpop.f32.mrf.mxu0 }
0x3b40   :  { %4867 = vrot.lane.b32.xlu1 %v4856_v17, %s7215_s26  ;;  %v4859_v14 = vadd.f32 %v4856_v17, %v4579_v13 }
0x3b42   :  { %v6357_v42 = vmul.f32 -1.442695, %v4859_v14 }
0x3b44   :  { %7040 = vpow2.f32 %v6357_v42 }
0x3b51   :  { %v7041_v41 = vpop.eup %7040 }
0x3b52   :  { %v4863_v46 = vadd.f32 1.0, %v7041_v41 }
0x3b54   :  { %7042 = vrcp.f32 %v4863_v46 }
0x3b61   :  { %v7043_v51 = vpop.eup %7042 }
0x3b62   :  { %v4877_v56 = vsub.f32 1.0, %v7043_v51  ;;  %v4883_v15 = vmul.f32 %v7043_v51, %v8034_v32 }
0x3bb2   :  { %v4868_v55 = vpop.permute.xlu1 %4867 }
0x3bb3   :  { %v4870_v59 = vmul.f32 %v7043_v51, %v4868_v55 }
0x3bb5   :  { %4872 = vrot.lane.b32.xlu0 %v4870_v59, %s7215_s26 }
0x3c27   :  { %v4873_v50 = vpop.permute.xlu0 %4872 }
0x3c28   :  { %v4875_v20 = vadd.f32 %v4873_v50, %v4579_v13 }
0x3c2a   :  { %7044 = vtanh.f32 %v4875_v20 }
0x3c37   :  { %v7045_v23 = vpop.eup %7044 }
0x3c38   :  { %4879 = vrot.lane.b32.xlu1 %v7045_v23, %s7216_s5 }
0x3caa   :  { %v4880_v24 = vpop.permute.xlu1 %4879 }
0x3cab   :  { %v4882_v25 = vmul.f32 %v4880_v24, %v4877_v56 }
0x3cad   :  { %v8057_v18 = vadd.f32 %v4883_v15, %v4882_v25  ;;  %v4570_v25 = vmul.f32 %v7979_v22, %v7452_v61 }
0x3caf   :  { %9528 = vst [vmem:[#allocation28_spill] sm:$0xff] %v8057_v18  ;;  %4886 = vrot.lane.b32.xlu0 %v8057_v18, %s7216_s5 }
0x3d21   :  { %v4887_v28 = vpop.permute.xlu0 %4886 }
0x3d22   :  { %6834 = vmatmul.mubr.msk.f32.vlgmr.msra.gmra.mxu1 %vm192_vm1, %v4887_v28  ;;  %v4577_v28 = vadd.f32 %v7985_v10, %v4570_v25 }
0x3d23   :  { %6848 = vmatpush3.msra.mxu1 %v7929_v49  ;;  %6855 = vmatprep.mubr.msk.f32.mxu1 %vm7214_vm0, %v7213_v1 }
0x3d24   :  { %6849 = vmatprep.subr.mxu1 %v7213_v1 }
0x3d25   :  { %6850 = vmatpush3.msra.mxu1 %v7932_v52 }
0x3d26   :  { %6851 = vmatprep.subr.mxu1 %v7213_v1 }
0x3d27   :  { %6852 = vmatpush3.msra.mxu1 %v7938_v54 }
0x3d28   :  { %6853 = vmatprep.subr.mxu1 %v7213_v1 }
0x3d29   :  { %6854 = vmatpush3.msra.mxu1 %v7943_v12 }
0x3d2a   :  { %6869 = vmatprep.subr.mxu1 %v7213_v1 }
0x3de2   :  { %v4956_v6 = vpop.f32.mrf.mxu1 }
0x3de3   :  { %v4957_v30 = vadd.f32 %v7969_v27, %v4956_v6 }
0x3de4   :  { %v6835_v19 = vpop.f32.mrf.mxu1 }
0x3de5   :  { %4968 = vrot.lane.b32.xlu1 %v4957_v30, %s7215_s26  ;;  %v4960_v9 = vadd.f32 %v4957_v30, %v4578_v37 }
0x3de7   :  { %v6359_v17 = vmul.f32 -1.442695, %v4960_v9 }
0x3de9   :  { %7046 = vpow2.f32 %v6359_v17 }
0x3df6   :  { %v7047_v39 = vpop.eup %7046 }
0x3df7   :  { %v4964_v47 = vadd.f32 1.0, %v7047_v39 }
0x3df9   :  { %7048 = vrcp.f32 %v4964_v47 }
0x3e06   :  { %v7049_v13 = vpop.eup %7048 }
0x3e07   :  { %v4978_v33 = vsub.f32 1.0, %v7049_v13  ;;  %v4984_v59 = vmul.f32 %v7049_v13, %v8057_v18 }
0x3e57   :  { %v4969_v14 = vpop.permute.xlu1 %4968 }
0x3e58   :  { %v4971_v42 = vmul.f32 %v7049_v13, %v4969_v14 }
0x3e5a   :  { %4973 = vrot.lane.b32.xlu0 %v4971_v42, %s7215_s26 }
0x3ecc   :  { %v4974_v41 = vpop.permute.xlu0 %4973 }
0x3ecd   :  { %v4976_v46 = vadd.f32 %v4974_v41, %v4578_v37 }
0x3ecf   :  { %7050 = vtanh.f32 %v4976_v46 }
0x3edc   :  { %v7051_v51 = vpop.eup %7050 }
0x3edd   :  { %4980 = vrot.lane.b32.xlu1 %v7051_v51, %s7216_s5 }
0x3f4f   :  { %v4981_v55 = vpop.permute.xlu1 %4980 }
0x3f50   :  { %v4983_v50 = vmul.f32 %v4981_v55, %v4978_v33 }
0x3f52   :  { %v8080_v20 = vadd.f32 %v4984_v59, %v4983_v50 }
0x3f54   :  { %9529 = vst [vmem:[#allocation29_spill] sm:$0xff] %v8080_v20  ;;  %4987 = vrot.lane.b32.xlu0 %v8080_v20, %s7216_s5 }
0x3fc6   :  { %v4988_v23 = vpop.permute.xlu0 %4987 }
0x3fc7   :  { %6845 = vmatmul.mubr.msk.f32.vlgmr.msra.gmra.mxu0 %vm192_vm1, %v4988_v23 }
0x3fc8   :  { %6859 = vmatpush3.msra.mxu0 %v7929_v49  ;;  %6866 = vmatprep.mubr.msk.f32.mxu0 %vm7214_vm0, %v7213_v1 }
0x3fc9   :  { %6860 = vmatprep.subr.mxu0 %v7213_v1 }
0x3fca   :  { %6861 = vmatpush3.msra.mxu0 %v7932_v52 }
0x3fcb   :  { %6862 = vmatprep.subr.mxu0 %v7213_v1 }
0x3fcc   :  { %6863 = vmatpush3.msra.mxu0 %v7938_v54 }
0x3fcd   :  { %6864 = vmatprep.subr.mxu0 %v7213_v1 }
0x3fce   :  { %6865 = vmatpush3.msra.mxu0 %v7943_v12 }
0x4087   :  { %v5057_v56 = vpop.f32.mrf.mxu0 }
0x4088   :  { %v5058_v24 = vadd.f32 %v7969_v27, %v5057_v56 }
0x4089   :  { %v6846_v15 = vpop.f32.mrf.mxu0 }
0x408a   :  { %5069 = vrot.lane.b32.xlu1 %v5058_v24, %s7215_s26  ;;  %v5061_v6 = vadd.f32 %v5058_v24, %v4577_v28 }
0x408c   :  { %v6361_v30 = vmul.f32 -1.442695, %v5061_v6 }
0x408e   :  { %7052 = vpow2.f32 %v6361_v30 }
0x409b   :  { %v7053_v19 = vpop.eup %7052 }
0x409c   :  { %v5065_v29 = vadd.f32 1.0, %v7053_v19 }
0x409e   :  { %7054 = vrcp.f32 %v5065_v29 }
0x40ab   :  { %v7055_v37 = vpop.eup %7054 }
0x40ac   :  { %v5079_v61 = vsub.f32 1.0, %v7055_v37  ;;  %v5085_v42 = vmul.f32 %v7055_v37, %v8080_v20 }
0x40fc   :  { %v5070_v9 = vpop.permute.xlu1 %5069 }
0x40fd   :  { %v5072_v17 = vmul.f32 %v7055_v37, %v5070_v9 }
0x40ff   :  { %5074 = vrot.lane.b32.xlu0 %v5072_v17, %s7215_s26 }
0x4171   :  { %v5075_v39 = vpop.permute.xlu0 %5074 }
0x4172   :  { %v5077_v47 = vadd.f32 %v5075_v39, %v4577_v28 }
0x4174   :  { %7056 = vtanh.f32 %v5077_v47  ;;  %v4568_v47 = vmul.f32 %v7979_v22, %v7406_v8  ;;  %v7088_v8 = vld [vmem:[%s9466_s9] ss:$0 sm:$0xff] }
0x4181   :  { %v7057_v13 = vpop.eup %7056 }
0x4182   :  { %5081 = vrot.lane.b32.xlu1 %v7057_v13, %s7216_s5  ;;  %v4575_v13 = vadd.f32 %v7985_v10, %v4568_v47 }
0x41f4   :  { %v5082_v14 = vpop.permute.xlu1 %5081 }
0x41f5   :  { %v5084_v41 = vmul.f32 %v5082_v14, %v5079_v61 }
0x41f7   :  { %v8102_v46 = vadd.f32 %v5085_v42, %v5084_v41 }
0x41f9   :  { %9530 = vst [vmem:[#allocation30_spill] sm:$0xff] %v8102_v46  ;;  %5088 = vrot.lane.b32.xlu0 %v8102_v46, %s7216_s5 }
0x426b   :  { %v5089_v51 = vpop.permute.xlu0 %5088 }
0x426c   :  { %6856 = vmatmul.mubr.msk.f32.vlgmr.msra.gmra.mxu1 %vm192_vm1, %v5089_v51 }
0x426d   :  { %6870 = vmatpush3.msra.mxu1 %v7929_v49  ;;  %6877 = vmatprep.mubr.msk.f32.mxu1 %vm7214_vm0, %v7213_v1  ;;  %v4569_v49 = vmul.f32 %v7979_v22, %v7429_v36  ;;  %v1849_v22 = vadd.f32 %v7088_v8, %v7814_v58  ;;  %vm2758_vm0 = vcmask 1047559  }
0x426e   :  { %6871 = vmatprep.subr.mxu1 %v7213_v1 }
0x426f   :  { %6872 = vmatpush3.msra.mxu1 %v7932_v52  ;;  %v4576_v50 = vadd.f32 %v7985_v10, %v4569_v49  ;;  %v7089_v10 = vld [vmem:[%s9463_s6] ss:$0 sm:$0xff] }
0x4270   :  { %6873 = vmatprep.subr.mxu1 %v7213_v1 }
0x4271   :  { %6874 = vmatpush3.msra.mxu1 %v7938_v54 }
0x4272   :  { %6875 = vmatprep.subr.mxu1 %v7213_v1 }
0x4273   :  { %6876 = vmatpush3.msra.mxu1 %v7943_v12 }
0x432c   :  { %v5158_v33 = vpop.f32.mrf.mxu1 }
0x432d   :  { %v5159_v55 = vadd.f32 %v7969_v27, %v5158_v33 }
0x432e   :  { %v6857_v59 = vpop.f32.mrf.mxu1 }
0x432f   :  { %5170 = vrot.lane.b32.xlu1 %v5159_v55, %s7215_s26  ;;  %v5162_v52 = vadd.f32 %v5159_v55, %v4576_v50 }
0x4331   :  { %v6363_v23 = vmul.f32 -1.442695, %v5162_v52  ;;  %v1050_v52 = vmul.f32 %v7089_v10, %v7383_v40 }
0x4333   :  { %7058 = vpow2.f32 %v6363_v23  ;;  %v7090_v23 = vld [vmem:[%s9464_s7] ss:$0 sm:$0xff] }
0x4340   :  { %v7059_v56 = vpop.eup %7058 }
0x4341   :  { %v5166_v54 = vadd.f32 1.0, %v7059_v56  ;;  %v1057_v56 = vadd.f32 %v7090_v23, %v1050_v52  ;;  %v7219_v52 = vmov 1966171168  }
0x4342   :  { %v1881_v23 = vunpack.c.l.s4 %v7219_v52 }
0x4343   :  { %7060 = vrcp.f32 %v5166_v54  ;;  %v1852_v54 = vadd.f32 %v1849_v22, %v1057_v56 }
0x4350   :  { %v7061_v1 = vpop.eup %7060 }
0x4351   :  { %v5180_v36 = vsub.f32 1.0, %v7061_v1  ;;  %v5186_v30 = vmul.f32 %v7061_v1, %v8102_v46 }
0x43a1   :  { %v5171_v24 = vpop.permute.xlu1 %5170 }
0x43a2   :  { %v5173_v12 = vmul.f32 %v7061_v1, %v5171_v24  ;;  %v6315_v1 = vmul.f32 -1.442695, %v1852_v54 }
0x43a4   :  { %5175 = vrot.lane.b32.xlu0 %v5173_v12, %s7215_s26 }
0x4416   :  { %v5176_v15 = vpop.permute.xlu0 %5175 }
0x4417   :  { %v5178_v25 = vadd.f32 %v5176_v15, %v4576_v50 }
0x4419   :  { %7062 = vtanh.f32 %v5178_v25 }
0x4426   :  { %v7063_v28 = vpop.eup %7062 }
0x4427   :  { %5182 = vrot.lane.b32.xlu1 %v7063_v28, %s7216_s5 }
0x4499   :  { %v5183_v6 = vpop.permute.xlu1 %5182 }
0x449a   :  { %v5185_v19 = vmul.f32 %v5183_v6, %v5180_v36  ;;  %v7091_v6 = vld [vmem:[%s9466_s9 + $0x1] ss:$0 sm:$0xff] }
0x449c   :  { %v8124_v29 = vadd.f32 %v5186_v30, %v5185_v19  ;;  %v3613_v30 = vadd.f32 %v7091_v6, %v8024_v63  ;;  %v7093_v63 = vld [vmem:[%s9464_s7 + $0x1] ss:$0 sm:$0xff] }
0x449e   :  { %9531 = vst [vmem:[#allocation31_spill] sm:$0xff] %v8124_v29  ;;  %5189 = vrot.lane.b32.xlu0 %v8124_v29, %s7216_s5 }
0x4510   :  { %v5190_v37 = vpop.permute.xlu0 %5189 }
0x4511   :  { %6867 = vmatmul.mubr.msk.f32.vlgmr.msra.gmra.mxu0 %vm192_vm1, %v5190_v37 }
0x45d1   :  { %v5259_v9 = vpop.f32.mrf.mxu0 }
0x45d2   :  { %v5260_v17 = vadd.f32 %v7969_v27, %v5259_v9 }
0x45d3   :  { %v6868_v39 = vpop.f32.mrf.mxu0 }
0x45d4   :  { %5271 = vrot.lane.b32.xlu1 %v5260_v17, %s7215_s26  ;;  %v5263_v61 = vadd.f32 %v5260_v17, %v4575_v13  ;;  %v7092_v39 = vld [vmem:[%s9463_s6 + $0x1] ss:$0 sm:$0xff] }
0x45d5   :  { %v2819_v47 = vmul.f32 %v7092_v39, %v7383_v40 }
0x45d6   :  { %v6365_v14 = vmul.f32 -1.442695, %v5263_v61 }
0x45d8   :  { %7064 = vpow2.f32 %v6365_v14 }
0x45e5   :  { %v7065_v42 = vpop.eup %7064 }
0x45e6   :  { %v5267_v41 = vadd.f32 1.0, %v7065_v42 }
0x45e8   :  { %7066 = vrcp.f32 %v5267_v41 }
0x45f5   :  { %v7067_v51 = vpop.eup %7066 }
0x45f6   :  { %v5281_v58 = vsub.f32 1.0, %v7067_v51  ;;  %v5287_v25 = vmul.f32 %v7067_v51, %v8124_v29 }
0x4646   :  { %v5272_v33 = vpop.permute.xlu1 %5271 }
0x4647   :  { %v5274_v55 = vmul.f32 %v7067_v51, %v5272_v33 }
0x4649   :  { %5276 = vrot.lane.b32.xlu0 %v5274_v55, %s7215_s26 }
0x46bb   :  { %v5277_v59 = vpop.permute.xlu0 %5276 }
0x46bc   :  { %v5279_v49 = vadd.f32 %v5277_v59, %v4575_v13  ;;  %v8170_v13 = vadd.f32 %v7093_v63, %v2819_v47 }
0x46be   :  { %7068 = vtanh.f32 %v5279_v49  ;;  %v3616_v61 = vadd.f32 %v3613_v30, %v8170_v13 }
0x46bf   :  { %7070 = vpow2.f32 %v6315_v1  ;;  %v2230_v1 = vcombine.high %v7591_v31, %v7591_v31 }
0x46c0   :  { %v6341_v14 = vmul.f32 -1.442695, %v3616_v61 }
0x46cb   :  { %v7069_v50 = vpop.eup %7068 }
0x46cc   :  { %5283 = vrot.lane.b32.xlu1 %v7069_v50, %s7216_s5  ;;  %v7071_v24 = vpop.eup %7070 }
0x46cd   :  { %v1856_v12 = vadd.f32 1.0, %v7071_v24  ;;  %v2181_v24 = vcombine.high %v7614_v57, %v7614_v57 }
0x46cf   :  { %7072 = vrcp.f32 %v1856_v12 }
0x46d0   :  { %1860 = vrot.lane.b32.xlu1 %v1849_v22, %s7215_s26  ;;  %7074 = vpow2.f32 %v6341_v14 }
0x46dc   :  { %v8158_v37 = vpop.eup %7072 }
0x46dd   :  { %v7075_v42 = vpop.eup %7074 }
0x46de   :  { %v3620_v51 = vadd.f32 1.0, %v7075_v42 }
0x46e0   :  { %7076 = vrcp.f32 %v3620_v51 }
0x46ed   :  { %v8178_v8 = vpop.eup %7076 }
0x46ee   :  { %9534 = vst [vmem:[#allocation34_spill] sm:$0xff] %v8178_v8 }
0x473e   :  { %v5284_v15 = vpop.permute.xlu1 %5283 }
0x473f   :  { %v5286_v28 = vmul.f32 %v5284_v15, %v5281_v58 }
0x4741   :  { %v8149_v36 = vadd.f32 %v5287_v25, %v5286_v28 }
0x4742   :  { %v1861_v19 = vpop.permute.xlu1 %1860 }
0x4743   :  { %9532 = vst [vmem:[#allocation32_spill] sm:$0xff] %v8149_v36  ;;  %5290 = vrot.lane.b32.xlu0 %v8149_v36, %s7216_s5  ;;  %v1863_v9 = vmul.f32 %v8158_v37, %v1861_v19 }
0x4747   :  { %3624 = vrot.lane.b32.xlu0 %v3613_v30, %s7215_s26 }
0x474b   :  { %1865 = vrot.lane.b32.xlu0 %v1863_v9, %s7215_s26 }
0x47b5   :  { %v5291_v17 = vpop.permute.xlu0 %5290 }
0x47b6   :  { %6878 = vmatmul.mubr.msk.f32.vlgmr.msra.gmra.mxu1 %vm192_vm1, %v5291_v17 }
0x47b9   :  { %v3625_v41 = vpop.permute.xlu0 %3624 }
0x47ba   :  { %v3627_v22 = vmul.f32 %v8178_v8, %v3625_v41  ;;  %v2083_v41 = vcombine.high %v7660_v60, %v7660_v60 }
0x47bd   :  { %v1866_v33 = vpop.permute.xlu0 %1865 }
0x47be   :  { %v1868_v55 = vadd.f32 %v1866_v33, %v1057_v56  ;;  %v1882_v56 = vunpack.c.0.s8 %v1881_v23  ;;  %v1985_v23 = vcombine.high %v7710_v62, %v7710_v62 }
0x47c0   :  { %7078 = vtanh.f32 %v1868_v55  ;;  %v8184_v54 = vsub.s32 %v1882_v56, %v7302_v2 }
0x47c2   :  { %v2244_v58 = vrot.slane %v2230_v1, %v8184_v54  ;;  %v2188_v15 = vrot.slane %v7614_v57, %v8184_v54  ;;  %v2195_v28 = vrot.slane %v2181_v24, %v8184_v54  ;;  %v2139_v9 = vrot.slane %v7637_v4, %v8184_v54 }
0x47c3   :  { %v2041_v0 = vrot.slane %v7683_v34, %v8184_v54  ;;  %v1999_v2 = vrot.slane %v1985_v23, %v8184_v54  ;;  %v1943_v46 = vrot.slane %v7783_v26, %v8184_v54 }
0x47c4   :  { %v2246_v30 = vcombine.high %v2244_v58, %v2244_v58  ;;  %v2196_v19 = vcombine.high %v2188_v15, %v2188_v15  ;;  %v2197_v17 = vcombine.high %v2195_v28, %v2195_v28  ;;  %v8209_v39 = vrot.slane %v2188_v15, %v8184_v54 }
0x47c5   :  { %v8214_v63 = vrot.slane %v2244_v58, %v8184_v54  ;;  %v2147_v42 = vcombine.high %v2139_v9, %v2139_v9  ;;  %v8228_v33 = vrot.slane %v2195_v28, %v8184_v54  ;;  %v2097_v15 = vrot.slane %v2083_v41, %v8184_v54 }
0x47c6   :  { %v8217_v61 = vrot.slane %v2196_v19, %v8184_v54  ;;  %v2049_v51 = vcombine.high %v2041_v0, %v2041_v0  ;;  %v8334_v55 = vrot.slane %v2041_v0, %v8184_v54 }
0x47c7   :  { %9535 = vst [vmem:[#allocation35_spill] sm:$0xff] %v8214_v63  ;;  %v8257_v58 = vrot.slane %v2147_v42, %v8184_v54  ;;  %v2227_v19 = vcombine.high %v8228_v33, %v8228_v33  ;;  %v2099_v28 = vcombine.high %v2097_v15, %v2097_v15 }
0x47c8   :  { %v2228_v1 = vcombine.high %v8217_v61, %v8217_v61 }
0x47ca   :  { %v8286_v53 = vrot.slane %v2228_v1, %v7308_v3 }
0x47cd   :  { %v7079_v10 = vpop.eup %7078 }
0x4876   :  { %v5360_v59 = vpop.f32.mrf.mxu1 }
0x4877   :  { %v8174_v49 = vadd.f32 %v7969_v27, %v5360_v59  ;;  %v2237_v27 = vrot.slane %v7591_v31, %v8184_v54  ;;  %v2132_v31 = vcombine.high %v7637_v4, %v7637_v4  ;;  %v8221_v4 = vrot.slane %v2246_v30, %v8184_v54 }
0x4878   :  { %v6879_v50 = vpop.f32.mrf.mxu1  ;;  %v8321_v30 = vrot.slane %v2099_v28, %v8184_v54 }
0x4879   :  { %9533 = vst [vmem:[#allocation33_spill] sm:$0xff] %v8174_v49  ;;  %5372 = vrot.lane.b32.xlu1 %v8174_v49, %s7215_s26  ;;  %v2245_v12 = vcombine.high %v2237_v27, %v2237_v27  ;;  %v8196_v25 = vrot.slane %v2237_v27, %v8184_v54  ;;  %v2146_v14 = vrot.slane %v2132_v31, %v8184_v54  ;;  %9536 = vst [vmem:[#allocation36_spill] sm:$0xff] %v8221_v4 }
0x487a   :  { %v8236_v50 = vrot.slane %v2197_v17, %v8184_v54  ;;  %v2090_v27 = vrot.slane %v7660_v60, %v8184_v54  ;;  %v2034_v17 = vcombine.high %v7683_v34, %v7683_v34  ;;  %v8300_v34 = vrot.slane %v2227_v19, %v7308_v3 }
0x487b   :  { %v8200_v6 = vrot.slane %v2245_v12, %v8184_v54  ;;  %v2275_v57 = vcombine.high %v8196_v25, %v8196_v25  ;;  %v2148_v56 = vcombine.high %v2146_v14, %v2146_v14  ;;  %v8254_v12 = vrot.slane %v2139_v9, %v8184_v54 }
0x487c   :  { %9537 = vst [vmem:[#allocation37_spill] sm:$0xff] %v8236_v50  ;;  %v2229_v31 = vcombine.high %v8236_v50, %v8236_v50  ;;  %v8271_v9 = vrot.slane %v2146_v14, %v8184_v54  ;;  %v2098_v41 = vcombine.high %v2090_v27, %v2090_v27  ;;  %v8297_v24 = vrot.slane %v2090_v27, %v8184_v54 }
0x487d   :  { %3629 = vrot.lane.b32.xlu1 %v3627_v22, %s7215_s26  ;;  %v2277_v47 = vcombine.high %v8200_v6, %v8200_v6  ;;  %v8233_v59 = vrot.slane %v2275_v57, %v7308_v3  ;;  %v2226_v22 = vcombine.high %v8209_v39, %v8209_v39  ;;  %v8281_v42 = vrot.slane %v2148_v56, %v8184_v54 }
0x487e   :  { %v2177_v14 = vcombine.high %v8254_v12, %v8254_v12  ;;  %9538 = vst [vmem:[#allocation38_spill] sm:$0xff] %v8300_v34  ;;  %v8303_v1 = vrot.slane %v2229_v31, %v7308_v3  ;;  %v2178_v52 = vcombine.high %v8271_v9, %v8271_v9  ;;  %v8313_v27 = vrot.slane %v2097_v15, %v8184_v54 }
0x487f   :  { %v8276_v57 = vrot.slane %v2226_v22, %v7308_v3  ;;  %v2179_v22 = vcombine.high %v8257_v58, %v8257_v58  ;;  %v8316_v19 = vrot.slane %v2098_v41, %v8184_v54  ;;  %v2180_v31 = vcombine.high %v8281_v42, %v8281_v42 }
0x4880   :  { %9539 = vst [vmem:[#allocation39_spill] sm:$0xff] %v8303_v1  ;;  %v2128_v41 = vcombine.high %v8297_v24, %v8297_v24  ;;  %v1992_v56 = vrot.slane %v7710_v62, %v8184_v54  ;;  %v8344_v15 = vrot.slane %v2178_v52, %v7308_v3  ;;  %v2129_v45 = vcombine.high %v8313_v27, %v8313_v27 }
0x4881   :  { %1872 = vrot.lane.b32.xlu1 %v7079_v10, %s7216_s5  ;;  %v8241_v10 = vrot.slane %v2277_v47, %v7308_v3  ;;  %v2048_v47 = vrot.slane %v2034_v17, %v8184_v54  ;;  %v8324_v17 = vrot.slane %v2177_v14, %v7308_v3  ;;  %v8327_v60 = vrot.slane %v2179_v22, %v7308_v3 }
0x4882   :  { %v1936_v22 = vcombine.high %v7783_v26, %v7783_v26  ;;  %9540 = vst [vmem:[#allocation40_spill] sm:$0xff] %v8344_v15  ;;  %v2130_v0 = vcombine.high %v8316_v19, %v8316_v19  ;;  %v8351_v62 = vrot.slane %v2049_v51, %v8184_v54  ;;  %v8354_v28 = vrot.slane %v2180_v31, %v7308_v3 }
0x4883   :  { %v2050_v14 = vcombine.high %v2048_v47, %v2048_v47  ;;  %v2131_v23 = vcombine.high %v8321_v30, %v8321_v30  ;;  %v8365_v18 = vrot.slane %v2128_v41, %v7308_v3  ;;  %v8368_v51 = vrot.slane %v2048_v47, %v8184_v54 }
0x4884   :  { %9541 = vst [vmem:[#allocation41_spill] sm:$0xff] %v8354_v28  ;;  %v2079_v31 = vcombine.high %v8334_v55, %v8334_v55  ;;  %v2000_v29 = vcombine.high %v1992_v56, %v1992_v56  ;;  %v2001_v52 = vcombine.high %v1999_v2, %v1999_v2  ;;  %v1950_v32 = vrot.slane %v1936_v22, %v8184_v54 }
0x4885   :  { %v8375_v20 = vrot.slane %v2050_v14, %v8184_v54  ;;  %v2081_v41 = vcombine.high %v8351_v62, %v8351_v62  ;;  %v8383_v47 = vrot.slane %v2130_v0, %v7308_v3  ;;  %v8388_v5 = vrot.slane %v2129_v45, %v7308_v3 }
0x4886   :  { %v8393_v36 = vrot.slane %v1992_v56, %v8184_v54  ;;  %v1951_v22 = vcombine.high %v1943_v46, %v1943_v46  ;;  %v2080_v0 = vcombine.high %v8368_v51, %v8368_v51  ;;  %v8403_v11 = vrot.slane %v2079_v31, %v7308_v3 }
0x4887   :  { %9543 = vst [vmem:[#allocation43_spill] sm:$0xff] %v8388_v5  ;;  %v8406_v45 = vrot.slane %v2000_v29, %v8184_v54  ;;  %v2082_v56 = vcombine.high %v8375_v20, %v8375_v20  ;;  %v8411_v14 = vrot.slane %v1999_v2, %v8184_v54  ;;  %v1952_v43 = vcombine.high %v1950_v32, %v1950_v32 }
0x4888   :  { %v8417_v21 = vrot.slane %v2081_v41, %v7308_v3  ;;  %v1959_v29 = vrot.slane %v1943_v46, %v8184_v54  ;;  %v2030_v2 = vcombine.high %v8393_v36, %v8393_v36  ;;  %v1973_v7 = vrot.slane %v1951_v22, %v8184_v54 }
0x4889   :  { %v8430_v41 = vrot.slane %v2080_v0, %v7308_v3  ;;  %v2032_v31 = vcombine.high %v8406_v45, %v8406_v45  ;;  %v1870_v46 = vsub.f32 1.0, %v8158_v37  ;;  %v1980_v22 = vrot.slane %v1952_v43, %v8184_v54 }
0x488a   :  { %v2322_v0 = vrot.slane %v8393_v36, %v7308_v3  ;;  %v1981_v8 = vcombine.high %v1959_v29, %v1959_v29  ;;  %v2330_v40 = vrot.slane %v2030_v2, %v7308_v3  ;;  %v1983_v34 = vcombine.high %v1973_v7, %v1973_v7 }
0x488b   :  { %v2334_v28 = vrot.slane %v2032_v31, %v7308_v3  ;;  %v2338_v43 = vrot.slane %v8411_v14, %v7308_v3 }
0x488c   :  { %v2290_v2 = vrot.slane %v1981_v8, %v7308_v3 }
0x48eb   :  { %v8378_v38 = vpop.permute.xlu1 %5372 }
0x48ec   :  { %9542 = vst [vmem:[#allocation42_spill] sm:$0xff] %v8378_v38  ;;  %v8396_v38 = vrot.slane %v2131_v23, %v7308_v3  ;;  %v8414_v23 = vrot.slane %v2001_v52, %v8184_v54  ;;  %v1966_v52 = vrot.slane %v1950_v32, %v8184_v54 }
0x48ee   :  { %9544 = vst [vmem:[#allocation44_spill] sm:$0xff] %v8396_v38  ;;  %v2033_v32 = vcombine.high %v8414_v23, %v8414_v23  ;;  %v1982_v1 = vcombine.high %v1966_v52, %v1966_v52  ;;  %v2342_v36 = vrot.slane %v8414_v23, %v7308_v3  ;;  %v2298_v63 = vrot.slane %v1966_v52, %v7308_v3 }
0x48ef   :  { %v3630_v35 = vpop.permute.xlu1 %3629 }
0x48f0   :  { %v3632_v16 = vadd.f32 %v3630_v35, %v8170_v13  ;;  %v8436_v35 = vrot.slane %v2082_v56, %v7308_v3  ;;  %v2031_v13 = vcombine.high %v8411_v14, %v8411_v14  ;;  %v2326_v56 = vrot.slane %v8406_v45, %v7308_v3 }
0x48f1   :  { %v2286_v45 = vrot.slane %v1973_v7, %v7308_v3  ;;  %v2294_v14 = vrot.slane %v1983_v34, %v7308_v3  ;;  %v2306_v23 = vrot.slane %v1982_v1, %v7308_v3 }
0x48f2   :  { %7080 = vtanh.f32 %v3632_v16  ;;  %v1876_v16 = vmul.f32 %v8158_v37, %v7783_v26  ;;  %v2346_v4 = vrot.slane %v2031_v13, %v7308_v3  ;;  %v2350_v26 = vrot.slane %v2033_v32, %v7308_v3 }
0x48f3   :  { %v1873_v44 = vpop.permute.xlu1 %1872  ;;  %v2282_v37 = vrot.slane %v1959_v29, %v7308_v3 }
0x48f4   :  { %v1875_v49 = vmul.f32 %v1873_v44, %v1870_v46  ;;  %v1984_v44 = vcombine.high %v1980_v22, %v1980_v22 }
0x48f6   :  { %v1877_v15 = vadd.f32 %v1876_v16, %v1875_v49  ;;  %v2302_v49 = vrot.slane %v1980_v22, %v7308_v3  ;;  %v2310_v7 = vrot.slane %v1984_v44, %v7308_v3 }
0x48f8   :  { %v1879_v46 = vcombine.high %v1877_v15, %v1877_v15  ;;  %v1886_v31 = vrot.slane %v1877_v15, %v8184_v54 }
0x48fa   :  { %v1893_v13 = vrot.slane %v1879_v46, %v8184_v54  ;;  %v1894_v32 = vcombine.high %v1886_v31, %v1886_v31  ;;  %v1902_v29 = vrot.slane %v1886_v31, %v8184_v54 }
0x48fc   :  { %v1895_v8 = vcombine.high %v1893_v13, %v1893_v13  ;;  %v1909_v34 = vrot.slane %v1893_v13, %v8184_v54  ;;  %v1916_v15 = vrot.slane %v1894_v32, %v8184_v54  ;;  %v1924_v52 = vcombine.high %v1902_v29, %v1902_v29 }
0x48fd   :  { %v2560_v22 = vsel %vm2559_vm2, %v1902_v29, %v2282_v37 }
0x48fe   :  { %v1923_v1 = vrot.slane %v1895_v8, %v8184_v54  ;;  %v1925_v16 = vcombine.high %v1909_v34, %v1909_v34  ;;  %v1926_v46 = vcombine.high %v1916_v15, %v1916_v15  ;;  %v2561_v44 = vsel %vm2559_vm2, %v1916_v15, %v2286_v45 }
0x48ff   :  { %v7081_v31 = vpop.eup %7080  ;;  %v2562_v38 = vsel %vm2559_vm2, %v1924_v52, %v2290_v2  ;;  %v2564_v5 = vsel %vm2559_vm2, %v1909_v34, %v2298_v63  ;;  %v2569_v13 = vsel %vm2568_vm3, %v2560_v22, %v2322_v0  ;;  %v2570_v32 = vsel %vm2568_vm3, %v2561_v44, %v2326_v56 }
0x4900   :  { %v1927_v50 = vcombine.high %v1923_v1, %v1923_v1  ;;  %v2563_v37 = vsel %vm2559_vm2, %v1926_v46, %v2294_v14  ;;  %v2565_v29 = vsel %vm2559_vm2, %v1923_v1, %v2302_v49  ;;  %v2566_v8 = vsel %vm2559_vm2, %v1925_v16, %v2306_v23  ;;  %3636 = vrot.lane.b32.xlu0 %v7081_v31, %s7216_s5 }
0x4901   :  { %v2571_v45 = vsel %vm2568_vm3, %v2562_v38, %v2330_v40  ;;  %v2572_v15 = vsel %vm2568_vm3, %v2563_v37, %v2334_v28  ;;  %v2573_v2 = vsel %vm2568_vm3, %v2564_v5, %v2338_v43  ;;  %v2574_v63 = vsel %vm2568_vm3, %v2565_v29, %v2342_v36 }
0x4902   :  { %v2567_v0 = vsel %vm2559_vm2, %v1927_v50, %v2310_v7  ;;  %v2575_v56 = vsel %vm2568_vm3, %v2566_v8, %v2346_v4  ;;  %v9545_v14 = vrot.slane %v8334_v55, %v7308_v3  ;;  %v9546_v23 = vrot.slane %v8351_v62, %v7308_v3 }
0x4903   :  { %v2576_v38 = vsel %vm2568_vm3, %v2567_v0, %v2350_v26  ;;  %v9547_v5 = vrot.slane %v8297_v24, %v7308_v3  ;;  %v9548_v4 = vrot.slane %v8316_v19, %v7308_v3  ;;  %v2580_v55 = vsel %vm2577_vm4, %v2571_v45, %v8403_v11  ;;  %v9565_v0 = vld [vmem:[#allocation44_spill] sm:$0xff] }
0x4904   :  { %v2578_v49 = vsel %vm2577_vm4, %v2569_v13, %v9545_v14  ;;  %v2579_v40 = vsel %vm2577_vm4, %v2570_v32, %v9546_v23  ;;  %v9549_v62 = vrot.slane %v8254_v12, %v7308_v3  ;;  %v9550_v36 = vrot.slane %v8257_v58, %v7308_v3 }
0x4905   :  { %v2587_v28 = vsel %vm2586_vm5, %v2578_v49, %v9547_v5  ;;  %v2588_v50 = vsel %vm2586_vm5, %v2579_v40, %v9548_v4  ;;  %v2589_v26 = vsel %vm2586_vm5, %v2580_v55, %v8365_v18  ;;  %v2581_v19 = vsel %vm2577_vm4, %v2572_v15, %v8417_v21  ;;  %v9562_v15 = vld [vmem:[#allocation37_spill] sm:$0xff]  ;;  %v9568_v49 = vld [vmem:[#allocation36_spill] sm:$0xff]  ;;  %v9572_v4 = vld [vmem:[#allocation38_spill] sm:$0xff] }
0x4906   :  { %v2596_v43 = vsel %vm2595_vm6, %v2587_v28, %v9549_v62  ;;  %v2597_v24 = vsel %vm2595_vm6, %v2588_v50, %v9550_v36  ;;  %v9551_v7 = vrot.slane %v8209_v39, %v7308_v3  ;;  %v9552_v12 = vrot.slane %v8217_v61, %v7308_v3  ;;  %v9570_v40 = vld [vmem:[#allocation40_spill] sm:$0xff]  ;;  %v9571_v5 = vld [vmem:[#allocation41_spill] sm:$0xff] }
0x4907   :  { %v2598_v58 = vsel %vm2595_vm6, %v2589_v26, %v8324_v17  ;;  %v2590_v52 = vsel %vm2586_vm5, %v2581_v19, %v8383_v47  ;;  %v9553_v18 = vrot.slane %v8196_v25, %v7308_v3  ;;  %v9554_v39 = vrot.slane %v8200_v6, %v7308_v3 }
0x4908   :  { %v2605_v11 = vsel %vm2604_vm7, %v2596_v43, %v9551_v7  ;;  %v2606_v34 = vsel %vm2604_vm7, %v2597_v24, %v9552_v12  ;;  %v2607_v61 = vsel %vm2604_vm7, %v2598_v58, %v8276_v57  ;;  %v2599_v1 = vsel %vm2595_vm6, %v2590_v52, %v8327_v60  ;;  %v9575_v24 = vld [vmem:[#allocation39_spill] sm:$0xff]  ;;  %v7094_v52 = vld [vmem:[%s9463_s6 + $0x2] ss:$0 sm:$0xff] }
0x4909   :  { %v2614_v21 = vsel %vm2613_vm8, %v2605_v11, %v9553_v18  ;;  %v2615_v22 = vsel %vm2613_vm8, %v2606_v34, %v9554_v39  ;;  %v2616_v25 = vsel %vm2613_vm8, %v2607_v61, %v8233_v59  ;;  %v2608_v16 = vsel %vm2604_vm7, %v2599_v1, %v8286_v53  ;;  %v9576_v18 = vld [vmem:[#allocation16_spill] sm:$0xff]  ;;  %v7095_v39 = vld [vmem:[%s9464_s7 + $0x2] ss:$0 sm:$0xff] }
0x490a   :  { %v2622_v17 = vmul.f32 %v2614_v21, %v7542_v48  ;;  %v2623_v47 = vmul.f32 %v2615_v22, %v7542_v48  ;;  %v2624_v6 = vmul.f32 %v2616_v25, %v7542_v48  ;;  %v2617_v46 = vsel %vm2613_vm8, %v2608_v16, %v8241_v10  ;;  %v9577_v61 = vld [vmem:[#allocation33_spill] sm:$0xff] }
0x490b   :  { %v9555_v57 = vrot.slane %v8368_v51, %v7308_v3  ;;  %v9556_v44 = vrot.slane %v8375_v20, %v7308_v3  ;;  %v2625_v53 = vmul.f32 %v2617_v46, %v7542_v48  ;;  %v9557_v59 = vrot.slane %v8313_v27, %v7308_v3 }
0x490c   :  { %2638 = vrot.lane.b32.xlu0 %v2622_v17, %s7216_s5  ;;  %2640 = vrot.lane.b32.xlu1 %v2623_v47, %s7216_s5  ;;  %v9558_v51 = vrot.slane %v8321_v30, %v7308_v3  ;;  %v9559_v20 = vrot.slane %v8271_v9, %v7308_v3  ;;  %v9560_v37 = vrot.slane %v8281_v42, %v7308_v3 }
0x490d   :  { %v2582_v60 = vsel %vm2577_vm4, %v2573_v2, %v9555_v57  ;;  %v2583_v31 = vsel %vm2577_vm4, %v2574_v63, %v9556_v44  ;;  %v2584_v27 = vsel %vm2577_vm4, %v2575_v56, %v8430_v41  ;;  %v2585_v8 = vsel %vm2577_vm4, %v2576_v38, %v8436_v35  ;;  %v9564_v63 = vld [vmem:[#allocation43_spill] sm:$0xff] }
0x490e   :  { %v2591_v10 = vsel %vm2586_vm5, %v2582_v60, %v9557_v59  ;;  %v2592_v13 = vsel %vm2586_vm5, %v2583_v31, %v9558_v51  ;;  %v9561_v30 = vrot.slane %v8228_v33, %v7308_v3  ;;  %v9563_v9 = vrot.slane %v9562_v15, %v7308_v3  ;;  %v9566_v41 = vld [vmem:[#allocation35_spill] sm:$0xff] }
0x490f   :  { %v2600_v32 = vsel %vm2595_vm6, %v2591_v10, %v9559_v20  ;;  %v2601_v29 = vsel %vm2595_vm6, %v2592_v13, %v9560_v37  ;;  %v2593_v42 = vsel %vm2586_vm5, %v2584_v27, %v9564_v63  ;;  %v2594_v14 = vsel %vm2586_vm5, %v2585_v8, %v9565_v0  ;;  %v9580_v59 = vld [vmem:[#allocation23_spill] sm:$0xff]  ;;  %v9581_v37 = vld [vmem:[#allocation22_spill] sm:$0xff]  ;;  %v9582_v0 = vld [vmem:[#allocation21_spill] sm:$0xff] }
0x4910   :  { %v2609_v45 = vsel %vm2604_vm7, %v2600_v32, %v9561_v30  ;;  %v2610_v2 = vsel %vm2604_vm7, %v2601_v29, %v9563_v9  ;;  %v9567_v56 = vrot.slane %v9566_v41, %v7308_v3  ;;  %v9569_v33 = vrot.slane %v9568_v49, %v7308_v3  ;;  %2642 = vrot.lane.b32.xlu0 %v2624_v6, %s7216_s5  ;;  %v9579_v6 = vld [vmem:[#allocation25_spill] sm:$0xff] }
0x4911   :  { %v2602_v38 = vsel %vm2595_vm6, %v2593_v42, %v9570_v40  ;;  %v2603_v28 = vsel %vm2595_vm6, %v2594_v14, %v9571_v5  ;;  %2644 = vrot.lane.b32.xlu1 %v2625_v53, %s7216_s5  ;;  %v9573_v55 = vcombine.high %v9566_v41, %v9566_v41  ;;  %v9574_v43 = vcombine.high %v9568_v49, %v9568_v49 }
0x4912   :  { %v2618_v35 = vsel %vm2613_vm8, %v2609_v45, %v9567_v56  ;;  %v2619_v23 = vsel %vm2613_vm8, %v2610_v2, %v9569_v33  ;;  %v2611_v50 = vsel %vm2604_vm7, %v2602_v38, %v9572_v4  ;;  %v2612_v26 = vsel %vm2604_vm7, %v2603_v28, %v9575_v24  ;;  %v9583_v28 = vld [vmem:[#allocation20_spill] sm:$0xff] }
0x4913   :  { %v2546_v62 = vrot.slane %v9573_v55, %v7308_v3  ;;  %v2550_v36 = vrot.slane %v9574_v43, %v7308_v3  ;;  %v2626_v19 = vmul.f32 %v2618_v35, %v7542_v48  ;;  %v2627_v7 = vmul.f32 %v2619_v23, %v7542_v48  ;;  %v9584_v43 = vld [vmem:[#allocation19_spill] sm:$0xff] }
0x4914   :  { %v4567_v21 = vmul.f32 %v7094_v52, %v9576_v18  ;;  %v3707_v60 = vrot.slane %v9579_v6, %v8184_v54  ;;  %v3756_v10 = vrot.slane %v9580_v59, %v8184_v54  ;;  %v3805_v29 = vrot.slane %v9581_v37, %v8184_v54 }
0x4915   :  { %v2620_v11 = vsel %vm2613_vm8, %v2611_v50, %v2546_v62  ;;  %v2621_v12 = vsel %vm2613_vm8, %v2612_v26, %v2550_v36  ;;  %2646 = vrot.lane.b32.xlu0 %v2626_v19, %s7216_s5  ;;  %2648 = vrot.lane.b32.xlu1 %v2627_v7, %s7216_s5  ;;  %v3854_v14 = vrot.slane %v9582_v0, %v8184_v54 }
0x4916   :  { %v2628_v34 = vmul.f32 %v2620_v11, %v7542_v48  ;;  %v2629_v58 = vmul.f32 %v2621_v12, %v7542_v48  ;;  %v8637_v22 = vadd.f32 %v7095_v39, %v4567_v21  ;;  %v9578_v48 = vld [vmem:[#allocation34_spill] sm:$0xff]  ;;  %v3715_v20 = vcombine.high %v3707_v60, %v3707_v60 }
0x4917   :  { %v3634_v17 = vsub.f32 1.0, %v9578_v48  ;;  %v3640_v46 = vmul.f32 %v9578_v48, %v9579_v6  ;;  %v8655_v32 = vrot.slane %v3707_v60, %v8184_v54  ;;  %v3764_v15 = vcombine.high %v3756_v10, %v3756_v10 }
0x4918   :  { %v5364_v1 = vadd.f32 %v9577_v61, %v8637_v22  ;;  %v8663_v9 = vrot.slane %v3756_v10, %v8184_v54  ;;  %v3737_v2 = vrot.slane %v3715_v20, %v8184_v54  ;;  %v3813_v41 = vcombine.high %v3805_v29, %v3805_v29 }
0x4919   :  { %2650 = vrot.lane.b32.xlu0 %v2628_v34, %s7216_s5  ;;  %2652 = vrot.lane.b32.xlu1 %v2629_v58, %s7216_s5  ;;  %v4046_v63 = vrot.slane %v8655_v32, %v7308_v3  ;;  %v8672_v56 = vrot.slane %v3805_v29, %v8184_v54  ;;  %v3786_v23 = vrot.slane %v3764_v15, %v8184_v54 }
0x491a   :  { %v6367_v16 = vmul.f32 -1.442695, %v5364_v1  ;;  %v4086_v40 = vrot.slane %v8663_v9, %v7308_v3  ;;  %v3903_v4 = vrot.slane %v9583_v28, %v8184_v54  ;;  %v3747_v50 = vcombine.high %v3737_v2, %v3737_v2 }
0x491b   :  { %v4050_v55 = vrot.slane %v3737_v2, %v7308_v3  ;;  %v3952_v36 = vrot.slane %v9584_v43, %v8184_v54  ;;  %v3862_v24 = vcombine.high %v3854_v14, %v3854_v14  ;;  %v8688_v26 = vrot.slane %v3854_v14, %v8184_v54 }
0x491c   :  { %7082 = vpow2.f32 %v6367_v16  ;;  %v3835_v7 = vrot.slane %v3813_v41, %v8184_v54  ;;  %v4126_v11 = vrot.slane %v8672_v56, %v7308_v3  ;;  %v3796_v52 = vcombine.high %v3786_v23, %v3786_v23 }
0x491d   :  { %v4090_v18 = vrot.slane %v3786_v23, %v7308_v3  ;;  %v3911_v61 = vcombine.high %v3903_v4, %v3903_v4  ;;  %v8698_v1 = vrot.slane %v3903_v4, %v8184_v54  ;;  %v4058_v48 = vrot.slane %v3747_v50, %v7308_v3 }
0x491e   :  { %v3884_v16 = vrot.slane %v3862_v24, %v8184_v54 }
0x491f   :  { %v3933_v29 = vrot.slane %v3911_v61, %v8184_v54 }
0x4920   :  { %v4170_v15 = vrot.slane %v3884_v16, %v7308_v3 }
0x4921   :  { %v3943_v23 = vcombine.high %v3933_v29, %v3933_v29 }
0x4929   :  { %v7083_v5 = vpop.eup %7082 }
0x492a   :  { %v5368_v21 = vadd.f32 1.0, %v7083_v5 }
0x492c   :  { %7084 = vrcp.f32 %v5368_v21 }
0x4939   :  { %v8747_v61 = vpop.eup %7084 }
0x4972   :  { %v3637_v47 = vpop.permute.xlu0 %3636 }
0x4973   :  { %v3639_v25 = vmul.f32 %v3637_v47, %v3634_v17  ;;  %v9585_v47 = vld [vmem:[#allocation18_spill] sm:$0xff] }
0x4975   :  { %v8644_v57 = vadd.f32 %v3640_v46, %v3639_v25  ;;  %v4001_v25 = vrot.slane %v9585_v47, %v8184_v54  ;;  %v4166_v46 = vrot.slane %v8688_v26, %v7308_v3 }
0x4977   :  { %v3650_v44 = vrot.slane %v8644_v57, %v8184_v54 }
0x4979   :  { %v3658_v27 = vcombine.high %v3650_v44, %v3650_v44  ;;  %v8660_v8 = vrot.slane %v3650_v44, %v8184_v54  ;;  %v3960_v44 = vcombine.high %v3952_v36, %v3952_v36 }
0x497b   :  { %v3680_v35 = vrot.slane %v3658_v27, %v8184_v54  ;;  %v4323_v49 = vsel %vm2559_vm2, %v8660_v8, %v4046_v63  ;;  %v4206_v27 = vrot.slane %v8698_v1, %v7308_v3  ;;  %v4009_v63 = vcombine.high %v4001_v25, %v4001_v25 }
0x497c   :  { %v4331_v19 = vsel %vm2568_vm3, %v4323_v49, %v4086_v40  ;;  %v4210_v40 = vrot.slane %v3933_v29, %v7308_v3  ;;  %v3794_v29 = vcombine.high %v8663_v9, %v8663_v9 }
0x497d   :  { %v3690_v12 = vcombine.high %v3680_v35, %v3680_v35  ;;  %v4324_v34 = vsel %vm2559_vm2, %v3680_v35, %v4050_v55  ;;  %v4339_v17 = vsel %vm2577_vm4, %v4331_v19, %v4126_v11  ;;  %v3982_v35 = vrot.slane %v3960_v44, %v8184_v54 }
0x497e   :  { %v2639_v31 = vpop.permute.xlu0 %2638  ;;  %v2641_v53 = vpop.permute.xlu1 %2640  ;;  %v4332_v60 = vsel %vm2568_vm3, %v4324_v34, %v4090_v18  ;;  %v4347_v20 = vsel %vm2586_vm5, %v4339_v17, %v4166_v46  ;;  %v4031_v55 = vrot.slane %v4009_v63, %v8184_v54  ;;  %v4218_v11 = vrot.slane %v3943_v23, %v7308_v3  ;;  %v9586_v18 = vld [vmem:[#allocation17_spill] sm:$0xff]  ;;  %v9587_v17 = vld [vmem:[#allocation42_spill] sm:$0xff] }
0x497f   :  { %v2662_v51 = vsel %vm192_vm1, %v2639_v31, 0.0  ;;  %v2665_v13 = vsel %vm192_vm1, %v2641_v53, 0.0  ;;  %v3845_v31 = vcombine.high %v3835_v7, %v3835_v7  ;;  %v4130_v53 = vrot.slane %v3835_v7, %v7308_v3 }
0x4980   :  { %2663 = vadd.xlane.f32.xlu0 %v2662_v51  ;;  %2666 = vadd.xlane.f32.xlu1 %v2665_v13  ;;  %v4326_v10 = vsel %vm2559_vm2, %v3690_v12, %v4058_v48  ;;  %v8711_v51 = vrot.slane %v3952_v36, %v8184_v54  ;;  %v4098_v13 = vrot.slane %v3796_v52, %v7308_v3 }
0x4981   :  { %v4138_v14 = vrot.slane %v3845_v31, %v7308_v3  ;;  %v4355_v41 = vsel %vm2595_vm6, %v4347_v20, %v4206_v27  ;;  %v4250_v36 = vrot.slane %v3982_v35, %v7308_v3  ;;  %v3992_v24 = vcombine.high %v3982_v35, %v3982_v35 }
0x4982   :  { %v2643_v30 = vpop.permute.xlu0 %2642  ;;  %v4334_v2 = vsel %vm2568_vm3, %v4326_v10, %v4098_v13  ;;  %v4246_v49 = vrot.slane %v8711_v51, %v7308_v3  ;;  %v4290_v34 = vrot.slane %v4031_v55, %v7308_v3  ;;  %v3745_v10 = vcombine.high %v8655_v32, %v8655_v32 }
0x4983   :  { %v2645_v45 = vpop.permute.xlu1 %2644  ;;  %v2668_v42 = vsel %vm192_vm1, %v2643_v30, 0.0  ;;  %v4340_v30 = vsel %vm2577_vm4, %v4332_v60, %v4130_v53  ;;  %v3688_v13 = vcombine.high %v8660_v8, %v8660_v8  ;;  %v4094_v32 = vrot.slane %v3794_v29, %v7308_v3 }
0x4984   :  { %2669 = vadd.xlane.f32.xlu0 %v2668_v42  ;;  %v2671_v62 = vsel %vm192_vm1, %v2645_v45, 0.0  ;;  %v3894_v45 = vcombine.high %v3884_v16, %v3884_v16  ;;  %v8722_v42 = vrot.slane %v4001_v25, %v8184_v54  ;;  %v4363_v4 = vsel %vm2604_vm7, %v4355_v41, %v4246_v49 }
0x4985   :  { %v5375_v25 = vmul.f32 %v8747_v61, %v9587_v17  ;;  %v3892_v8 = vcombine.high %v8688_v26, %v8688_v26  ;;  %v3990_v35 = vcombine.high %v8711_v51, %v8711_v51  ;;  %v3700_v51 = vcombine.high %v9579_v6, %v9579_v6 }
0x4986   :  { %v4178_v5 = vrot.slane %v3894_v45, %v7308_v3  ;;  %v4286_v50 = vrot.slane %v8722_v42, %v7308_v3  ;;  %v3843_v45 = vcombine.high %v8672_v56, %v8672_v56  ;;  %v4039_v26 = vcombine.high %v8722_v42, %v8722_v42 }
0x4987   :  { %v2649_v33 = vpop.permute.xlu1 %2648  ;;  %v2647_v53 = vpop.permute.xlu0 %2646  ;;  %v4174_v56 = vrot.slane %v3892_v8, %v7308_v3  ;;  %v3643_v42 = vcombine.high %v8644_v57, %v8644_v57  ;;  %v3896_v57 = vcombine.high %v9583_v28, %v9583_v28 }
0x4988   :  { %v2677_v38 = vsel %vm192_vm1, %v2649_v33, 0.0  ;;  %2672 = vadd.xlane.f32.xlu0 %v2671_v62  ;;  %v4348_v33 = vsel %vm2586_vm5, %v4340_v30, %v4170_v15  ;;  %v4371_v7 = vsel %vm2613_vm8, %v4363_v4, %v4286_v50  ;;  %v2674_v20 = vsel %vm192_vm1, %v2647_v53, 0.0 }
0x4989   :  { %2678 = vadd.xlane.f32.xlu1 %v2677_v38  ;;  %v4342_v38 = vsel %vm2577_vm4, %v4334_v2, %v4138_v14  ;;  %v4356_v62 = vsel %vm2595_vm6, %v4348_v33, %v4210_v40  ;;  %v4379_v21 = vmul.f32 %v4371_v7, %v9586_v18  ;;  %v4054_v30 = vrot.slane %v3745_v10, %v7308_v3 }
0x498a   :  { %v4350_v19 = vsel %vm2586_vm5, %v4342_v38, %v4178_v5  ;;  %v4364_v12 = vsel %vm2604_vm7, %v4356_v62, %v4250_v36  ;;  %v4134_v9 = vrot.slane %v3843_v45, %v7308_v3  ;;  %v3941_v14 = vcombine.high %v8698_v1, %v8698_v1 }
0x498b   :  { %v2653_v58 = vpop.permute.xlu1 %2652  ;;  %v4358_v52 = vsel %vm2595_vm6, %v4350_v19, %v4218_v11  ;;  %v4372_v48 = vsel %vm2613_vm8, %v4364_v12, %v4290_v34  ;;  %v2651_v27 = vpop.permute.xlu0 %2650  ;;  %v4325_v15 = vsel %vm2559_vm2, %v3688_v13, %v4054_v30  ;;  %v4254_v40 = vrot.slane %v3990_v35, %v7308_v3 }
0x498c   :  { %v2683_v39 = vsel %vm192_vm1, %v2653_v58, 0.0  ;;  %v4041_v58 = vcombine.high %v4031_v55, %v4031_v55  ;;  %v4380_v60 = vmul.f32 %v4372_v48, %v9586_v18  ;;  %v2680_v2 = vsel %vm192_vm1, %v2651_v27, 0.0 }
0x498d   :  { %2684 = vadd.xlane.f32.xlu1 %v2683_v39  ;;  %v4258_v39 = vrot.slane %v3992_v24, %v7308_v3  ;;  %v4333_v63 = vsel %vm2568_vm3, %v4325_v15, %v4094_v32  ;;  %v4214_v33 = vrot.slane %v3941_v14, %v7308_v3  ;;  %v4294_v38 = vrot.slane %v4039_v26, %v7308_v3 }
0x498e   :  { %v4298_v46 = vrot.slane %v4041_v58, %v7308_v3  ;;  %v4341_v41 = vsel %vm2577_vm4, %v4333_v63, %v4134_v9  ;;  %v3749_v50 = vcombine.high %v9580_v59, %v9580_v59  ;;  %v3714_v62 = vrot.slane %v3700_v51, %v8184_v54 }
0x498f   :  { %v4366_v16 = vsel %vm2604_vm7, %v4358_v52, %v4258_v39  ;;  %v4349_v49 = vsel %vm2586_vm5, %v4341_v41, %v4174_v56  ;;  %v3798_v36 = vcombine.high %v9581_v37, %v9581_v37  ;;  %v3657_v24 = vrot.slane %v3643_v42, %v8184_v54 }
0x4990   :  { %v4374_v44 = vsel %vm2613_vm8, %v4366_v16, %v4298_v46  ;;  %v4357_v23 = vsel %vm2595_vm6, %v4349_v49, %v4214_v33  ;;  %v3994_v19 = vcombine.high %v9585_v47, %v9585_v47  ;;  %v3763_v6 = vrot.slane %v3749_v50, %v8184_v54 }
0x4991   :  { %v4382_v31 = vmul.f32 %v4374_v44, %v9586_v18  ;;  %v4365_v1 = vsel %vm2604_vm7, %v4357_v23, %v4254_v40  ;;  %v3716_v59 = vcombine.high %v3714_v62, %v3714_v62  ;;  %v3730_v11 = vrot.slane %v3714_v62, %v8184_v54 }
0x4992   :  { %v4373_v5 = vsel %vm2613_vm8, %v4365_v1, %v4294_v38  ;;  %v3847_v37 = vcombine.high %v9582_v0, %v9582_v0  ;;  %v3812_v34 = vrot.slane %v3798_v36, %v8184_v54  ;;  %v3659_v58 = vcombine.high %v3657_v24, %v3657_v24 }
0x4993   :  { %v4381_v4 = vmul.f32 %v4373_v5, %v9586_v18  ;;  %v3673_v47 = vrot.slane %v3657_v24, %v8184_v54  ;;  %v8822_v52 = vrot.slane %v3994_v19, %v8184_v54  ;;  %v3779_v39 = vrot.slane %v3763_v6, %v8184_v54 }
0x4994   :  { %v3945_v48 = vcombine.high %v9584_v43, %v9584_v43  ;;  %v3910_v17 = vrot.slane %v3896_v57, %v8184_v54  ;;  %v3744_v0 = vrot.slane %v3716_v59, %v8184_v54  ;;  %v3861_v46 = vrot.slane %v3847_v37, %v8184_v54 }
0x4995   :  { %v3828_v44 = vrot.slane %v3812_v34, %v8184_v54  ;;  %v4010_v43 = vcombine.high %v8822_v52, %v8822_v52  ;;  %v4102_v13 = vrot.slane %v3779_v39, %v7308_v3  ;;  %v3746_v30 = vcombine.high %v3730_v11, %v3730_v11 }
0x4996   :  { %v3959_v29 = vrot.slane %v3945_v48, %v8184_v54  ;;  %v3912_v27 = vcombine.high %v3910_v17, %v3910_v17  ;;  %v4066_v45 = vrot.slane %v3744_v0, %v7308_v3  ;;  %v3877_v32 = vrot.slane %v3861_v46, %v8184_v54 }
0x4997   :  { %v4142_v14 = vrot.slane %v3828_v44, %v7308_v3  ;;  %v3689_v41 = vcombine.high %v3673_v47, %v3673_v47  ;;  %v3926_v35 = vrot.slane %v3910_v17, %v8184_v54  ;;  %v3795_v49 = vcombine.high %v3779_v39, %v3779_v39 }
0x4998   :  { %v3748_v23 = vcombine.high %v3744_v0, %v3744_v0  ;;  %v4070_v40 = vrot.slane %v3746_v30, %v7308_v3  ;;  %v3961_v38 = vcombine.high %v3959_v29, %v3959_v29  ;;  %v3844_v42 = vcombine.high %v3828_v44, %v3828_v44 }
0x4999   :  { %v3975_v24 = vrot.slane %v3959_v29, %v8184_v54  ;;  %v3940_v59 = vrot.slane %v3912_v27, %v8184_v54  ;;  %v4222_v37 = vrot.slane %v3926_v35, %v7308_v3  ;;  %v4024_v39 = vrot.slane %v8822_v52, %v8184_v54 }
0x499a   :  { %v4329_v36 = vsel %vm2559_vm2, %v3689_v41, %v4070_v40  ;;  %v4150_v17 = vrot.slane %v3844_v42, %v7308_v3  ;;  %v3989_v44 = vrot.slane %v3961_v38, %v8184_v54 }
0x499c   :  { %v3993_v38 = vcombine.high %v3989_v44, %v3989_v44 }
0x499e   :  { %4395 = vrot.lane.b32.xlu1 %v4379_v21, %s7216_s5  ;;  %5377 = vrot.lane.b32.xlu0 %v5375_v25, %s7215_s26  ;;  %v3765_v21 = vcombine.high %v3763_v6, %v3763_v6  ;;  %v4062_v25 = vrot.slane %v3730_v11, %v7308_v3  ;;  %v4110_v6 = vrot.slane %v3795_v49, %v7308_v3 }
0x499f   :  { %v4074_v11 = vrot.slane %v3748_v23, %v7308_v3  ;;  %v3944_v49 = vcombine.high %v3940_v59, %v3940_v59  ;;  %v4040_v23 = vcombine.high %v4024_v39, %v4024_v39 }
0x49a0   :  { %v4327_v53 = vsel %vm2559_vm2, %v3673_v47, %v4062_v25  ;;  %v3793_v10 = vrot.slane %v3765_v21, %v8184_v54  ;;  %v4337_v21 = vsel %vm2568_vm3, %v4329_v36, %v4110_v6 }
0x49a1   :  { %v4335_v8 = vsel %vm2568_vm3, %v4327_v53, %v4102_v13  ;;  %v3942_v53 = vcombine.high %v3926_v35, %v3926_v35  ;;  %v4345_v13 = vsel %vm2577_vm4, %v4337_v21, %v4150_v17 }
0x49a2   :  { %4397 = vrot.lane.b32.xlu1 %v4380_v60, %s7216_s5  ;;  %v3814_v60 = vcombine.high %v3812_v34, %v3812_v34  ;;  %v4106_v33 = vrot.slane %v3793_v10, %v7308_v3  ;;  %v3797_v19 = vcombine.high %v3793_v10, %v3793_v10  ;;  %v4226_v10 = vrot.slane %v3940_v59, %v7308_v3 }
0x49a3   :  { %v4230_v35 = vrot.slane %v3942_v53, %v7308_v3 }
0x49a4   :  { %v3842_v9 = vrot.slane %v3814_v60, %v8184_v54  ;;  %v4262_v60 = vrot.slane %v3975_v24, %v7308_v3 }
0x49a6   :  { %4401 = vrot.lane.b32.xlu1 %v4382_v31, %s7216_s5  ;;  %v3687_v31 = vrot.slane %v3659_v58, %v8184_v54  ;;  %v4146_v50 = vrot.slane %v3842_v9, %v7308_v3  ;;  %v3893_v58 = vcombine.high %v3877_v32, %v3877_v32  ;;  %v3846_v48 = vcombine.high %v3842_v9, %v3842_v9 }
0x49a7   :  { %v3991_v9 = vcombine.high %v3975_v24, %v3975_v24 }
0x49a8   :  { %v4328_v56 = vsel %vm2559_vm2, %v3687_v31, %v4066_v45  ;;  %v3691_v62 = vcombine.high %v3687_v31, %v3687_v31  ;;  %v4190_v27 = vrot.slane %v3893_v58, %v7308_v3 }
0x49a9   :  { %v4336_v51 = vsel %vm2568_vm3, %v4328_v56, %v4106_v33 }
0x49aa   :  { %v4344_v34 = vsel %vm2577_vm4, %v4336_v51, %v4146_v50  ;;  %v4330_v0 = vsel %vm2559_vm2, %v3691_v62, %v4074_v11  ;;  %v4234_v51 = vrot.slane %v3944_v49, %v7308_v3  ;;  %v4310_v50 = vrot.slane %v4040_v23, %v7308_v3 }
0x49bd   :  { %2675 = vadd.xlane.f32.xlu0 %v2674_v20 }
0x49c1   :  { %2681 = vadd.xlane.f32.xlu0 %v2680_v2  ;;  %v3863_v2 = vcombine.high %v3861_v46, %v3861_v46  ;;  %v4114_v46 = vrot.slane %v3797_v19, %v7308_v3  ;;  %v4274_v19 = vrot.slane %v3993_v38, %v7308_v3 }
0x49c3   :  { %v3891_v5 = vrot.slane %v3863_v2, %v8184_v54  ;;  %v4338_v30 = vsel %vm2568_vm3, %v4330_v0, %v4114_v46  ;;  %v4302_v2 = vrot.slane %v4024_v39, %v7308_v3  ;;  %v9588_v46 = vld [vmem:[#allocation26_spill] sm:$0xff] }
0x49c4   :  { %v5749_v53 = vrot.slane %v9588_v46, %v8184_v54 }
0x49c5   :  { %v4186_v47 = vrot.slane %v3891_v5, %v7308_v3  ;;  %v3895_v29 = vcombine.high %v3891_v5, %v3891_v5 }
0x49c7   :  { %v4352_v31 = vsel %vm2586_vm5, %v4344_v34, %v4186_v47 }
0x49d7   :  { %4399 = vrot.lane.b32.xlu0 %v4381_v4, %s7216_s5  ;;  %v4182_v4 = vrot.slane %v3877_v32, %v7308_v3  ;;  %v4038_v32 = vrot.slane %v4010_v43, %v8184_v54  ;;  %v4194_v43 = vrot.slane %v3895_v29, %v7308_v3 }
0x49d9   :  { %v4042_v62 = vcombine.high %v4038_v32, %v4038_v32 }
0x49db   :  { %v4314_v59 = vrot.slane %v4042_v62, %v7308_v3  ;;  %v9593_v62 = vld [vmem:[#allocation30_spill] sm:$0xff] }
0x4a09   :  { %v8801_v55 = vpop.xlane.xlu0 %2663  ;;  %v8810_v7 = vpop.xlane.xlu1 %2666 }
0x4a0d   :  { %v8815_v12 = vpop.xlane.xlu0 %2669 }
0x4a11   :  { %v8832_v16 = vpop.xlane.xlu0 %2672 }
0x4a12   :  { %v8825_v28 = vpop.xlane.xlu1 %2678 }
0x4a15   :  { %v5378_v15 = vpop.permute.xlu0 %5377 }
0x4a16   :  { %v8842_v20 = vpop.xlane.xlu1 %2684  ;;  %v5380_v63 = vadd.f32 %v5378_v15, %v8637_v22  ;;  %v4343_v22 = vsel %vm2577_vm4, %v4335_v8, %v4142_v14  ;;  %v4154_v15 = vrot.slane %v3846_v48, %v7308_v3  ;;  %v4360_v8 = vsel %vm2595_vm6, %v4352_v31, %v4226_v10 }
0x4a17   :  { %v4351_v57 = vsel %vm2586_vm5, %v4343_v22, %v4182_v4  ;;  %v4353_v14 = vsel %vm2586_vm5, %v4345_v13, %v4190_v27  ;;  %v4270_v22 = vrot.slane %v3991_v9, %v7308_v3  ;;  %v5757_v27 = vcombine.high %v5749_v53, %v5749_v53 }
0x4a18   :  { %7086 = vtanh.f32 %v5380_v63  ;;  %v4359_v25 = vsel %vm2595_vm6, %v4351_v57, %v4222_v37  ;;  %v4266_v63 = vrot.slane %v3989_v44, %v7308_v3  ;;  %v4346_v33 = vsel %vm2577_vm4, %v4338_v30, %v4154_v15  ;;  %v9589_v44 = vld [vmem:[#allocation27_spill] sm:$0xff] }
0x4a19   :  { %v4367_v45 = vsel %vm2604_vm7, %v4359_v25, %v4262_v60  ;;  %v4361_v40 = vsel %vm2595_vm6, %v4353_v14, %v4230_v35  ;;  %v4354_v5 = vsel %vm2586_vm5, %v4346_v33, %v4194_v43  ;;  %v5693_v31 = vcombine.high %v9589_v44, %v9589_v44  ;;  %v9591_v33 = vld [vmem:[#allocation31_spill] sm:$0xff] }
0x4a1a   :  { %v4396_v26 = vpop.permute.xlu1 %4395  ;;  %v4375_v56 = vsel %vm2613_vm8, %v4367_v45, %v4302_v2  ;;  %v4368_v52 = vsel %vm2604_vm7, %v4360_v8, %v4266_v63  ;;  %v4369_v42 = vsel %vm2604_vm7, %v4361_v40, %v4270_v22  ;;  %v4362_v36 = vsel %vm2595_vm6, %v4354_v5, %v4234_v51  ;;  %v9590_v63 = vld [vmem:[#allocation32_spill] sm:$0xff] }
0x4a1b   :  { %v4419_v1 = vsel %vm192_vm1, %v4396_v26, 0.0  ;;  %v4306_v26 = vrot.slane %v4038_v32, %v7308_v3  ;;  %v4377_v6 = vsel %vm2613_vm8, %v4369_v42, %v4310_v50  ;;  %v4370_v57 = vsel %vm2604_vm7, %v4362_v36, %v4274_v19 }
0x4a1c   :  { %4420 = vadd.xlane.f32.xlu0 %v4419_v1  ;;  %v4383_v1 = vmul.f32 %v4375_v56, %v9586_v18  ;;  %v4385_v11 = vmul.f32 %v4377_v6, %v9586_v18  ;;  %v4378_v37 = vsel %vm2613_vm8, %v4370_v57, %v4314_v59  ;;  %v5707_v13 = vrot.slane %v5693_v31, %v8184_v54 }
0x4a1d   :  { %v4376_v4 = vsel %vm2613_vm8, %v4368_v52, %v4306_v26  ;;  %v4386_v34 = vmul.f32 %v4378_v37, %v9586_v18  ;;  %v5700_v29 = vrot.slane %v9589_v44, %v8184_v54  ;;  %v8940_v30 = vrot.slane %v5749_v53, %v8184_v54  ;;  %v9592_v26 = vld [vmem:[#allocation28_spill] sm:$0xff] }
0x4a1e   :  { %v4384_v24 = vmul.f32 %v4376_v4, %v9586_v18  ;;  %v4398_v47 = vpop.permute.xlu1 %4397  ;;  %v5742_v18 = vcombine.high %v9588_v46, %v9588_v46  ;;  %v5709_v15 = vcombine.high %v5707_v13, %v5707_v13  ;;  %v8946_v32 = vrot.slane %v5757_v27, %v8184_v54 }
0x4a1f   :  { %v4422_v25 = vsel %vm192_vm1, %v4398_v47, 0.0  ;;  %v5708_v2 = vcombine.high %v5700_v29, %v5700_v29  ;;  %v5787_v8 = vcombine.high %v8940_v30, %v8940_v30  ;;  %v5448_v9 = vcombine.high %v9590_v63, %v9590_v63 }
0x4a20   :  { %v5756_v60 = vrot.slane %v5742_v18, %v8184_v54  ;;  %v8958_v56 = vrot.slane %v5709_v15, %v8184_v54  ;;  %v5497_v52 = vcombine.high %v9591_v33, %v9591_v33  ;;  %v5644_v23 = vcombine.high %v9592_v26, %v9592_v26 }
0x4a21   :  { %v8964_v49 = vrot.slane %v5708_v2, %v8184_v54  ;;  %v8973_v40 = vrot.slane %v5448_v9, %v8184_v54  ;;  %v8978_v22 = vrot.slane %v5787_v8, %v7308_v3  ;;  %v8981_v38 = vrot.slane %v5707_v13, %v8184_v54 }
0x4a22   :  { %v4402_v17 = vpop.permute.xlu1 %4401  ;;  %v5758_v10 = vcombine.high %v5756_v60, %v5756_v60  ;;  %v8961_v35 = vrot.slane %v5756_v60, %v8184_v54  ;;  %v5651_v5 = vrot.slane %v9592_v26, %v8184_v54  ;;  %v5382_v4 = vsub.f32 1.0, %v8747_v61 }
0x4a23   :  { %v4428_v0 = vsel %vm192_vm1, %v4402_v17, 0.0  ;;  %v5546_v36 = vcombine.high %v9593_v62, %v9593_v62  ;;  %v5741_v19 = vcombine.high %v8958_v56, %v8958_v56  ;;  %v9000_v57 = vrot.slane %v5497_v52, %v8184_v54 }
0x4a24   :  { %v8943_v45 = vrot.slane %v5758_v10, %v8184_v54  ;;  %v5388_v59 = vmul.f32 %v8747_v61, %v9590_v63  ;;  %v5658_v37 = vrot.slane %v5644_v23, %v8184_v54  ;;  %v5659_v17 = vcombine.high %v5651_v5, %v5651_v5 }
0x4a25   :  { %v7087_v41 = vpop.eup %7086  ;;  %v9017_v46 = vrot.slane %v5546_v36, %v8184_v54  ;;  %v5504_v18 = vrot.slane %v9591_v33, %v8184_v54  ;;  %v9022_v44 = vrot.slane %v5741_v19, %v7308_v3  ;;  %v5513_v53 = vcombine.high %v9000_v57, %v9000_v57 }
0x4a26   :  { %5384 = vrot.lane.b32.xlu1 %v7087_v41, %s7216_s5  ;;  %v5790_v14 = vcombine.high %v8943_v45, %v8943_v45  ;;  %v8955_v41 = vrot.slane %v5700_v29, %v8184_v54  ;;  %v5660_v27 = vcombine.high %v5658_v37, %v5658_v37  ;;  %v9044_v9 = vrot.slane %v5659_v17, %v8184_v54 }
0x4a27   :  { %v5553_v26 = vrot.slane %v9593_v62, %v8184_v54  ;;  %v5562_v23 = vcombine.high %v9017_v46, %v9017_v46  ;;  %v9066_v36 = vrot.slane %v5513_v53, %v8184_v54 }
0x4a28   :  { %v8987_v51 = vrot.slane %v5790_v14, %v7308_v3  ;;  %v5738_v42 = vcombine.high %v8955_v41, %v8955_v41 }
0x4a29   :  { %v9086_v17 = vrot.slane %v5553_v26, %v8184_v54 }
0x4a2a   :  { %4403 = vrot.lane.b32.xlu1 %v4383_v1, %s7216_s5  ;;  %v9025_v31 = vrot.slane %v5738_v42, %v7308_v3  ;;  %v9063_v42 = vrot.slane %v5504_v18, %v8184_v54 }
0x4a2b   :  { %v5874_v61 = vrot.slane %v9086_v17, %v7308_v3  ;;  %v5591_v50 = vcombine.high %v9086_v17, %v9086_v17 }
0x4a2e   :  { %4405 = vrot.lane.b32.xlu1 %v4384_v24, %s7216_s5 }
0x4a32   :  { %4407 = vrot.lane.b32.xlu1 %v4385_v11, %s7216_s5 }
0x4a36   :  { %4409 = vrot.lane.b32.xlu1 %v4386_v34, %s7216_s5  ;;  %v9594_v34 = vld [vmem:[#allocation29_spill] sm:$0xff] }
0x4a37   :  { %v5595_v47 = vcombine.high %v9594_v34, %v9594_v34  ;;  %v9053_v52 = vrot.slane %v9594_v34, %v8184_v54  ;;  %v9078_v34 = vrot.slane %v5660_v27, %v8184_v54 }
0x4a39   :  { %v9032_v15 = vrot.slane %v5595_v47, %v8184_v54 }
0x4a3b   :  { %v5611_v62 = vcombine.high %v9032_v15, %v9032_v15 }
0x4a46   :  { %v8922_v58 = vpop.xlane.xlu0 %2675 }
0x4a4a   :  { %v8924_v21 = vpop.xlane.xlu0 %2681 }
0x4a4e   :  { %v4400_v39 = vpop.permute.xlu0 %4399 }
0x4a4f   :  { %v4425_v48 = vsel %vm192_vm1, %v4400_v39, 0.0  ;;  %v5455_v39 = vrot.slane %v9590_v63, %v8184_v54  ;;  %v9041_v63 = vrot.slane %v5658_v37, %v8184_v54 }
0x4a50   :  { %4426 = vadd.xlane.f32.xlu0 %v4425_v48  ;;  %v5464_v48 = vcombine.high %v8973_v40, %v8973_v40 }
0x4a51   :  { %v9035_v2 = vrot.slane %v5455_v39, %v8184_v54 }
0x4a52   :  { %v9038_v8 = vrot.slane %v5464_v48, %v8184_v54 }
0x4a54   :  { %4429 = vadd.xlane.f32.xlu0 %v4428_v0  ;;  %v9012_v0 = vrot.slane %v5651_v5, %v8184_v54 }
0x4a56   :  { %v5954_v47 = vrot.slane %v9012_v0, %v7308_v3 }
0x4a5a   :  { %4423 = vadd.xlane.f32.xlu1 %v4422_v25 }
0x4a98   :  { %v5385_v24 = vpop.permute.xlu1 %5384 }
0x4a99   :  { %v5387_v11 = vmul.f32 %v5385_v24, %v5382_v4  ;;  %v5463_v24 = vcombine.high %v5455_v39, %v5455_v39 }
0x4a9b   :  { %v5389_v25 = vadd.f32 %v5388_v59, %v5387_v11  ;;  %v5496_v59 = vcombine.high %v9038_v8, %v9038_v8  ;;  %v5794_v11 = vrot.slane %v9035_v2, %v7308_v3  ;;  %v9098_v27 = vrot.slane %v5463_v24, %v8184_v54 }
0x4a9c   :  { %v4404_v60 = vpop.permute.xlu1 %4403 }
0x4a9d   :  { %v5391_v10 = vcombine.high %v5389_v25, %v5389_v25  ;;  %v5398_v13 = vrot.slane %v5389_v25, %v8184_v54  ;;  %v4431_v29 = vsel %vm192_vm1, %v4404_v60, 0.0  ;;  %v9089_v25 = vrot.slane %v5562_v23, %v8184_v54 }
0x4a9e   :  { %4432 = vadd.xlane.f32.xlu0 %v4431_v29  ;;  %v5512_v60 = vcombine.high %v5504_v18, %v5504_v18  ;;  %v5545_v29 = vcombine.high %v9066_v36, %v9066_v36  ;;  %v9106_v18 = vrot.slane %v9053_v52, %v8184_v54  ;;  %v5495_v17 = vcombine.high %v9098_v27, %v9098_v27 }
0x4a9f   :  { %v9049_v33 = vrot.slane %v5391_v10, %v8184_v54  ;;  %v9060_v5 = vrot.slane %v5398_v13, %v8184_v54  ;;  %v5406_v39 = vcombine.high %v5398_v13, %v5398_v13  ;;  %v5834_v13 = vrot.slane %v9063_v42, %v7308_v3 }
0x4aa0   :  { %v4406_v4 = vpop.permute.xlu1 %4405  ;;  %v5594_v23 = vcombine.high %v9089_v25, %v9089_v25  ;;  %v9122_v43 = vrot.slane %v5512_v60, %v8184_v54 }
0x4aa1   :  { %v5407_v19 = vcombine.high %v9049_v33, %v9049_v33  ;;  %v4434_v37 = vsel %vm192_vm1, %v4406_v4, 0.0  ;;  %v6071_v53 = vsel %vm2559_vm2, %v9060_v5, %v5794_v11  ;;  %v5822_v11 = vrot.slane %v5496_v59, %v7308_v3 }
0x4aa2   :  { %4435 = vadd.xlane.f32.xlu1 %v4434_v37  ;;  %v5561_v37 = vcombine.high %v5553_v26, %v5553_v26  ;;  %v9113_v6 = vrot.slane %v5406_v39, %v8184_v54  ;;  %v6079_v24 = vsel %vm2568_vm3, %v6071_v53, %v5834_v13  ;;  %v5862_v59 = vrot.slane %v5545_v29, %v7308_v3 }
0x4aa3   :  { %v9083_v48 = vrot.slane %v5407_v19, %v8184_v54  ;;  %v9109_v19 = vrot.slane %v5611_v62, %v8184_v54  ;;  %v5493_v39 = vcombine.high %v9035_v2, %v9035_v2  ;;  %v5798_v53 = vrot.slane %v9098_v27, %v7308_v3 }
0x4aa4   :  { %v4408_v10 = vpop.permute.xlu1 %4407  ;;  %v5610_v13 = vcombine.high %v9053_v52, %v9053_v52  ;;  %v9139_v29 = vrot.slane %v5561_v37, %v8184_v54  ;;  %v5436_v2 = vcombine.high %v9060_v5, %v9060_v5  ;;  %v5902_v14 = vrot.slane %v5594_v23, %v7308_v3 }
0x4aa5   :  { %v5439_v4 = vcombine.high %v9083_v48, %v9083_v48  ;;  %v4437_v1 = vsel %vm192_vm1, %v4408_v10, 0.0  ;;  %v5643_v60 = vcombine.high %v9109_v19, %v9109_v19  ;;  %v5838_v37 = vrot.slane %v9122_v43, %v7308_v3 }
0x4aa6   :  { %4438 = vadd.xlane.f32.xlu0 %v4437_v1  ;;  %v5914_v1 = vrot.slane %v9106_v18, %v7308_v3  ;;  %v9157_v5 = vrot.slane %v8973_v40, %v8184_v54  ;;  %v5878_v40 = vrot.slane %v9139_v29, %v7308_v3  ;;  %v5882_v27 = vrot.slane %v5591_v50, %v7308_v3 }
0x4aa7   :  { %v6078_v62 = vsel %vm2559_vm2, %v5439_v4, %v5822_v11  ;;  %v6087_v4 = vsel %vm2577_vm4, %v6079_v24, %v5874_v61  ;;  %v6072_v11 = vsel %vm2559_vm2, %v9113_v6, %v5798_v53  ;;  %v5542_v61 = vcombine.high %v9063_v42, %v9063_v42 }
0x4aa8   :  { %v4410_v26 = vpop.permute.xlu1 %4409  ;;  %v6086_v52 = vsel %vm2568_vm3, %v6078_v62, %v5862_v59  ;;  %v5958_v24 = vrot.slane %v9044_v9, %v7308_v3  ;;  %v5802_v62 = vrot.slane %v5493_v39, %v7308_v3  ;;  %v6095_v59 = vsel %vm2586_vm5, %v6087_v4, %v5914_v1 }
0x4aa9   :  { %v4440_v10 = vsel %vm192_vm1, %v4410_v26, 0.0  ;;  %v5692_v26 = vcombine.high %v9078_v34, %v9078_v34  ;;  %v9162_v53 = vrot.slane %v5610_v13, %v8184_v54  ;;  %v6080_v23 = vsel %vm2568_vm3, %v6072_v11, %v5838_v37 }
0x4aaa   :  { %4441 = vadd.xlane.f32.xlu1 %v4440_v10  ;;  %v5942_v42 = vrot.slane %v5643_v60, %v7308_v3  ;;  %v6094_v10 = vsel %vm2577_vm4, %v6086_v52, %v5902_v14  ;;  %v9173_v39 = vrot.slane %v9049_v33, %v8184_v54  ;;  %v6073_v1 = vsel %vm2559_vm2, %v5436_v2, %v5802_v62 }
0x4aab   :  { %v9178_v13 = vrot.slane %v9000_v57, %v8184_v54  ;;  %v5842_v60 = vrot.slane %v5542_v61, %v7308_v3  ;;  %v6103_v14 = vsel %vm2595_vm6, %v6095_v59, %v5954_v47  ;;  %v5982_v4 = vrot.slane %v5692_v26, %v7308_v3 }
0x4aac   :  { %v5810_v11 = vrot.slane %v9157_v5, %v7308_v3  ;;  %v6102_v33 = vsel %vm2586_vm5, %v6094_v10, %v5942_v42  ;;  %v6088_v2 = vsel %vm2577_vm4, %v6080_v23, %v5878_v40  ;;  %v5640_v57 = vcombine.high %v9106_v18, %v9106_v18 }
0x4aad   :  { %v5918_v52 = vrot.slane %v9162_v53, %v7308_v3  ;;  %v9195_v47 = vrot.slane %v9017_v46, %v8184_v54  ;;  %v6081_v26 = vsel %vm2568_vm3, %v6073_v1, %v5842_v60  ;;  %v5438_v61 = vcombine.high %v9113_v6, %v9113_v6 }
0x4aae   :  { %v6075_v37 = vsel %vm2559_vm2, %v9173_v39, %v5810_v11  ;;  %v9595_v18 = vrot.slane %v8955_v41, %v7308_v3  ;;  %v5544_v59 = vcombine.high %v9122_v43, %v9122_v43  ;;  %v5850_v46 = vrot.slane %v9178_v13, %v7308_v3 }
0x4aaf   :  { %v6110_v23 = vsel %vm2595_vm6, %v6102_v33, %v5982_v4  ;;  %v6096_v50 = vsel %vm2586_vm5, %v6088_v2, %v5918_v52  ;;  %v9596_v6 = vcombine.high %v9012_v0, %v9012_v0  ;;  %v9219_v41 = vrot.slane %v9032_v15, %v8184_v54  ;;  %v9598_v52 = vld [vmem:[#allocation24_spill] sm:$0xff] }
0x4ab0   :  { %v6111_v62 = vsel %vm2604_vm7, %v6103_v14, %v9595_v18  ;;  %v5806_v10 = vrot.slane %v5495_v17, %v7308_v3  ;;  %v6089_v43 = vsel %vm2577_vm4, %v6081_v26, %v5882_v27  ;;  %v5922_v40 = vrot.slane %v5640_v57, %v7308_v3 }
0x4ab1   :  { %v5962_v42 = vrot.slane %v9596_v6, %v7308_v3  ;;  %v5593_v1 = vcombine.high %v9139_v29, %v9139_v29  ;;  %v6083_v60 = vsel %vm2568_vm3, %v6075_v37, %v5850_v46  ;;  %v9597_v14 = vrot.slane %v8940_v30, %v7308_v3 }
0x4ab2   :  { %v5890_v54 = vrot.slane %v9195_v47, %v7308_v3  ;;  %v6074_v15 = vsel %vm2559_vm2, %v5438_v61, %v5806_v10  ;;  %v6118_v4 = vsel %vm2604_vm7, %v6110_v23, %v9022_v44  ;;  %v6104_v17 = vsel %vm2595_vm6, %v6096_v50, %v5958_v24 }
0x4ab3   :  { %v6119_v0 = vsel %vm2613_vm8, %v6111_v62, %v9597_v14  ;;  %v5970_v29 = vrot.slane %v9041_v63, %v7308_v3  ;;  %v5846_v11 = vrot.slane %v5544_v59, %v7308_v3  ;;  %v5494_v30 = vcombine.high %v9157_v5, %v9157_v5 }
0x4ab4   :  { %v6097_v33 = vsel %vm2586_vm5, %v6089_v43, %v5922_v40  ;;  %v5642_v2 = vcombine.high %v9162_v53, %v9162_v53  ;;  %v5814_v57 = vrot.slane %v9038_v8, %v7308_v3  ;;  %v6127_v44 = vmul.f32 %v6119_v0, %v9598_v52  ;;  %v9261_v8 = vld [vmem:[%s9458_s1] sm:$0xff] }
0x4ab5   :  { %v6091_v24 = vsel %vm2577_vm4, %v6083_v60, %v5890_v54  ;;  %v5930_v26 = vrot.slane %v9219_v41, %v7308_v3  ;;  %v6082_v27 = vsel %vm2568_vm3, %v6074_v15, %v5846_v11  ;;  %v6126_v5 = vsel %vm2613_vm8, %v6118_v4, %v8987_v51 }
0x4ab6   :  { %v9599_v61 = vrot.slane %v8964_v49, %v7308_v3  ;;  %v5886_v37 = vrot.slane %v5593_v1, %v7308_v3  ;;  %v5437_v18 = vcombine.high %v9173_v39, %v9173_v39  ;;  %v6076_v62 = vsel %vm2559_vm2, %v9083_v48, %v5814_v57 }
0x4ab7   :  { %v6105_v51 = vsel %vm2595_vm6, %v6097_v33, %v5962_v42  ;;  %v5543_v59 = vcombine.high %v9178_v13, %v9178_v13  ;;  %v5854_v46 = vrot.slane %v9066_v36, %v7308_v3  ;;  %v5818_v23 = vrot.slane %v5494_v30, %v7308_v3  ;;  %v7096_v36 = vld [vmem:[%s9468_s11] ss:$0 sm:$0xff] }
0x4ab8   :  { %v6112_v53 = vsel %vm2604_vm7, %v6104_v17, %v9599_v61  ;;  %v6099_v50 = vsel %vm2586_vm5, %v6091_v24, %v5930_v26  ;;  %v6134_v6 = vmul.f32 %v6126_v5, %v9598_v52  ;;  %v9600_v39 = vrot.slane %v8946_v32, %v7308_v3 }
0x4ab9   :  { %vm2698_vm9 = vcmp.eq.s32.totalorder %v9261_v8, 0  ;;  %v6090_v42 = vsel %vm2577_vm4, %v6082_v27, %v5886_v37  ;;  %v5926_v13 = vrot.slane %v5642_v2, %v7308_v3  ;;  %v6084_v10 = vsel %vm2568_vm3, %v6076_v62, %v5854_v46 }
0x4aba   :  { %v6120_v48 = vsel %vm2613_vm8, %v6112_v53, %v9600_v39  ;;  %v6113_v43 = vsel %vm2604_vm7, %v6105_v51, %v9025_v31  ;;  %v6010_v40 = vrot.slane %v8981_v38, %v7308_v3  ;;  %v5592_v1 = vcombine.high %v9195_v47, %v9195_v47 }
0x4abb   :  { %6143 = vrot.lane.b32.xlu1 %v6127_v44, %s7216_s5  ;;  %v5894_v60 = vrot.slane %v9089_v25, %v7308_v3  ;;  %v6077_v14 = vsel %vm2559_vm2, %v5437_v18, %v5818_v23  ;;  %v6107_v0 = vsel %vm2595_vm6, %v6099_v50, %v5970_v29  ;;  %v5858_v54 = vrot.slane %v5543_v59, %v7308_v3 }
0x4abc   :  { %2687 = vperm.xlu0 %6895, %v7096_v36   ;;  %v6128_v15 = vmul.f32 %v6120_v48, %v9598_v52  ;;  %v9601_v31 = vmov 0   ;;  %v6098_v17 = vsel %vm2586_vm5, %v6090_v42, %v5926_v13  ;;  %v6121_v47 = vsel %vm2613_vm8, %v6113_v43, %v8978_v22 }
0x4abd   :  { %v2699_v4 = vsel %vm2698_vm9, 1, %v9601_v31  ;;  %v9602_v25 = vcombine.high %v9044_v9, %v9044_v9  ;;  %v6092_v30 = vsel %vm2577_vm4, %v6084_v10, %v5894_v60  ;;  %v5641_v29 = vcombine.high %v9219_v41, %v9219_v41 }
0x4abe   :  { %v5934_v33 = vrot.slane %v9109_v19, %v7308_v3  ;;  %v6085_v2 = vsel %vm2568_vm3, %v6077_v14, %v5858_v54  ;;  %v6115_v57 = vsel %vm2604_vm7, %v6107_v0, %v6010_v40  ;;  %v5898_v22 = vrot.slane %v5592_v1, %v7308_v3  ;;  %v4421_v40 = vpop.xlane.xlu0 %4420 }
0x4abf   :  { %6157 = vrot.lane.b32.xlu1 %v6134_v6, %s7216_s5  ;;  %v5966_v11 = vrot.slane %v9602_v25, %v7308_v3  ;;  %v6050_v9 = vrot.slane %v8961_v35, %v7308_v3  ;;  %v5789_v44 = vcombine.high %v8946_v32, %v8946_v32  ;;  %v6129_v24 = vmul.f32 %v6121_v47, %v9598_v52 }
0x4ac0   :  { %6145 = vrot.lane.b32.xlu0 %v6128_v15, %s7216_s5  ;;  %v9603_v19 = vcombine.high %v8964_v49, %v8964_v49  ;;  %v6100_v27 = vsel %vm2586_vm5, %v6092_v30, %v5934_v33  ;;  %v5690_v5 = vcombine.high %v9041_v63, %v9041_v63  ;;  %v5974_v53 = vrot.slane %v9078_v34, %v7308_v3  ;;  %v7097_v49 = vld [vmem:[%s9468_s11 + $0x1] ss:$0 sm:$0xff] }
0x4ac1   :  { %v6106_v41 = vsel %vm2595_vm6, %v6098_v17, %v5966_v11  ;;  %v6123_v61 = vsel %vm2613_vm8, %v6115_v57, %v6050_v9  ;;  %v6093_v32 = vsel %vm2577_vm4, %v6085_v2, %v5898_v22  ;;  %v5938_v37 = vrot.slane %v5641_v29, %v7308_v3  ;;  %v9605_v9 = vld [vmem:[#allocation15_spill] sm:$0xff] }
0x4ac2   :  { %v6006_v26 = vrot.slane %v9603_v19, %v7308_v3  ;;  %v6046_v63 = vrot.slane %v5789_v44, %v7308_v3  ;;  %v6108_v62 = vsel %vm2595_vm6, %v6100_v27, %v5974_v53  ;;  %v5739_v34 = vcombine.high %v8981_v38, %v8981_v38 }
0x4ac3   :  { %2701 = vperm.xlu1 %6894, %v2699_v4   ;;  %v6131_v51 = vmul.f32 %v6123_v61, %v9598_v52  ;;  %v6014_v59 = vrot.slane %v8958_v56, %v7308_v3  ;;  %v6101_v46 = vsel %vm2586_vm5, %v6093_v32, %v5938_v37  ;;  %v5978_v50 = vrot.slane %v5690_v5, %v7308_v3 }
0x4ac4   :  { %6147 = vrot.lane.b32.xlu0 %v6129_v24, %s7216_s5  ;;  %v6114_v18 = vsel %vm2604_vm7, %v6106_v41, %v6006_v26  ;;  %v6054_v39 = vrot.slane %v8943_v45, %v7308_v3  ;;  %v5788_v38 = vcombine.high %v8961_v35, %v8961_v35  ;;  %v6018_v42 = vrot.slane %v5739_v34, %v7308_v3 }
0x4ac5   :  { %v6122_v23 = vsel %vm2613_vm8, %v6114_v18, %v6046_v63  ;;  %v6116_v6 = vsel %vm2604_vm7, %v6108_v62, %v6014_v59  ;;  %v6109_v48 = vsel %vm2595_vm6, %v6101_v46, %v5978_v50  ;;  %v9604_v29 = vlaneseq }
0x4ac6   :  { %v6130_v56 = vmul.f32 %v6122_v23, %v9598_v52  ;;  %v6124_v13 = vsel %vm2613_vm8, %v6116_v6, %v6054_v39  ;;  %v6117_v10 = vsel %vm2604_vm7, %v6109_v48, %v6018_v42  ;;  %v6058_v36 = vrot.slane %v5788_v38, %v7308_v3 }
0x4ac7   :  { %4444 = vperm.xlu1 %6894, %v7097_v49   ;;  %v6132_v43 = vmul.f32 %v6124_v13, %v9598_v52  ;;  %v2713_v33 = vand.u32 127, %v9604_v29  ;;  %vm4455_vm2 = vcmp.eq.s32.totalorder %v9261_v8, 1  ;;  %vm6203_vm3 = vcmp.eq.s32.totalorder %v9261_v8, 2 }
0x4ac8   :  { %6151 = vrot.lane.b32.xlu0 %v6131_v51, %s7216_s5  ;;  %v6125_v45 = vsel %vm2613_vm8, %v6117_v10, %v6058_v36  ;;  %vm6258_vm5 = vcmask 64512  }
0x4ac9   :  { %v6133_v35 = vmul.f32 %v6125_v45, %v9598_v52  ;;  %v9378_v44 = vsub.s32 %v2713_v33, %v9605_v9 }
0x4acc   :  { %6149 = vrot.lane.b32.xlu0 %v6130_v56, %s7216_s5 }
0x4ad0   :  { %6153 = vrot.lane.b32.xlu0 %v6132_v43, %s7216_s5 }
0x4ad4   :  { %6155 = vrot.lane.b32.xlu0 %v6133_v35, %s7216_s5 }
0x4ad9   :  { %v4427_v1 = vpop.xlane.xlu0 %4426 }
0x4add   :  { %v4430_v14 = vpop.xlane.xlu0 %4429 }
0x4ae3   :  { %v4424_v60 = vpop.xlane.xlu1 %4423 }
0x4b27   :  { %v4433_v54 = vpop.xlane.xlu0 %4432 }
0x4b2b   :  { %v4436_v0 = vpop.xlane.xlu1 %4435 }
0x4b2f   :  { %v4439_v4 = vpop.xlane.xlu0 %4438 }
0x4b33   :  { %v4442_v15 = vpop.xlane.xlu1 %4441 }
0x4b37   :  { %v6144_v17 = vpop.permute.xlu1 %6143  ;;  %v9370_v47 = vpop.permute.xlu0 %2687 }
0x4b38   :  { %v6167_v3 = vsel %vm192_vm1, %v6144_v17, 0.0 }
0x4b39   :  { %6168 = vadd.xlane.f32.xlu0 %v6167_v3 }
0x4b3b   :  { %v6158_v25 = vpop.permute.xlu1 %6157  ;;  %v6146_v11 = vpop.permute.xlu0 %6145 }
0x4b3c   :  { %v6170_v52 = vsel %vm192_vm1, %v6146_v11, 0.0  ;;  %v6188_v35 = vsel %vm192_vm1, %v6158_v25, 0.0 }
0x4b3d   :  { %6171 = vadd.xlane.f32.xlu1 %v6170_v52 }
0x4b3f   :  { %v9373_v30 = vpop.permute.xlu1 %2701  ;;  %v6148_v2 = vpop.permute.xlu0 %6147 }
0x4b40   :  { %v6173_v57 = vsel %vm192_vm1, %v6148_v2, 0.0  ;;  %v2697_v2 = vadd.f32 %v9370_v47, %v8842_v20 }
0x4b41   :  { %6174 = vadd.xlane.f32.xlu0 %v6173_v57 }
0x4b43   :  { %v4445_v22 = vpop.permute.xlu1 %4444  ;;  %v6152_v26 = vpop.permute.xlu0 %6151 }
0x4b44   :  { %v4447_v41 = vadd.f32 %v4445_v22, %v4421_v40  ;;  %v4448_v24 = vadd.f32 %v4445_v22, %v4424_v60  ;;  %v4449_v19 = vadd.f32 %v4445_v22, %v4427_v1  ;;  %v4450_v27 = vadd.f32 %v4445_v22, %v4430_v14  ;;  %v7098_v60 = vld [vmem:[%s9468_s11 + $0x2] ss:$0 sm:$0xff]  ;;  %s7220_s11 = smov [#allocation10]  }
0x4b45   :  { %v4451_v5 = vadd.f32 %v4445_v22, %v4433_v54  ;;  %v6179_v61 = vsel %vm192_vm1, %v6152_v26, 0.0  ;;  %v4452_v37 = vadd.f32 %v4445_v22, %v4436_v0  ;;  %v4453_v18 = vadd.f32 %v4445_v22, %v4439_v4  ;;  %s6266_s30 = sshll.u32 %s7220_s11, 4  ;;  %s6267_s30 = int_to_ptr.vmem [resolvable:$true] %s6266_s30 }
0x4b46   :  { %v4472_v53 = vrot.slane %v4447_v41, %v9378_v44  ;;  %v4476_v32 = vrot.slane %v4448_v24, %v9378_v44  ;;  %6180 = vadd.xlane.f32.xlu0 %v6179_v61  ;;  %v4480_v49 = vrot.slane %v4449_v19, %v9378_v44  ;;  %v4454_v63 = vadd.f32 %v4445_v22, %v4442_v15  ;;  %s7179_s13 = scalar_lea.vmem %s6267_s30, 128  ;;  %p7184_p7 = scmp.lt.s32.totalorder %s6267_s30, %s6267_s30 }
0x4b47   :  { %v4484_v62 = vrot.slane %v4450_v27, %v9378_v44  ;;  %v6150_v51 = vpop.permute.xlu0 %6149  ;;  %v4488_v59 = vrot.slane %v4451_v5, %v9378_v44  ;;  %v4492_v50 = vrot.slane %v4452_v37, %v9378_v44  ;;  %v4496_v39 = vrot.slane %v4453_v18, %v9378_v44  ;;  %p7180_p6 = scmp.ne.s32.totalorder %s6267_s30, %s7179_s13  ;;  %p7185_p8 = scmp.lt.s32.totalorder %s7179_s13, %s7179_s13 }
0x4b48   :  { %v4501_v34 = vsel %vm2746_vm10, %v4476_v32, %v4472_v53  ;;  %v6176_v23 = vsel %vm192_vm1, %v6150_v51, 0.0  ;;  %v4500_v48 = vrot.slane %v4454_v63, %v9378_v44  ;;  %v4456_v40 = vsel %vm4455_vm2, 1, %v9601_v31 }
0x4b49   :  { %v4502_v46 = vsel %vm2748_vm11, %v4480_v49, %v4501_v34  ;;  %6177 = vadd.xlane.f32.xlu1 %v6176_v23  ;;  %v6204_v1 = vsel %vm6203_vm3, 1, %v9601_v31  ;;  %v2690_v14 = vadd.f32 %v9370_v47, %v8801_v55  ;;  %v2691_v0 = vadd.f32 %v9370_v47, %v8810_v7  ;;  %p7186_p9 = por %p7185_p8, %p7184_p7 }
0x4b4a   :  { %v4503_v6 = vsel %vm2750_vm12, %v4484_v62, %v4502_v46  ;;  %v2692_v54 = vadd.f32 %v9370_v47, %v8815_v12  ;;  %v2693_v4 = vadd.f32 %v9370_v47, %v8832_v16  ;;  %v2694_v55 = vadd.f32 %v9370_v47, %v8922_v58 }
0x4b4b   :  { %v4504_v38 = vsel %vm2752_vm13, %v4488_v59, %v4503_v6  ;;  %v6154_v42 = vpop.permute.xlu0 %6153  ;;  %v2717_v8 = vrot.slane %v2690_v14, %v9378_v44  ;;  %v2721_v15 = vrot.slane %v2691_v0, %v9378_v44  ;;  %v2695_v12 = vadd.f32 %v9370_v47, %v8825_v28  ;;  %p7187_p10 = pnand %p7186_p9, %p7180_p6 }
0x4b4c   :  { %v4505_v56 = vsel %vm2754_vm14, %v4492_v50, %v4504_v38  ;;  %v6182_v10 = vsel %vm192_vm1, %v6154_v42, 0.0  ;;  %v2725_v31 = vrot.slane %v2692_v54, %v9378_v44  ;;  %v2729_v7 = vrot.slane %v2693_v4, %v9378_v44 }
0x4b4d   :  { %v4506_v13 = vsel %vm2756_vm15, %v4496_v39, %v4505_v56  ;;  %6183 = vadd.xlane.f32.xlu1 %v6182_v10  ;;  %v2747_v17 = vsel %vm2746_vm10, %v2721_v15, %v2717_v8  ;;  %v2733_v11 = vrot.slane %v2694_v55, %v9378_v44  ;;  %v2696_v16 = vadd.f32 %v9370_v47, %v8924_v21 }
0x4b4e   :  { %v4507_v36 = vsel %vm2758_vm0, %v4500_v48, %v4506_v13  ;;  %v2749_v3 = vsel %vm2748_vm11, %v2725_v31, %v2747_v17  ;;  %v2737_v58 = vrot.slane %v2695_v12, %v9378_v44  ;;  %v2745_v24 = vrot.slane %v2697_v2, %v9378_v44 }
0x4b4f   :  { %v6156_v43 = vpop.permute.xlu0 %6155  ;;  %v2751_v25 = vsel %vm2750_vm12, %v2729_v7, %v2749_v3  ;;  %v2741_v9 = vrot.slane %v2696_v16, %v9378_v44 }
0x4b50   :  { %v6185_v45 = vsel %vm192_vm1, %v6156_v43, 0.0  ;;  %v2753_v33 = vsel %vm2752_vm13, %v2733_v11, %v2751_v25  ;;  %vm2703_vm1 = vcmp.eq.s32.totalorder %v9373_v30, 1 }
0x4b51   :  { %6186 = vadd.xlane.f32.xlu0 %v6185_v45  ;;  %v2755_v57 = vsel %vm2754_vm14, %v2737_v58, %v2753_v33 }
0x4b52   :  { %v2757_v41 = vsel %vm2756_vm15, %v2741_v9, %v2755_v57 }
0x4b53   :  { %v2759_v21 = vsel %vm2758_vm0, %v2745_v24, %v2757_v41 }
0x4b54   :  { %v2761_v5 = vsel %vm2703_vm1, %v2759_v21, 0.0 }
0x4b55   :  { %6189 = vadd.xlane.f32.xlu0 %v6188_v35 }
0x4b5e   :  { %4458 = vperm.xlu1 %6894, %v4456_v40  }
0x4b62   :  { %6206 = vperm.xlu1 %6894, %v6204_v1  }
0x4b6b   :  { %6192 = vperm.xlu0 %6895, %v7098_v60  }
0x4bc2   :  { %v6169_v52 = vpop.xlane.xlu0 %6168 }
0x4bc6   :  { %v6172_v29 = vpop.xlane.xlu1 %6171 }
0x4bca   :  { %v6175_v22 = vpop.xlane.xlu0 %6174 }
0x4bcf   :  { %v6181_v26 = vpop.xlane.xlu0 %6180 }
0x4bd2   :  { %v6178_v28 = vpop.xlane.xlu1 %6177 }
0x4bd6   :  { %v6184_v19 = vpop.xlane.xlu1 %6183 }
0x4bda   :  { %v4459_v27 = vpop.permute.xlu1 %4458  ;;  %v6187_v20 = vpop.xlane.xlu0 %6186 }
0x4bdb   :  { %vm4460_vm4 = vcmp.eq.s32.totalorder %v4459_v27, 1 }
0x4bdc   :  { %v4509_v47 = vsel %vm4460_vm4, %v4507_v36, %v2761_v5 }
0x4bde   :  { %v6190_v61 = vpop.xlane.xlu0 %6189  ;;  %v6207_v56 = vpop.permute.xlu1 %6206 }
0x4bdf   :  { %vm6208_vm6 = vcmp.eq.s32.totalorder %v6207_v56, 1 }
0x4be6   :  { %v6193_v53 = vpop.permute.xlu0 %6192 }
0x4be7   :  { %v6195_v32 = vadd.f32 %v6193_v53, %v6169_v52  ;;  %v6196_v37 = vadd.f32 %v6193_v53, %v6172_v29  ;;  %v6197_v18 = vadd.f32 %v6193_v53, %v6175_v22  ;;  %v6198_v49 = vadd.f32 %v6193_v53, %v6178_v28 }
0x4be8   :  { %v6199_v63 = vadd.f32 %v6193_v53, %v6181_v26  ;;  %v6200_v62 = vadd.f32 %v6193_v53, %v6184_v19  ;;  %v6201_v30 = vadd.f32 %v6193_v53, %v6187_v20  ;;  %v6202_v23 = vadd.f32 %v6193_v53, %v6190_v61 }
0x4be9   :  { %v6220_v34 = vrot.slane %v6195_v32, %v9378_v44  ;;  %v6224_v51 = vrot.slane %v6196_v37, %v9378_v44  ;;  %v6228_v59 = vrot.slane %v6197_v18, %v9378_v44  ;;  %v6232_v46 = vrot.slane %v6198_v49, %v9378_v44 }
0x4bea   :  { %v6236_v6 = vrot.slane %v6199_v63, %v9378_v44  ;;  %v6240_v38 = vrot.slane %v6200_v62, %v9378_v44  ;;  %v6244_v42 = vrot.slane %v6201_v30, %v9378_v44  ;;  %v6248_v10 = vrot.slane %v6202_v23, %v9378_v44 }
0x4beb   :  { %v6249_v50 = vsel %vm2746_vm10, %v6224_v51, %v6220_v34 }
0x4bec   :  { %v6250_v39 = vsel %vm2748_vm11, %v6228_v59, %v6249_v50 }
0x4bed   :  { %v6251_v48 = vsel %vm2750_vm12, %v6232_v46, %v6250_v39 }
0x4bee   :  { %v6252_v13 = vsel %vm2752_vm13, %v6236_v6, %v6251_v48 }
0x4bef   :  { %v6253_v36 = vsel %vm2754_vm14, %v6240_v38, %v6252_v13 }
0x4bf0   :  { %v6254_v43 = vsel %vm2756_vm15, %v6244_v42, %v6253_v36 }
0x4bf1   :  { %v6255_v45 = vsel %vm2758_vm0, %v6248_v10, %v6254_v43 }
0x4bf2   :  { %v6257_v35 = vsel %vm6208_vm6, %v6255_v45, %v4509_v47 }
0x4bf3   :  { %6259 = vst.msk [vmem:[#allocation10] sm:$0xff] %vm6258_vm5, %v6257_v35 }
0x4bf4   :  { %7190 = shalt.err (!%p7187_p10)
}
0x4bf5   :  { %6269 = dma.vmem_to_hbm [thread:$0]  %s6267_s30, 128, %s9469_s12, [#allocation4]  }
0x4bf6   :  { %7205 = dma.done.wait [#allocation4], 128  }
0x4bf7   :  { %7206 = vsyncadd [#allocation4], 4294967168 }
0x4bf8   :  { %6273 = vsyncpa [#allocation3], 1 }
0x4bf9   :  { %6274 = vsyncpa [#allocation6], 1 }
0x4bfa   :  { %6275 = vsyncpa [#allocation9], 1 }
0x4bfb   :  { %6276 = vsyncpa [#allocation4], 1 }

</bundles_post_ra>
